<compile_context>
chip_gen: v7x
topology: tpu7x:2x2x1
jax: 0.10.0
libtpu: 0.0.40
codegen_flags: <defaults>
</compile_context>

<pallas_src>
import jax
import jax.numpy as jnp
from jax.experimental import pallas as pl
from jax.experimental.pallas import tpu as pltpu

IMG = (1, 28, 28)                       # image_size from the module
OUT_DIM = IMG[0] * IMG[1] * IMG[2]      # np.prod(image_size) = 784
OUT_PAD = 896                           # 7 * 128 -> lane-dense final layer / output
LAT_PAD = 128                           # latent padded to one full lane group
HIDDEN = (128, 256, 512, 1024)
BN_EPS = 1e-5


def _gelu(x):
    # tanh-approximate GELU: 0.5*x*(1 + tanh(sqrt(2/pi)*(x + 0.044715*x^3))).
    # EUP tanh + ~6 VALU ops; error well below the bf16-weight noise floor.
    c = 0.7978845608028654
    return 0.5 * x * (1.0 + jnp.tanh(c * (x + 0.044715 * (x * x * x))))


def _linear_bn_gelu(h_bf16, w_ref, p_ref):
    """h_bf16: (B, K) bf16.  w_ref: (K, N) bf16.  p_ref: (2, N) f32 = [gamma; beta]."""
    gamma = p_ref[0:1, :]
    beta = p_ref[1:2, :]

    # Linear bias omitted: training-mode BN subtracts the batch mean -> exact cancel.
    y = jnp.dot(h_bf16, w_ref[...], preferred_element_type=jnp.float32)

    # nn.BatchNorm1d training mode: batch statistics over axis 0, biased variance.
    inv_n = 1.0 / y.shape[0]
    mean = jnp.sum(y, axis=0, keepdims=True) * inv_n
    ex2 = jnp.sum(y * y, axis=0, keepdims=True) * inv_n
    var = jnp.maximum(ex2 - mean * mean, 0.0)        # guard single-pass cancellation
    scale = gamma * jax.lax.rsqrt(var + BN_EPS)      # (1, N)
    shift = beta - mean * scale                      # (1, N)
    y = y * scale + shift                            # one FMA on the (B, N) tensor

    # TODO(synk): on v6e/v7x run the GELU in bf16 (bf16 VPU/EUP); f32 kept for v5e.
    return _gelu(y).astype(jnp.bfloat16)


def generator1_kernel(z_ref,
                      w1, p1, w2, p2, w3, p3, w4_hbm, p4, w5_hbm, b5,
                      out_ref,
                      w4_vmem, w5_vmem, sem):
    # Kick off the two big weight DMAs (w4: 1 MB, w5: 1.75 MB bf16) immediately so
    # they overlap with layers 1-3's compute instead of serializing before it.
    cp4 = pltpu.make_async_copy(w4_hbm, w4_vmem, sem.at[0])
    cp5 = pltpu.make_async_copy(w5_hbm, w5_vmem, sem.at[1])
    cp4.start()
    cp5.start()

    h = z_ref[...].astype(jnp.bfloat16)              # (B, 128): latent zero-padded
    h = _linear_bn_gelu(h, w1, p1)                   # (B, 128)
    h = _linear_bn_gelu(h, w2, p2)                   # (B, 256)
    h = _linear_bn_gelu(h, w3, p3)                   # (B, 512)

    cp4.wait()
    h = _linear_bn_gelu(h, w4_vmem, p4)              # (B, 1024)

    cp5.wait()
    logits = jnp.dot(h, w5_vmem[...],
                     preferred_element_type=jnp.float32) + b5[...]   # (B, 896)
    # Exact sigmoid (true divide on a small tensor) so the output stays in [0, 1].
    out_ref[...] = 1.0 / (1.0 + jnp.exp(-logits))


def init_params(key, latent_dim):
    """Deterministic synthetic parameters with the module's Linear/BN shapes.

    Weights -> bf16; per-layer BN (gamma, beta) packed into one (2, N) f32 array
    (Linear biases of layers 1-4 are cancelled by training-mode BN and dropped);
    layer-1 weight rows padded to LAT_PAD, layer-5 columns padded to OUT_PAD.
    """
    dims = [latent_dim] + list(HIDDEN) + [OUT_DIM]
    params = []
    for i in range(5):
        fan_in, fan_out = dims[i], dims[i + 1]
        key, kw, kb = jax.random.split(key, 3)
        bound = 1.0 / (fan_in ** 0.5)            # PyTorch Linear default-init range
        w = jax.random.uniform(kw, (fan_in, fan_out), jnp.float32, -bound, bound)
        b = jax.random.uniform(kb, (1, fan_out), jnp.float32, -bound, bound)
        if i == 0:
            w = jnp.pad(w, ((0, LAT_PAD - fan_in), (0, 0)))   # matches zero-padded z
        if i < 4:
            packed = jnp.concatenate(
                [jnp.ones((1, fan_out), jnp.float32),          # BN gamma (weight) = 1
                 jnp.zeros((1, fan_out), jnp.float32)],        # BN beta  (bias)   = 0
                axis=0)                                        # (2, N) f32
            params += [w.astype(jnp.bfloat16), packed]
        else:
            w = jnp.pad(w, ((0, 0), (0, OUT_PAD - OUT_DIM)))   # lane-dense final layer
            b = jnp.pad(b, ((0, 0), (0, OUT_PAD - OUT_DIM)))
            params += [w.astype(jnp.bfloat16), b]
    return params


def _vmem_limit_bytes():
    try:
        cap = pltpu.get_tpu_info().vmem_capacity_bytes
    except Exception:
        cap = 64 * 1024 * 1024
    # ~96 MiB on v5e/v6e (128 MiB physical), ~48 MiB on v7x (64 MiB physical).
    return int(min(100 * 1024 * 1024, cap * 3 // 4))


def generator1_forward(z, params):
    """Forward pass.  For best MXU fill, call with B a multiple of 256 (v6e/v7x)
    or 128 (v5e); small batches are latency/overhead-bound."""
    B, latent = z.shape
    z_pad = jnp.pad(z, ((0, 0), (0, LAT_PAD - latent))) if latent < LAT_PAD else z

    in_specs = [pl.BlockSpec(memory_space=pltpu.MemorySpace.VMEM)] * 11
    in_specs[7] = pl.BlockSpec(memory_space=pl.ANY)   # w4: manual DMA inside kernel
    in_specs[9] = pl.BlockSpec(memory_space=pl.ANY)   # w5: manual DMA inside kernel

    out = pl.pallas_call(
        generator1_kernel,
        out_shape=jax.ShapeDtypeStruct((B, OUT_PAD), jnp.float32),
        in_specs=in_specs,
        out_specs=pl.BlockSpec(memory_space=pltpu.MemorySpace.VMEM),
        scratch_shapes=[
            pltpu.VMEM((HIDDEN[2], HIDDEN[3]), jnp.bfloat16),   # w4 landing buffer
            pltpu.VMEM((HIDDEN[3], OUT_PAD), jnp.bfloat16),     # w5 landing buffer
            pltpu.SemaphoreType.DMA((2,)),
        ],
        compiler_params=pltpu.CompilerParams(
            vmem_limit_bytes=_vmem_limit_bytes()),
    )(z_pad, *params)
    # output = model(z).reshape(B, 1, 28, 28)  (NCHW); drop the lane padding.
    return out[:, :OUT_DIM].reshape(B, *IMG)


if __name__ == "__main__":
    latent_dim = 32
    batch = 8          # >= 2 so training-mode BatchNorm1d is well defined

    key = jax.random.PRNGKey(0)
    kz, kp = jax.random.split(key)
    z = jax.random.normal(kz, (batch, latent_dim), jnp.float32)
    params = init_params(kp, latent_dim)

    img = generator1_forward(z, params)
    jax.block_until_ready(img)

    assert img.shape == (batch, 1, 28, 28), img.shape
    assert img.dtype == jnp.float32
    assert bool(jnp.all(jnp.isfinite(img)))
    assert bool(jnp.all((img >= 0.0) & (img <= 1.0)))   # sigmoid range (exact divide)
    print("KERNEL_OK")
</pallas_src>

<mosaic_0001>
module attributes {stable_mosaic.version = 11 : i64} {
  func.func @generator1_kernel(%arg0: memref<8x128xf32, #tpu.memory_space<vmem>>, %arg1: memref<128x128xbf16, #tpu.memory_space<vmem>>, %arg2: memref<2x128xf32, #tpu.memory_space<vmem>>, %arg3: memref<128x256xbf16, #tpu.memory_space<vmem>>, %arg4: memref<2x256xf32, #tpu.memory_space<vmem>>, %arg5: memref<256x512xbf16, #tpu.memory_space<vmem>>, %arg6: memref<2x512xf32, #tpu.memory_space<vmem>>, %arg7: memref<512x1024xbf16, #tpu.memory_space<any>>, %arg8: memref<2x1024xf32, #tpu.memory_space<vmem>>, %arg9: memref<1024x896xbf16, #tpu.memory_space<any>>, %arg10: memref<1x896xf32, #tpu.memory_space<vmem>>, %arg11: memref<8x896xf32, #tpu.memory_space<vmem>>, %arg12: memref<512x1024xbf16, #tpu.memory_space<vmem>>, %arg13: memref<1024x896xbf16, #tpu.memory_space<vmem>>, %arg14: memref<2x!tpu.dma_semaphore, #tpu.memory_space<semaphore_mem>>) attributes {dimension_semantics = [], scalar_prefetch = 0 : i64, scratch_operands = 3 : i64, tpu.core_type = #tpu.core_type<tc>} {
    %c0_i32 = arith.constant 0 : i32
    %0 = tpu.memref_slice %arg14[%c0_i32] : memref<2x!tpu.dma_semaphore, #tpu.memory_space<semaphore_mem>> -> memref<1x!tpu.dma_semaphore, #tpu.memory_space<semaphore_mem>>
    %1 = tpu.memref_squeeze %0 : memref<1x!tpu.dma_semaphore, #tpu.memory_space<semaphore_mem>> -> memref<!tpu.dma_semaphore, #tpu.memory_space<semaphore_mem>>
    tpu.enqueue_dma source(%arg7 : memref<512x1024xbf16, #tpu.memory_space<any>>) target(%arg12 : memref<512x1024xbf16, #tpu.memory_space<vmem>>) target_semaphore(%1 : memref<!tpu.dma_semaphore, #tpu.memory_space<semaphore_mem>>)
    %c1_i32 = arith.constant 1 : i32
    %2 = tpu.memref_slice %arg14[%c1_i32] : memref<2x!tpu.dma_semaphore, #tpu.memory_space<semaphore_mem>> -> memref<1x!tpu.dma_semaphore, #tpu.memory_space<semaphore_mem>>
    %3 = tpu.memref_squeeze %2 : memref<1x!tpu.dma_semaphore, #tpu.memory_space<semaphore_mem>> -> memref<!tpu.dma_semaphore, #tpu.memory_space<semaphore_mem>>
    tpu.enqueue_dma source(%arg9 : memref<1024x896xbf16, #tpu.memory_space<any>>) target(%arg13 : memref<1024x896xbf16, #tpu.memory_space<vmem>>) target_semaphore(%3 : memref<!tpu.dma_semaphore, #tpu.memory_space<semaphore_mem>>)
    %c0 = arith.constant 0 : index
    %c0_0 = arith.constant 0 : index
    %4 = vector.load %arg0[%c0, %c0_0] : memref<8x128xf32, #tpu.memory_space<vmem>>, vector<8x128xf32>
    %5 = arith.truncf %4 : vector<8x128xf32> to vector<8x128xbf16>
    %c0_1 = arith.constant 0 : index
    %c0_2 = arith.constant 0 : index
    %6 = vector.load %arg2[%c0_1, %c0_2] : memref<2x128xf32, #tpu.memory_space<vmem>>, vector<1x128xf32>
    %c1 = arith.constant 1 : index
    %c0_3 = arith.constant 0 : index
    %7 = vector.load %arg2[%c1, %c0_3] : memref<2x128xf32, #tpu.memory_space<vmem>>, vector<1x128xf32>
    %c0_4 = arith.constant 0 : index
    %c0_5 = arith.constant 0 : index
    %8 = vector.load %arg1[%c0_4, %c0_5] : memref<128x128xbf16, #tpu.memory_space<vmem>>, vector<128x128xbf16>
    %cst = arith.constant dense<0.000000e+00> : vector<8x128xf32>
    %9 = tpu.matmul %5, %8, %cst {dimension_numbers = #tpu.dot_dimension_numbers<[1], [0], [0], [1], [0, 0, 1, 1], [], []>} : vector<8x128xbf16>, vector<128x128xbf16>, vector<8x128xf32> -> vector<8x128xf32>
    %cst_6 = arith.constant dense<0.000000e+00> : vector<128xf32>
    %10 = vector.multi_reduction <add>, %9, %cst_6 [0] : vector<8x128xf32> to vector<128xf32>
    %11 = vector.shape_cast %10 : vector<128xf32> to vector<1x128xf32>
    %cst_7 = arith.constant 1.250000e-01 : f32
    %12 = vector.broadcast %cst_7 : f32 to vector<1x128xf32>
    %13 = arith.mulf %11, %12 : vector<1x128xf32>
    %14 = arith.mulf %9, %9 : vector<8x128xf32>
    %cst_8 = arith.constant dense<0.000000e+00> : vector<128xf32>
    %15 = vector.multi_reduction <add>, %14, %cst_8 [0] : vector<8x128xf32> to vector<128xf32>
    %16 = vector.shape_cast %15 : vector<128xf32> to vector<1x128xf32>
    %cst_9 = arith.constant 1.250000e-01 : f32
    %17 = vector.broadcast %cst_9 : f32 to vector<1x128xf32>
    %18 = arith.mulf %16, %17 : vector<1x128xf32>
    %19 = arith.mulf %13, %13 : vector<1x128xf32>
    %20 = arith.subf %18, %19 : vector<1x128xf32>
    %cst_10 = arith.constant 0.000000e+00 : f32
    %21 = vector.broadcast %cst_10 : f32 to vector<1x128xf32>
    %22 = arith.maximumf %20, %21 : vector<1x128xf32>
    %cst_11 = arith.constant 9.99999974E-6 : f32
    %23 = vector.broadcast %cst_11 : f32 to vector<1x128xf32>
    %24 = arith.addf %22, %23 : vector<1x128xf32>
    %25 = math.rsqrt %24 : vector<1x128xf32>
    %26 = arith.mulf %6, %25 : vector<1x128xf32>
    %27 = arith.mulf %13, %26 : vector<1x128xf32>
    %28 = arith.subf %7, %27 : vector<1x128xf32>
    %29 = vector.broadcast %26 : vector<1x128xf32> to vector<8x128xf32>
    %30 = arith.mulf %9, %29 : vector<8x128xf32>
    %31 = vector.broadcast %28 : vector<1x128xf32> to vector<8x128xf32>
    %32 = arith.addf %30, %31 : vector<8x128xf32>
    %cst_12 = arith.constant 5.000000e-01 : f32
    %33 = vector.broadcast %cst_12 : f32 to vector<8x128xf32>
    %34 = arith.mulf %33, %32 : vector<8x128xf32>
    %35 = arith.mulf %32, %32 : vector<8x128xf32>
    %36 = arith.mulf %35, %32 : vector<8x128xf32>
    %cst_13 = arith.constant 4.471500e-02 : f32
    %37 = vector.broadcast %cst_13 : f32 to vector<8x128xf32>
    %38 = arith.mulf %37, %36 : vector<8x128xf32>
    %39 = arith.addf %32, %38 : vector<8x128xf32>
    %cst_14 = arith.constant 0.797884583 : f32
    %40 = vector.broadcast %cst_14 : f32 to vector<8x128xf32>
    %41 = arith.mulf %40, %39 : vector<8x128xf32>
    %42 = math.tanh %41 : vector<8x128xf32>
    %cst_15 = arith.constant 1.000000e+00 : f32
    %43 = vector.broadcast %cst_15 : f32 to vector<8x128xf32>
    %44 = arith.addf %43, %42 : vector<8x128xf32>
    %45 = arith.mulf %34, %44 : vector<8x128xf32>
    %46 = arith.truncf %45 : vector<8x128xf32> to vector<8x128xbf16>
    %c0_16 = arith.constant 0 : index
    %c0_17 = arith.constant 0 : index
    %47 = vector.load %arg4[%c0_16, %c0_17] : memref<2x256xf32, #tpu.memory_space<vmem>>, vector<1x256xf32>
    %c1_18 = arith.constant 1 : index
    %c0_19 = arith.constant 0 : index
    %48 = vector.load %arg4[%c1_18, %c0_19] : memref<2x256xf32, #tpu.memory_space<vmem>>, vector<1x256xf32>
    %c0_20 = arith.constant 0 : index
    %c0_21 = arith.constant 0 : index
    %49 = vector.load %arg3[%c0_20, %c0_21] : memref<128x256xbf16, #tpu.memory_space<vmem>>, vector<128x256xbf16>
    %cst_22 = arith.constant dense<0.000000e+00> : vector<8x256xf32>
    %50 = tpu.matmul %46, %49, %cst_22 {dimension_numbers = #tpu.dot_dimension_numbers<[1], [0], [0], [1], [0, 0, 1, 1], [], []>} : vector<8x128xbf16>, vector<128x256xbf16>, vector<8x256xf32> -> vector<8x256xf32>
    %cst_23 = arith.constant dense<0.000000e+00> : vector<256xf32>
    %51 = vector.multi_reduction <add>, %50, %cst_23 [0] : vector<8x256xf32> to vector<256xf32>
    %52 = vector.shape_cast %51 : vector<256xf32> to vector<1x256xf32>
    %cst_24 = arith.constant 1.250000e-01 : f32
    %53 = vector.broadcast %cst_24 : f32 to vector<1x256xf32>
    %54 = arith.mulf %52, %53 : vector<1x256xf32>
    %55 = arith.mulf %50, %50 : vector<8x256xf32>
    %cst_25 = arith.constant dense<0.000000e+00> : vector<256xf32>
    %56 = vector.multi_reduction <add>, %55, %cst_25 [0] : vector<8x256xf32> to vector<256xf32>
    %57 = vector.shape_cast %56 : vector<256xf32> to vector<1x256xf32>
    %cst_26 = arith.constant 1.250000e-01 : f32
    %58 = vector.broadcast %cst_26 : f32 to vector<1x256xf32>
    %59 = arith.mulf %57, %58 : vector<1x256xf32>
    %60 = arith.mulf %54, %54 : vector<1x256xf32>
    %61 = arith.subf %59, %60 : vector<1x256xf32>
    %cst_27 = arith.constant 0.000000e+00 : f32
    %62 = vector.broadcast %cst_27 : f32 to vector<1x256xf32>
    %63 = arith.maximumf %61, %62 : vector<1x256xf32>
    %cst_28 = arith.constant 9.99999974E-6 : f32
    %64 = vector.broadcast %cst_28 : f32 to vector<1x256xf32>
    %65 = arith.addf %63, %64 : vector<1x256xf32>
    %66 = math.rsqrt %65 : vector<1x256xf32>
    %67 = arith.mulf %47, %66 : vector<1x256xf32>
    %68 = arith.mulf %54, %67 : vector<1x256xf32>
    %69 = arith.subf %48, %68 : vector<1x256xf32>
    %70 = vector.broadcast %67 : vector<1x256xf32> to vector<8x256xf32>
    %71 = arith.mulf %50, %70 : vector<8x256xf32>
    %72 = vector.broadcast %69 : vector<1x256xf32> to vector<8x256xf32>
    %73 = arith.addf %71, %72 : vector<8x256xf32>
    %cst_29 = arith.constant 5.000000e-01 : f32
    %74 = vector.broadcast %cst_29 : f32 to vector<8x256xf32>
    %75 = arith.mulf %74, %73 : vector<8x256xf32>
    %76 = arith.mulf %73, %73 : vector<8x256xf32>
    %77 = arith.mulf %76, %73 : vector<8x256xf32>
    %cst_30 = arith.constant 4.471500e-02 : f32
    %78 = vector.broadcast %cst_30 : f32 to vector<8x256xf32>
    %79 = arith.mulf %78, %77 : vector<8x256xf32>
    %80 = arith.addf %73, %79 : vector<8x256xf32>
    %cst_31 = arith.constant 0.797884583 : f32
    %81 = vector.broadcast %cst_31 : f32 to vector<8x256xf32>
    %82 = arith.mulf %81, %80 : vector<8x256xf32>
    %83 = math.tanh %82 : vector<8x256xf32>
    %cst_32 = arith.constant 1.000000e+00 : f32
    %84 = vector.broadcast %cst_32 : f32 to vector<8x256xf32>
    %85 = arith.addf %84, %83 : vector<8x256xf32>
    %86 = arith.mulf %75, %85 : vector<8x256xf32>
    %87 = arith.truncf %86 : vector<8x256xf32> to vector<8x256xbf16>
    %c0_33 = arith.constant 0 : index
    %c0_34 = arith.constant 0 : index
    %88 = vector.load %arg6[%c0_33, %c0_34] : memref<2x512xf32, #tpu.memory_space<vmem>>, vector<1x512xf32>
    %c1_35 = arith.constant 1 : index
    %c0_36 = arith.constant 0 : index
    %89 = vector.load %arg6[%c1_35, %c0_36] : memref<2x512xf32, #tpu.memory_space<vmem>>, vector<1x512xf32>
    %c0_37 = arith.constant 0 : index
    %c0_38 = arith.constant 0 : index
    %90 = vector.load %arg5[%c0_37, %c0_38] : memref<256x512xbf16, #tpu.memory_space<vmem>>, vector<256x512xbf16>
    %cst_39 = arith.constant dense<0.000000e+00> : vector<8x512xf32>
    %91 = tpu.matmul %87, %90, %cst_39 {dimension_numbers = #tpu.dot_dimension_numbers<[1], [0], [0], [1], [0, 0, 1, 1], [], []>} : vector<8x256xbf16>, vector<256x512xbf16>, vector<8x512xf32> -> vector<8x512xf32>
    %cst_40 = arith.constant dense<0.000000e+00> : vector<512xf32>
    %92 = vector.multi_reduction <add>, %91, %cst_40 [0] : vector<8x512xf32> to vector<512xf32>
    %93 = vector.shape_cast %92 : vector<512xf32> to vector<1x512xf32>
    %cst_41 = arith.constant 1.250000e-01 : f32
    %94 = vector.broadcast %cst_41 : f32 to vector<1x512xf32>
    %95 = arith.mulf %93, %94 : vector<1x512xf32>
    %96 = arith.mulf %91, %91 : vector<8x512xf32>
    %cst_42 = arith.constant dense<0.000000e+00> : vector<512xf32>
    %97 = vector.multi_reduction <add>, %96, %cst_42 [0] : vector<8x512xf32> to vector<512xf32>
    %98 = vector.shape_cast %97 : vector<512xf32> to vector<1x512xf32>
    %cst_43 = arith.constant 1.250000e-01 : f32
    %99 = vector.broadcast %cst_43 : f32 to vector<1x512xf32>
    %100 = arith.mulf %98, %99 : vector<1x512xf32>
    %101 = arith.mulf %95, %95 : vector<1x512xf32>
    %102 = arith.subf %100, %101 : vector<1x512xf32>
    %cst_44 = arith.constant 0.000000e+00 : f32
    %103 = vector.broadcast %cst_44 : f32 to vector<1x512xf32>
    %104 = arith.maximumf %102, %103 : vector<1x512xf32>
    %cst_45 = arith.constant 9.99999974E-6 : f32
    %105 = vector.broadcast %cst_45 : f32 to vector<1x512xf32>
    %106 = arith.addf %104, %105 : vector<1x512xf32>
    %107 = math.rsqrt %106 : vector<1x512xf32>
    %108 = arith.mulf %88, %107 : vector<1x512xf32>
    %109 = arith.mulf %95, %108 : vector<1x512xf32>
    %110 = arith.subf %89, %109 : vector<1x512xf32>
    %111 = vector.broadcast %108 : vector<1x512xf32> to vector<8x512xf32>
    %112 = arith.mulf %91, %111 : vector<8x512xf32>
    %113 = vector.broadcast %110 : vector<1x512xf32> to vector<8x512xf32>
    %114 = arith.addf %112, %113 : vector<8x512xf32>
    %cst_46 = arith.constant 5.000000e-01 : f32
    %115 = vector.broadcast %cst_46 : f32 to vector<8x512xf32>
    %116 = arith.mulf %115, %114 : vector<8x512xf32>
    %117 = arith.mulf %114, %114 : vector<8x512xf32>
    %118 = arith.mulf %117, %114 : vector<8x512xf32>
    %cst_47 = arith.constant 4.471500e-02 : f32
    %119 = vector.broadcast %cst_47 : f32 to vector<8x512xf32>
    %120 = arith.mulf %119, %118 : vector<8x512xf32>
    %121 = arith.addf %114, %120 : vector<8x512xf32>
    %cst_48 = arith.constant 0.797884583 : f32
    %122 = vector.broadcast %cst_48 : f32 to vector<8x512xf32>
    %123 = arith.mulf %122, %121 : vector<8x512xf32>
    %124 = math.tanh %123 : vector<8x512xf32>
    %cst_49 = arith.constant 1.000000e+00 : f32
    %125 = vector.broadcast %cst_49 : f32 to vector<8x512xf32>
    %126 = arith.addf %125, %124 : vector<8x512xf32>
    %127 = arith.mulf %116, %126 : vector<8x512xf32>
    %128 = arith.truncf %127 : vector<8x512xf32> to vector<8x512xbf16>
    %c0_i32_50 = arith.constant 0 : i32
    %129 = tpu.memref_slice %arg14[%c0_i32_50] : memref<2x!tpu.dma_semaphore, #tpu.memory_space<semaphore_mem>> -> memref<1x!tpu.dma_semaphore, #tpu.memory_space<semaphore_mem>>
    %130 = tpu.memref_squeeze %129 : memref<1x!tpu.dma_semaphore, #tpu.memory_space<semaphore_mem>> -> memref<!tpu.dma_semaphore, #tpu.memory_space<semaphore_mem>>
    tpu.wait_dma2 semaphore(%130 : memref<!tpu.dma_semaphore, #tpu.memory_space<semaphore_mem>>) src(%arg7 : memref<512x1024xbf16, #tpu.memory_space<any>>) dst(%arg12 : memref<512x1024xbf16, #tpu.memory_space<vmem>>)
    %c0_51 = arith.constant 0 : index
    %c0_52 = arith.constant 0 : index
    %131 = vector.load %arg8[%c0_51, %c0_52] : memref<2x1024xf32, #tpu.memory_space<vmem>>, vector<1x1024xf32>
    %c1_53 = arith.constant 1 : index
    %c0_54 = arith.constant 0 : index
    %132 = vector.load %arg8[%c1_53, %c0_54] : memref<2x1024xf32, #tpu.memory_space<vmem>>, vector<1x1024xf32>
    %c0_55 = arith.constant 0 : index
    %c0_56 = arith.constant 0 : index
    %133 = vector.load %arg12[%c0_55, %c0_56] : memref<512x1024xbf16, #tpu.memory_space<vmem>>, vector<512x1024xbf16>
    %cst_57 = arith.constant dense<0.000000e+00> : vector<8x1024xf32>
    %134 = tpu.matmul %128, %133, %cst_57 {dimension_numbers = #tpu.dot_dimension_numbers<[1], [0], [0], [1], [0, 0, 1, 1], [], []>} : vector<8x512xbf16>, vector<512x1024xbf16>, vector<8x1024xf32> -> vector<8x1024xf32>
    %cst_58 = arith.constant dense<0.000000e+00> : vector<1024xf32>
    %135 = vector.multi_reduction <add>, %134, %cst_58 [0] : vector<8x1024xf32> to vector<1024xf32>
    %136 = vector.shape_cast %135 : vector<1024xf32> to vector<1x1024xf32>
    %cst_59 = arith.constant 1.250000e-01 : f32
    %137 = vector.broadcast %cst_59 : f32 to vector<1x1024xf32>
    %138 = arith.mulf %136, %137 : vector<1x1024xf32>
    %139 = arith.mulf %134, %134 : vector<8x1024xf32>
    %cst_60 = arith.constant dense<0.000000e+00> : vector<1024xf32>
    %140 = vector.multi_reduction <add>, %139, %cst_60 [0] : vector<8x1024xf32> to vector<1024xf32>
    %141 = vector.shape_cast %140 : vector<1024xf32> to vector<1x1024xf32>
    %cst_61 = arith.constant 1.250000e-01 : f32
    %142 = vector.broadcast %cst_61 : f32 to vector<1x1024xf32>
    %143 = arith.mulf %141, %142 : vector<1x1024xf32>
    %144 = arith.mulf %138, %138 : vector<1x1024xf32>
    %145 = arith.subf %143, %144 : vector<1x1024xf32>
    %cst_62 = arith.constant 0.000000e+00 : f32
    %146 = vector.broadcast %cst_62 : f32 to vector<1x1024xf32>
    %147 = arith.maximumf %145, %146 : vector<1x1024xf32>
    %cst_63 = arith.constant 9.99999974E-6 : f32
    %148 = vector.broadcast %cst_63 : f32 to vector<1x1024xf32>
    %149 = arith.addf %147, %148 : vector<1x1024xf32>
    %150 = math.rsqrt %149 : vector<1x1024xf32>
    %151 = arith.mulf %131, %150 : vector<1x1024xf32>
    %152 = arith.mulf %138, %151 : vector<1x1024xf32>
    %153 = arith.subf %132, %152 : vector<1x1024xf32>
    %154 = vector.broadcast %151 : vector<1x1024xf32> to vector<8x1024xf32>
    %155 = arith.mulf %134, %154 : vector<8x1024xf32>
    %156 = vector.broadcast %153 : vector<1x1024xf32> to vector<8x1024xf32>
    %157 = arith.addf %155, %156 : vector<8x1024xf32>
    %cst_64 = arith.constant 5.000000e-01 : f32
    %158 = vector.broadcast %cst_64 : f32 to vector<8x1024xf32>
    %159 = arith.mulf %158, %157 : vector<8x1024xf32>
    %160 = arith.mulf %157, %157 : vector<8x1024xf32>
    %161 = arith.mulf %160, %157 : vector<8x1024xf32>
    %cst_65 = arith.constant 4.471500e-02 : f32
    %162 = vector.broadcast %cst_65 : f32 to vector<8x1024xf32>
    %163 = arith.mulf %162, %161 : vector<8x1024xf32>
    %164 = arith.addf %157, %163 : vector<8x1024xf32>
    %cst_66 = arith.constant 0.797884583 : f32
    %165 = vector.broadcast %cst_66 : f32 to vector<8x1024xf32>
    %166 = arith.mulf %165, %164 : vector<8x1024xf32>
    %167 = math.tanh %166 : vector<8x1024xf32>
    %cst_67 = arith.constant 1.000000e+00 : f32
    %168 = vector.broadcast %cst_67 : f32 to vector<8x1024xf32>
    %169 = arith.addf %168, %167 : vector<8x1024xf32>
    %170 = arith.mulf %159, %169 : vector<8x1024xf32>
    %171 = arith.truncf %170 : vector<8x1024xf32> to vector<8x1024xbf16>
    %c1_i32_68 = arith.constant 1 : i32
    %172 = tpu.memref_slice %arg14[%c1_i32_68] : memref<2x!tpu.dma_semaphore, #tpu.memory_space<semaphore_mem>> -> memref<1x!tpu.dma_semaphore, #tpu.memory_space<semaphore_mem>>
    %173 = tpu.memref_squeeze %172 : memref<1x!tpu.dma_semaphore, #tpu.memory_space<semaphore_mem>> -> memref<!tpu.dma_semaphore, #tpu.memory_space<semaphore_mem>>
    tpu.wait_dma2 semaphore(%173 : memref<!tpu.dma_semaphore, #tpu.memory_space<semaphore_mem>>) src(%arg9 : memref<1024x896xbf16, #tpu.memory_space<any>>) dst(%arg13 : memref<1024x896xbf16, #tpu.memory_space<vmem>>)
    %c0_69 = arith.constant 0 : index
    %c0_70 = arith.constant 0 : index
    %174 = vector.load %arg13[%c0_69, %c0_70] : memref<1024x896xbf16, #tpu.memory_space<vmem>>, vector<1024x896xbf16>
    %cst_71 = arith.constant dense<0.000000e+00> : vector<8x896xf32>
    %175 = tpu.matmul %171, %174, %cst_71 {dimension_numbers = #tpu.dot_dimension_numbers<[1], [0], [0], [1], [0, 0, 1, 1], [], []>} : vector<8x1024xbf16>, vector<1024x896xbf16>, vector<8x896xf32> -> vector<8x896xf32>
    %c0_72 = arith.constant 0 : index
    %c0_73 = arith.constant 0 : index
    %176 = vector.load %arg10[%c0_72, %c0_73] : memref<1x896xf32, #tpu.memory_space<vmem>>, vector<1x896xf32>
    %177 = vector.broadcast %176 : vector<1x896xf32> to vector<8x896xf32>
    %178 = arith.addf %175, %177 : vector<8x896xf32>
    %cst_74 = arith.constant 0.000000e+00 : f32
    %179 = vector.broadcast %cst_74 : f32 to vector<8x896xf32>
    %180 = arith.subf %179, %178 : vector<8x896xf32>
    %181 = math.exp %180 : vector<8x896xf32>
    %cst_75 = arith.constant 1.000000e+00 : f32
    %182 = vector.broadcast %cst_75 : f32 to vector<8x896xf32>
    %183 = arith.addf %182, %181 : vector<8x896xf32>
    %cst_76 = arith.constant 1.000000e+00 : f32
    %184 = vector.broadcast %cst_76 : f32 to vector<8x896xf32>
    %185 = arith.divf %184, %183 : vector<8x896xf32>
    %c0_77 = arith.constant 0 : index
    %c0_78 = arith.constant 0 : index
    %186 = vector.load %arg11[%c0_77, %c0_78] : memref<8x896xf32, #tpu.memory_space<vmem>>, vector<8x896xf32>
    tpu.vector_store %arg11[%c0_77, %c0_78], %185 {strides = array<i32>} : memref<8x896xf32, #tpu.memory_space<vmem>>, vector<8x896xf32>,
    return
  }
}

</mosaic_0001>

<bundles_post_ra>
// kernel: tpu_custom_call.1
= control target key start
LH: loop header
LB: loop body
LE: loop exit
PB: predicated region body
PF: predicated region fallthrough
CT: control target
= control target key end

     0   :  { %16 = vsyncpa [#allocation6], 0  ;;  %s4926_s0 = inlined_call_operand.hbm [shape: f32[8,128], index: 0, kind: input, shape index: {}]   ;;  %s4927_s1 = inlined_call_operand.hbm [shape: bf16[128,128], index: 1, kind: input, shape index: {}]   ;;  %s4928_s2 = inlined_call_operand.hbm [shape: f32[2,128], index: 2, kind: input, shape index: {}]   ;;  %s4929_s3 = inlined_call_operand.hbm [shape: bf16[128,256], index: 3, kind: input, shape index: {}]   ;;  %s4930_s4 = inlined_call_operand.hbm [shape: f32[2,256], index: 4, kind: input, shape index: {}]   ;;  %s4931_s5 = inlined_call_operand.hbm [shape: bf16[256,512], index: 5, kind: input, shape index: {}]   ;;  %s4932_s6 = inlined_call_operand.hbm [shape: f32[2,512], index: 6, kind: input, shape index: {}]   ;;  %s4933_s7 = inlined_call_operand.hbm [shape: bf16[512,1024], index: 7, kind: input, shape index: {}]   ;;  %s4934_s8 = inlined_call_operand.hbm [shape: f32[2,1024], index: 8, kind: input, shape index: {}]   ;;  %s4935_s9 = inlined_call_operand.hbm [shape: bf16[1024,896], index: 9, kind: input, shape index: {}]   ;;  %s4936_s10 = inlined_call_operand.hbm [shape: f32[1,896], index: 10, kind: input, shape index: {}]   ;;  %s4937_s11 = inlined_call_operand.hbm [shape: f32[8,896], index: 11, kind: output, shape index: {}]  }
   0x1   :  { %17 = vsyncpa [#allocation9], 0 }
   0x2   :  { %18 = vsyncpa [#allocation12], 0 }
   0x3   :  { %19 = vsyncpa [#allocation15], 0 }
   0x4   :  { %20 = vsyncpa [#allocation18], 0 }
   0x5   :  { %21 = vsyncpa [#allocation7], 0  ;;  %s4366_s17 = smov [#allocation8]   ;;  %s4130_s21 = scalar_lea.hbm %s4927_s1, 1024 }
   0x6   :  { %s37_s18 = sshll.u32 %s4366_s17, 4  ;;  %p4131_p0 = scmp.ne.s32.totalorder %s4927_s1, %s4130_s21  ;;  %s38_s18 = int_to_ptr.vmem [resolvable:$true] %s37_s18 }
   0x7   :  { %p4134_p1 = scmp.lt.u32.totalorder %s4130_s21, %s4927_s1 }
   0x9   :  { %p4136_p2 = pnand %p4134_p1, %p4131_p0 }
   0xb   :  { %4139 = shalt.err (!%p4136_p2)
}
   0xc   :  { %s4140_s26 = scalar_lea.vmem %s38_s18, 1024  ;;  %p4145_p4 = scmp.lt.s32.totalorder %s38_s18, %s38_s18 }
   0xd   :  { %p4141_p3 = scmp.ne.s32.totalorder %s38_s18, %s4140_s26  ;;  %p4146_p5 = scmp.lt.s32.totalorder %s4140_s26, %s4140_s26 }
   0xf   :  { %p4147_p6 = por %p4146_p5, %p4145_p4 }
  0x11   :  { %p4148_p7 = pnand %p4147_p6, %p4141_p3 }
  0x13   :  { %4151 = shalt.err (!%p4148_p7)
}
  0x14   :  { %s4367_s27 = smov 64   ;;  %s4368_s28 = smov 4  }
  0x15   :  { %43 = dma.hbm_to_vmem [thread:$0]  %s4927_s1, 1024, %s38_s18, [#allocation9], %s4367_s27, %s4367_s27, %s4368_s28  }
  0x16   :  { %s4369_s12 = smov [#allocation11]   ;;  %s4152_s16 = scalar_lea.hbm %s4929_s3, 2048 }
  0x17   :  { %s59_s13 = sshll.u32 %s4369_s12, 4  ;;  %p4153_p8 = scmp.ne.s32.totalorder %s4929_s3, %s4152_s16  ;;  %s60_s13 = int_to_ptr.vmem [resolvable:$true] %s59_s13 }
  0x18   :  { %p4156_p9 = scmp.lt.u32.totalorder %s4152_s16, %s4929_s3 }
  0x1a   :  { %p4158_p10 = pnand %p4156_p9, %p4153_p8 }
  0x1c   :  { %4161 = shalt.err (!%p4158_p10)
}
  0x1d   :  { %s4162_s22 = scalar_lea.vmem %s60_s13, 2048  ;;  %p4167_p12 = scmp.lt.s32.totalorder %s60_s13, %s60_s13 }
  0x1e   :  { %p4163_p11 = scmp.ne.s32.totalorder %s60_s13, %s4162_s22  ;;  %p4168_p13 = scmp.lt.s32.totalorder %s4162_s22, %s4162_s22 }
  0x20   :  { %p4169_p0 = por %p4168_p13, %p4167_p12 }
  0x22   :  { %p4170_p1 = pnand %p4169_p0, %p4163_p11 }
  0x24   :  { %4173 = shalt.err (!%p4170_p1)
}
  0x25   :  { %s4370_s1 = smov 128   ;;  %s4371_s18 = smov 8  }
  0x26   :  { %65 = dma.hbm_to_vmem [thread:$0]  %s4929_s3, 2048, %s60_s13, [#allocation12], %s4370_s1, %s4370_s1, %s4371_s18  }
  0x27   :  { %s4372_s25 = smov [#allocation14]   ;;  %s4174_s12 = scalar_lea.hbm %s4931_s5, 8192 }
  0x28   :  { %s81_s26 = sshll.u32 %s4372_s25, 4  ;;  %p4175_p2 = scmp.ne.s32.totalorder %s4931_s5, %s4174_s12  ;;  %s82_s26 = int_to_ptr.vmem [resolvable:$true] %s81_s26 }
  0x29   :  { %p4178_p3 = scmp.lt.u32.totalorder %s4174_s12, %s4931_s5 }
  0x2b   :  { %p4180_p4 = pnand %p4178_p3, %p4175_p2 }
  0x2d   :  { %4183 = shalt.err (!%p4180_p4)
}
  0x2e   :  { %s4184_s19 = scalar_lea.vmem %s82_s26, 8192  ;;  %p4189_p6 = scmp.lt.s32.totalorder %s82_s26, %s82_s26 }
  0x2f   :  { %p4185_p5 = scmp.ne.s32.totalorder %s82_s26, %s4184_s19  ;;  %p4190_p7 = scmp.lt.s32.totalorder %s4184_s19, %s4184_s19 }
  0x31   :  { %p4191_p8 = por %p4190_p7, %p4189_p6 }
  0x33   :  { %p4192_p9 = pnand %p4191_p8, %p4185_p5 }
  0x35   :  { %4195 = shalt.err (!%p4192_p9)
}
  0x36   :  { %s4373_s3 = smov 256   ;;  %s4374_s13 = smov 16  }
  0x37   :  { %87 = dma.hbm_to_vmem [thread:$0]  %s4931_s5, 8192, %s82_s26, [#allocation15], %s4373_s3, %s4373_s3, %s4374_s13  }
  0x38   :  { %s4375_s22 = smov [#allocation17]   ;;  %s4376_s24 = smov [#allocation5]  }
  0x39   :  { %s104_s23 = sshll.u32 %s4375_s22, 4  ;;  %s28_s25 = sshll.u32 %s4376_s24, 4  ;;  %s105_s23 = int_to_ptr.vmem [resolvable:$true] %s104_s23  ;;  %s29_s25 = int_to_ptr.vmem [resolvable:$true] %s28_s25 }
  0x3a   :  { %s4196_s12 = scalar_lea.hbm %s4934_s8, 256 }
  0x3b   :  { %p4197_p10 = scmp.ne.s32.totalorder %s4934_s8, %s4196_s12  ;;  %p4200_p11 = scmp.lt.u32.totalorder %s4196_s12, %s4934_s8 }
  0x3d   :  { %p4202_p12 = pnand %p4200_p11, %p4197_p10 }
  0x3f   :  { %4205 = shalt.err (!%p4202_p12)
}
  0x40   :  { %s4206_s5 = scalar_lea.vmem %s105_s23, 256  ;;  %p4211_p0 = scmp.lt.s32.totalorder %s105_s23, %s105_s23 }
  0x41   :  { %p4207_p13 = scmp.ne.s32.totalorder %s105_s23, %s4206_s5  ;;  %p4212_p1 = scmp.lt.s32.totalorder %s4206_s5, %s4206_s5 }
  0x43   :  { %p4213_p2 = por %p4212_p1, %p4211_p0 }
  0x45   :  { %p4214_p3 = pnand %p4213_p2, %p4207_p13 }
  0x47   :  { %4217 = shalt.err (!%p4214_p3)
}
  0x48   :  { %107 = dma.hbm_to_vmem [thread:$0]  %s4934_s8, 256, %s105_s23, [#allocation18]  }
  0x49   :  { %s4218_s20 = scalar_lea.hbm %s4926_s0, 128 }
  0x4a   :  { %p4219_p4 = scmp.ne.s32.totalorder %s4926_s0, %s4218_s20  ;;  %p4222_p5 = scmp.lt.u32.totalorder %s4218_s20, %s4926_s0 }
  0x4c   :  { %p4224_p6 = pnand %p4222_p5, %p4219_p4 }
  0x4e   :  { %4227 = shalt.err (!%p4224_p6)
}
  0x4f   :  { %s4228_s30 = scalar_lea.vmem %s29_s25, 128  ;;  %p4233_p8 = scmp.lt.s32.totalorder %s29_s25, %s29_s25 }
  0x50   :  { %p4229_p7 = scmp.ne.s32.totalorder %s29_s25, %s4228_s30  ;;  %p4234_p9 = scmp.lt.s32.totalorder %s4228_s30, %s4228_s30 }
  0x52   :  { %p4235_p10 = por %p4234_p9, %p4233_p8 }
  0x54   :  { %p4236_p11 = pnand %p4235_p10, %p4229_p7 }
  0x56   :  { %4239 = shalt.err (!%p4236_p11)
}
  0x57   :  { %31 = dma.hbm_to_vmem [thread:$0]  %s4926_s0, 128, %s29_s25, [#allocation6]  }
  0x58   :  { %s4377_s12 = smov [#allocation10]   ;;  %s4378_s15 = smov [#allocation13]  }
  0x59   :  { %s50_s14 = sshll.u32 %s4377_s12, 4  ;;  %s72_s16 = sshll.u32 %s4378_s15, 4  ;;  %s51_s14 = int_to_ptr.vmem [resolvable:$true] %s50_s14  ;;  %s73_s16 = int_to_ptr.vmem [resolvable:$true] %s72_s16 }
  0x5a   :  { %s4240_s26 = scalar_lea.hbm %s4928_s2, 32 }
  0x5b   :  { %p4241_p12 = scmp.ne.s32.totalorder %s4928_s2, %s4240_s26  ;;  %p4244_p13 = scmp.lt.u32.totalorder %s4240_s26, %s4928_s2 }
  0x5d   :  { %p4246_p0 = pnand %p4244_p13, %p4241_p12 }
  0x5f   :  { %4249 = shalt.err (!%p4246_p0)
}
  0x60   :  { %s4250_s0 = scalar_lea.vmem %s51_s14, 32  ;;  %p4255_p2 = scmp.lt.s32.totalorder %s51_s14, %s51_s14 }
  0x61   :  { %p4251_p1 = scmp.ne.s32.totalorder %s51_s14, %s4250_s0  ;;  %p4256_p3 = scmp.lt.s32.totalorder %s4250_s0, %s4250_s0 }
  0x63   :  { %p4257_p4 = por %p4256_p3, %p4255_p2 }
  0x65   :  { %p4258_p5 = pnand %p4257_p4, %p4251_p1 }
  0x67   :  { %4261 = shalt.err (!%p4258_p5)
}
  0x68   :  { %53 = dma.hbm_to_vmem [thread:$0]  %s4928_s2, 32, %s51_s14, [#allocation9]  }
  0x69   :  { %s4262_s29 = scalar_lea.hbm %s4930_s4, 64 }
  0x6a   :  { %p4263_p6 = scmp.ne.s32.totalorder %s4930_s4, %s4262_s29  ;;  %p4266_p7 = scmp.lt.u32.totalorder %s4262_s29, %s4930_s4 }
  0x6c   :  { %p4268_p8 = pnand %p4266_p7, %p4263_p6 }
  0x6e   :  { %4271 = shalt.err (!%p4268_p8)
}
  0x6f   :  { %s4272_s15 = scalar_lea.vmem %s73_s16, 64  ;;  %p4277_p10 = scmp.lt.s32.totalorder %s73_s16, %s73_s16 }
  0x70   :  { %p4273_p9 = scmp.ne.s32.totalorder %s73_s16, %s4272_s15  ;;  %p4278_p11 = scmp.lt.s32.totalorder %s4272_s15, %s4272_s15 }
  0x72   :  { %p4279_p12 = por %p4278_p11, %p4277_p10 }
  0x74   :  { %p4280_p13 = pnand %p4279_p12, %p4273_p9 }
  0x76   :  { %4283 = shalt.err (!%p4280_p13)
}
  0x77   :  { %75 = dma.hbm_to_vmem [thread:$0]  %s4930_s4, 64, %s73_s16, [#allocation12]  }
  0x78   :  { %s4379_s17 = smov [#allocation16]   ;;  %s4380_s26 = smov [#allocation19]  }
  0x79   :  { %s94_s5 = sshll.u32 %s4379_s17, 4  ;;  %s114_s19 = sshll.u32 %s4380_s26, 4  ;;  %s95_s5 = int_to_ptr.vmem [resolvable:$true] %s94_s5  ;;  %s115_s19 = int_to_ptr.vmem [resolvable:$true] %s114_s19 }
  0x7a   :  { %s4284_s20 = scalar_lea.hbm %s4932_s6, 128 }
  0x7b   :  { %p4285_p0 = scmp.ne.s32.totalorder %s4932_s6, %s4284_s20  ;;  %p4288_p1 = scmp.lt.u32.totalorder %s4284_s20, %s4932_s6 }
  0x7d   :  { %p4290_p2 = pnand %p4288_p1, %p4285_p0 }
  0x7f   :  { %4293 = shalt.err (!%p4290_p2)
}
  0x80   :  { %s4294_s4 = scalar_lea.vmem %s95_s5, 128  ;;  %p4299_p4 = scmp.lt.s32.totalorder %s95_s5, %s95_s5 }
  0x81   :  { %p4295_p3 = scmp.ne.s32.totalorder %s95_s5, %s4294_s4  ;;  %p4300_p5 = scmp.lt.s32.totalorder %s4294_s4, %s4294_s4 }
  0x83   :  { %p4301_p6 = por %p4300_p5, %p4299_p4 }
  0x85   :  { %p4302_p7 = pnand %p4301_p6, %p4295_p3 }
  0x87   :  { %4305 = shalt.err (!%p4302_p7)
}
  0x88   :  { %97 = dma.hbm_to_vmem [thread:$0]  %s4932_s6, 128, %s95_s5, [#allocation15]  }
  0x89   :  { %s4306_s8 = scalar_lea.hbm %s4936_s10, 112 }
  0x8a   :  { %p4307_p8 = scmp.ne.s32.totalorder %s4936_s10, %s4306_s8  ;;  %p4310_p9 = scmp.lt.u32.totalorder %s4306_s8, %s4936_s10 }
  0x8c   :  { %p4312_p10 = pnand %p4310_p9, %p4307_p8 }
  0x8e   :  { %4315 = shalt.err (!%p4312_p10)
}
  0x8f   :  { %s4316_s14 = scalar_lea.vmem %s115_s19, 112  ;;  %s4320_s17 = scalar_lea.vmem %s115_s19, 128 }
  0x90   :  { %p4317_p11 = scmp.ne.s32.totalorder %s115_s19, %s4316_s14  ;;  %p4321_p12 = scmp.lt.s32.totalorder %s115_s19, %s115_s19 }
  0x91   :  { %p4322_p13 = scmp.lt.s32.totalorder %s4320_s17, %s4316_s14 }
  0x93   :  { %p4323_p0 = por %p4322_p13, %p4321_p12 }
  0x95   :  { %p4324_p1 = pnand %p4323_p0, %p4317_p11 }
  0x97   :  { %4327 = shalt.err (!%p4324_p1)
}
  0x98   :  { %117 = dma.hbm_to_vmem [thread:$0]  %s4936_s10, 112, %s115_s19, [#allocation18]  }
  0x99   :  { %4350 = dma.done.wait [#allocation6], 128  }
  0x9a   :  { %4351 = vsyncadd [#allocation6], 4294967168 }
  0x9b   :  { %4352 = dma.done.wait [#allocation9], 1056  }
  0x9c   :  { %4353 = vsyncadd [#allocation9], 4294966240 }
  0x9d   :  { %4354 = dma.done.wait [#allocation12], 2112  }
  0x9e   :  { %4355 = vsyncadd [#allocation12], 4294965184 }
  0x9f   :  { %4356 = dma.done.wait [#allocation15], 8320  }
  0xa0   :  { %4357 = vsyncadd [#allocation15], 4294958976 }
  0xa1   :  { %4358 = dma.done.wait [#allocation18], 368  }
  0xa2   :  { %4359 = vsyncadd [#allocation18], 4294966928  ;;  %s150_s26 = sld [smem:[#allocation0]]   ;;  %s4381_s3 = smov 1024   ;;  %v4382_v0 = vmov 0.0   ;;  %vm4383_vm0 = vmmov 0   ;;  %v347_v51 = vlaneseq }
  0xa3   :  { %162 = sst [smem:[#allocation22]] %s4381_s3  ;;  %3804 = vmatprep.subr.bf16.mxu0 %v4382_v0  ;;  %3820 = vmatprep.mubr.msk.bf16.mxu0 %vm4383_vm0, %v4382_v0  ;;  %s4384_s10 = smov [#allocation2]   ;;  %v4395_v18 = vmov 0  }
  0xa4   :  { %164 = sst [smem:[#allocation22 + $0x1]] %s4381_s3  ;;  %s158_s19 = sshll.u32 %s4384_s10, 4  ;;  %498 = vmatprep.mubr.bf16.mxu1 %v4395_v18  ;;  %v4587_v52 = vshrl.u32 %v347_v51, 7  ;;  %s159_s19 = int_to_ptr.vmem [resolvable:$true] %s158_s19 }
  0xa5   :  { %166 = sst [smem:[#allocation22 + $0x2]] %s4371_s18  ;;  %s4385_s13 = smov 512  }
  0xa6   :  { %168 = sst [smem:[#allocation22 + $0x3]] %s4367_s27  ;;  %s4386_s25 = smov 2   ;;  %v4590_v54 = vsub.s32 0, %v4587_v52 }
  0xa7   :  { %170 = sst [smem:[#allocation22 + $0x4]] %s4370_s1  ;;  %s4387_s21 = smov [#allocation4]  }
  0xa8   :  { %174 = sst [smem:[#allocation22 + $0x6]] %s4385_s13  ;;  %s3613_s20 = sshll.u32 %s150_s26, 26 }
  0xa9   :  { %176 = sst [smem:[#allocation22 + $0x7]] %s4367_s27  ;;  %s3614_s0 = sadd.s32 134217728, %s3613_s20 }
  0xaa   :  { %178 = sst [smem:[#allocation22 + $0x8]] %s4368_s28  ;;  %s4388_s22 = smov [#allocation21]  }
  0xab   :  { %172 = sst [smem:[#allocation22 + $0x5]] %s4386_s25  ;;  %s4389_s16 = smov 896  }
  0xac   :  { %180 = dma.general %s4933_s7, 32768, %s159_s19, %s4387_s21, %s4388_s22, [#allocation22], %s3614_s0, 0  }
  0xad   :  { %197 = sst [smem:[#allocation24]] %s4389_s16  ;;  %s4390_s24 = smov 7  }
  0xae   :  { %199 = sst [smem:[#allocation24 + $0x1]] %s4389_s16  ;;  %s4391_s29 = smov [#allocation3]  }
  0xaf   :  { %201 = sst [smem:[#allocation24 + $0x2]] %s4390_s24  ;;  %s193_s30 = sshll.u32 %s4391_s29, 4  ;;  %s194_s30 = int_to_ptr.vmem [resolvable:$true] %s193_s30 }
  0xb0   :  { %203 = sst [smem:[#allocation24 + $0x3]] %s4367_s27  ;;  %s4392_s8 = smov 448  }
  0xb1   :  { %205 = sst [smem:[#allocation24 + $0x4]] %s4370_s1  ;;  %s4393_s7 = smov [#allocation4 + $0x1]  }
  0xb2   :  { %207 = sst [smem:[#allocation24 + $0x5]] %s4386_s25  ;;  %s4394_s23 = smov [#allocation23]  }
  0xb3   :  { %209 = sst [smem:[#allocation24 + $0x6]] %s4392_s8 }
  0xb4   :  { %211 = sst [smem:[#allocation24 + $0x7]] %s4367_s27 }
  0xb5   :  { %213 = sst [smem:[#allocation24 + $0x8]] %s4368_s28 }
  0xb6   :  { %215 = dma.general %s4935_s9, 57344, %s194_s30, %s4393_s7, %s4394_s23, [#allocation24], %s3614_s0, 0  }
  0xb7   :  { %v3914_v1 = vld [vmem:[#allocation8] sm:$0xff]   ;;  %v3915_v2 = vld [vmem:[#allocation8 + $0x8] sm:$0xff]   ;;  %v3916_v3 = vld [vmem:[#allocation8 + $0x10] sm:$0xff]  }
  0xb8   :  { %3805 = vmatpush3.bf16.msra.mxu0 %v3914_v1  ;;  %v3917_v4 = vld [vmem:[#allocation8 + $0x18] sm:$0xff]   ;;  %v3918_v5 = vld [vmem:[#allocation8 + $0x20] sm:$0xff]   ;;  %v3919_v6 = vld [vmem:[#allocation8 + $0x28] sm:$0xff]  }
  0xb9   :  { %3806 = vmatprep.subr.bf16.mxu0 %v4382_v0  ;;  %v3920_v7 = vld [vmem:[#allocation8 + $0x30] sm:$0xff]   ;;  %v3921_v8 = vld [vmem:[#allocation8 + $0x38] sm:$0xff]   ;;  %v3924_v12 = vld [vmem:[#allocation11] ss:$8 sps:$4 sm:$0xff]  }
  0xba   :  { %v216_v9 = vld [vmem:[#allocation5] sm:$0xff]  ;;  %v3922_v11 = vld [vmem:[#allocation11 + $0x4] ss:$8 sps:$4 sm:$0xff]   ;;  %v3930_v16 = vld [vmem:[#allocation11 + $0x20] ss:$8 sps:$4 sm:$0xff]  }
  0xbb   :  { %v217_v10 = vpack.c.bf16 %v216_v9, %v216_v9  ;;  %466 = vmatprep.subr.bf16.mxu1 %v3922_v11  ;;  %v3925_v13 = vld [vmem:[#allocation11 + $0x14] ss:$8 sps:$4 sm:$0xff]   ;;  %v3927_v14 = vld [vmem:[#allocation11 + $0x10] ss:$8 sps:$4 sm:$0xff]   ;;  %v3928_v15 = vld [vmem:[#allocation11 + $0x24] ss:$8 sps:$4 sm:$0xff]  }
  0xbc   :  { %3807 = vmatpush3.bf16.msra.mxu0 %v3915_v2  ;;  %467 = vmatpush1.bf16.msra.mxu1 %v3924_v12  ;;  %v3931_v17 = vld [vmem:[#allocation11 + $0x34] ss:$8 sps:$4 sm:$0xff]   ;;  %v3933_v19 = vld [vmem:[#allocation11 + $0x30] ss:$8 sps:$4 sm:$0xff]   ;;  %v3934_v20 = vld [vmem:[#allocation11 + $0x44] ss:$8 sps:$4 sm:$0xff]  }
  0xbd   :  { %3808 = vmatprep.subr.bf16.mxu0 %v4382_v0  ;;  %468 = vmatprep.subr.bf16.mxu1 %v3925_v13  ;;  %v3936_v21 = vld [vmem:[#allocation11 + $0x40] ss:$8 sps:$4 sm:$0xff]   ;;  %v3937_v22 = vld [vmem:[#allocation11 + $0x54] ss:$8 sps:$4 sm:$0xff]   ;;  %v3939_v23 = vld [vmem:[#allocation11 + $0x50] ss:$8 sps:$4 sm:$0xff]  }
  0xbe   :  { %v3940_v24 = vld [vmem:[#allocation11 + $0x64] ss:$8 sps:$4 sm:$0xff]   ;;  %v3942_v25 = vld [vmem:[#allocation11 + $0x60] ss:$8 sps:$4 sm:$0xff]   ;;  %v3943_v26 = vld [vmem:[#allocation11 + $0x74] ss:$8 sps:$4 sm:$0xff]  }
  0xbf   :  { %v3945_v27 = vld [vmem:[#allocation11 + $0x70] ss:$8 sps:$4 sm:$0xff]   ;;  %v218_v53 = vld [vmem:[#allocation10] sm:$0x1]  ;;  %v219_v57 = vld [vmem:[#allocation10 + $0x1] sm:$0x1] }
  0xc0   :  { %3809 = vmatpush3.bf16.msra.mxu0 %v3916_v3  ;;  %469 = vmatpush1.bf16.msra.mxu1 %v3927_v14  ;;  %v3946_v11 = vld [vmem:[#allocation14] ss:$16 sps:$4 sm:$0xff]   ;;  %v3951_v12 = vld [vmem:[#allocation14 + $0x24] ss:$16 sps:$4 sm:$0xff]  }
  0xc1   :  { %3810 = vmatprep.subr.bf16.mxu0 %v4382_v0  ;;  %470 = vmatprep.subr.bf16.mxu1 %v3928_v15  ;;  %v3949_v13 = vld [vmem:[#allocation14 + $0x20] ss:$16 sps:$4 sm:$0xff]   ;;  %v3954_v14 = vld [vmem:[#allocation14 + $0x44] ss:$16 sps:$4 sm:$0xff]  }
  0xc2   :  { %v3952_v15 = vld [vmem:[#allocation14 + $0x40] ss:$16 sps:$4 sm:$0xff]   ;;  %v3960_v18 = vld [vmem:[#allocation14 + $0x84] ss:$16 sps:$4 sm:$0xff]  }
  0xc4   :  { %3811 = vmatpush3.bf16.msra.mxu0 %v3917_v4  ;;  %471 = vmatpush1.bf16.msra.mxu1 %v3930_v16  ;;  %v3957_v16 = vld [vmem:[#allocation14 + $0x64] ss:$16 sps:$4 sm:$0xff]  }
  0xc5   :  { %3812 = vmatprep.subr.bf16.mxu0 %v4382_v0  ;;  %472 = vmatprep.subr.bf16.mxu1 %v3931_v17  ;;  %v3955_v17 = vld [vmem:[#allocation14 + $0x60] ss:$16 sps:$4 sm:$0xff]  }
  0xc8   :  { %3813 = vmatpush3.bf16.msra.mxu0 %v3918_v5  ;;  %473 = vmatpush1.bf16.msra.mxu1 %v3933_v19  ;;  %v3958_v19 = vld [vmem:[#allocation14 + $0x80] ss:$16 sps:$4 sm:$0xff]  }
  0xc9   :  { %3814 = vmatprep.subr.bf16.mxu0 %v4382_v0  ;;  %474 = vmatprep.subr.bf16.mxu1 %v3934_v20  ;;  %v3963_v20 = vld [vmem:[#allocation14 + $0xa4] ss:$16 sps:$4 sm:$0xff]  }
  0xcc   :  { %3815 = vmatpush3.bf16.msra.mxu0 %v3919_v6  ;;  %475 = vmatpush1.bf16.msra.mxu1 %v3936_v21  ;;  %v3961_v21 = vld [vmem:[#allocation14 + $0xa0] ss:$16 sps:$4 sm:$0xff]  }
  0xcd   :  { %3816 = vmatprep.subr.bf16.mxu0 %v4382_v0  ;;  %476 = vmatprep.subr.bf16.mxu1 %v3937_v22  ;;  %v3966_v22 = vld [vmem:[#allocation14 + $0xc4] ss:$16 sps:$4 sm:$0xff]  }
  0xd0   :  { %3817 = vmatpush3.bf16.msra.mxu0 %v3920_v7  ;;  %477 = vmatpush1.bf16.msra.mxu1 %v3939_v23  ;;  %v3964_v23 = vld [vmem:[#allocation14 + $0xc0] ss:$16 sps:$4 sm:$0xff]  }
  0xd1   :  { %3818 = vmatprep.subr.bf16.mxu0 %v4382_v0  ;;  %478 = vmatprep.subr.bf16.mxu1 %v3940_v24  ;;  %v3969_v24 = vld [vmem:[#allocation14 + $0xe4] ss:$16 sps:$4 sm:$0xff]  }
  0xd4   :  { %3819 = vmatpush3.bf16.msra.mxu0 %v3921_v8  ;;  %479 = vmatpush1.bf16.msra.mxu1 %v3942_v25  ;;  %v3967_v25 = vld [vmem:[#allocation14 + $0xe0] ss:$16 sps:$4 sm:$0xff]  }
  0xd5   :  { %480 = vmatprep.subr.bf16.mxu1 %v3943_v26  ;;  %v3972_v26 = vld [vmem:[#allocation14 + $0x104] ss:$16 sps:$4 sm:$0xff]  }
  0xd7   :  { %3821 = vmatmul.mubr.bf16.vlgmr.msra.gmra.mrb[0].mxu0 %v217_v10  ;;  %v3948_v10 = vld [vmem:[#allocation14 + $0x4] ss:$16 sps:$4 sm:$0xff]  }
  0xd8   :  { %481 = vmatpush1.bf16.msra.mxu1 %v3945_v27  ;;  %v3970_v27 = vld [vmem:[#allocation14 + $0x100] ss:$16 sps:$4 sm:$0xff]  }
  0xd9   :  { %1020 = vmatprep.subr.bf16.mxu1 %v3948_v10 }
 0x1aa   :  { %v318_v28 = vpop.f32.mrb[0].mxu0 }
 0x1ab   :  { %v324_v29 = vrot.slane %v318_v28, 4  ;;  %v331_v30 = vmul.f32 %v318_v28, %v318_v28  ;;  %v3822_v31 = vpop.f32.mrb[1].mxu0 }
 0x1ac   :  { %v321_v32 = vpop.f32.mrb[2].mxu0  ;;  %v3976_v31 = vld [vmem:[#allocation14 + $0x140] ss:$16 sps:$4 sm:$0xff]  }
 0x1ad   :  { %v325_v33 = vadd.f32 %v324_v29, %v318_v28  ;;  %v332_v34 = vrot.slane %v331_v30, 4  ;;  %v3823_v35 = vpop.f32.mrb[3].mxu0  ;;  %v3973_v29 = vld [vmem:[#allocation14 + $0x120] ss:$16 sps:$4 sm:$0xff]   ;;  %v3981_v32 = vld [vmem:[#allocation14 + $0x164] ss:$16 sps:$4 sm:$0xff]  }
 0x1ae   :  { %v3982_v35 = vld [vmem:[#allocation14 + $0x180] ss:$16 sps:$4 sm:$0xff]  }
 0x1af   :  { %v326_v36 = vrot.slane %v325_v33, 2  ;;  %v333_v37 = vadd.f32 %v332_v34, %v331_v30  ;;  %v3978_v30 = vld [vmem:[#allocation14 + $0x144] ss:$16 sps:$4 sm:$0xff]  }
 0x1b0   :  { %v3984_v34 = vld [vmem:[#allocation14 + $0x184] ss:$16 sps:$4 sm:$0xff]  }
 0x1b1   :  { %v327_v38 = vadd.f32 %v326_v36, %v325_v33  ;;  %v334_v39 = vrot.slane %v333_v37, 2  ;;  %v3979_v33 = vld [vmem:[#allocation14 + $0x160] ss:$16 sps:$4 sm:$0xff]   ;;  %v3987_v36 = vld [vmem:[#allocation14 + $0x1a4] ss:$16 sps:$4 sm:$0xff]  }
 0x1b3   :  { %v328_v40 = vrot.slane %v327_v38, 1  ;;  %v335_v41 = vadd.f32 %v334_v39, %v333_v37  ;;  %v3985_v37 = vld [vmem:[#allocation14 + $0x1a0] ss:$16 sps:$4 sm:$0xff]  }
 0x1b4   :  { %v3988_v39 = vld [vmem:[#allocation14 + $0x1c0] ss:$16 sps:$4 sm:$0xff]  }
 0x1b5   :  { %v329_v42 = vadd.f32 %v328_v40, %v327_v38  ;;  %v336_v43 = vrot.slane %v335_v41, 1  ;;  %v3990_v38 = vld [vmem:[#allocation14 + $0x1c4] ss:$16 sps:$4 sm:$0xff]  }
 0x1b6   :  { %v3993_v40 = vld [vmem:[#allocation14 + $0x1e4] ss:$16 sps:$4 sm:$0xff]  }
 0x1b7   :  { %v330_v44 = vmul.f32 0.125, %v329_v42  ;;  %v337_v45 = vadd.f32 %v336_v43, %v335_v41  ;;  %v3991_v41 = vld [vmem:[#allocation14 + $0x1e0] ss:$16 sps:$4 sm:$0xff]   ;;  %v3996_v42 = vld [vmem:[#allocation14 + $0xc] ss:$16 sps:$4 sm:$0xff]  }
 0x1b9   :  { %v338_v46 = vmul.f32 0.125, %v337_v45  ;;  %v339_v47 = vmul.f32 %v330_v44, %v330_v44 }
 0x1bb   :  { %v340_v48 = vsub.f32 %v338_v46, %v339_v47 }
 0x1bd   :  { %v341_v49 = vmax.f32 %v340_v48, 0.0 }
 0x1bf   :  { %v342_v50 = vadd.f32 1e-05, %v341_v49 }
 0x1c1   :  { %4042 = vrsqrt.f32 %v342_v50 }
 0x1cb   :  { %v4043_v55 = vpop.eup %4042 }
 0x1cc   :  { %v344_v56 = vmul.f32 %v4043_v55, %v218_v53 }
 0x1ce   :  { %v345_v58 = vmul.f32 %v344_v56, %v330_v44  ;;  %v350_v59 = vrot.slane %v344_v56, %v4590_v54 }
 0x1d0   :  { %v346_v60 = vsub.f32 %v219_v57, %v345_v58  ;;  %v351_v61 = vmul.f32 %v350_v59, %v318_v28  ;;  %v3975_v28 = vld [vmem:[#allocation14 + $0x124] ss:$16 sps:$4 sm:$0xff]  }
 0x1d2   :  { %v355_v62 = vrot.slane %v346_v60, %v4590_v54 }
 0x1d4   :  { %v356_v63 = vadd.f32 %v355_v62, %v351_v61 }
 0x1d6   :  { %v358_v0 = vmul.f32 %v356_v63, %v356_v63  ;;  %v357_v6 = vmul.f32 0.5, %v356_v63 }
 0x1d8   :  { %v359_v1 = vmul.f32 %v358_v0, %v356_v63 }
 0x1da   :  { %v360_v2 = vmul.f32 0.044715, %v359_v1 }
 0x1dc   :  { %v361_v3 = vadd.f32 %v360_v2, %v356_v63 }
 0x1de   :  { %v362_v4 = vmul.f32 0.7978846, %v361_v3 }
 0x1e0   :  { %4044 = vtanh.f32 %v362_v4 }
 0x1ea   :  { %v4045_v5 = vpop.eup %4044 }
 0x1eb   :  { %v364_v7 = vadd.f32 1.0, %v4045_v5 }
 0x1ed   :  { %v365_v8 = vmul.f32 %v364_v7, %v357_v6 }
 0x1ef   :  { %v366_v9 = vpack.c.bf16 %v365_v8, %v365_v8 }
 0x1f1   :  { %499 = vmatmul.mubr.bf16.vlgmr.msra.gmra.mrb[0].mxu1 %v366_v9 }
 0x1f2   :  { %1021 = vmatpush1.bf16.msra.mxu1 %v3946_v11 }
 0x1f3   :  { %1022 = vmatprep.subr.bf16.mxu1 %v3951_v12 }
 0x1f6   :  { %1023 = vmatpush1.bf16.msra.mxu1 %v3949_v13 }
 0x1f7   :  { %1024 = vmatprep.subr.bf16.mxu1 %v3954_v14 }
 0x1fa   :  { %1025 = vmatpush1.bf16.msra.mxu1 %v3952_v15 }
 0x1fb   :  { %1026 = vmatprep.subr.bf16.mxu1 %v3957_v16 }
 0x1fe   :  { %1027 = vmatpush1.bf16.msra.mxu1 %v3955_v17 }
 0x1ff   :  { %1028 = vmatprep.subr.bf16.mxu1 %v3960_v18 }
 0x202   :  { %1029 = vmatpush1.bf16.msra.mxu1 %v3958_v19 }
 0x203   :  { %1030 = vmatprep.subr.bf16.mxu1 %v3963_v20 }
 0x206   :  { %1031 = vmatpush1.bf16.msra.mxu1 %v3961_v21 }
 0x207   :  { %1032 = vmatprep.subr.bf16.mxu1 %v3966_v22 }
 0x20a   :  { %1033 = vmatpush1.bf16.msra.mxu1 %v3964_v23  ;;  %v4396_v23 = vmov 1966171168  }
 0x20b   :  { %1034 = vmatprep.subr.bf16.mxu1 %v3969_v24  ;;  %v551_v24 = vunpack.c.l.s4 %v4396_v23  ;;  %v4020_v23 = vld [vmem:[#allocation14 + $0x10c] ss:$16 sps:$4 sm:$0xff]  }
 0x20e   :  { %1035 = vmatpush1.bf16.msra.mxu1 %v3967_v25  ;;  %v552_v25 = vunpack.c.0.s8 %v551_v24  ;;  %v4018_v24 = vld [vmem:[#allocation14 + $0x108] ss:$16 sps:$4 sm:$0xff]  }
 0x20f   :  { %1036 = vmatprep.subr.bf16.mxu1 %v3972_v26 }
 0x212   :  { %1037 = vmatpush1.bf16.msra.mxu1 %v3970_v27  ;;  %v4595_v27 = vsub.s32 %v552_v25, %v4587_v52  ;;  %v4023_v25 = vld [vmem:[#allocation14 + $0x12c] ss:$16 sps:$4 sm:$0xff]  }
 0x213   :  { %1038 = vmatprep.subr.bf16.mxu1 %v3975_v28 }
 0x216   :  { %1039 = vmatpush1.bf16.msra.mxu1 %v3973_v29 }
 0x217   :  { %1040 = vmatprep.subr.bf16.mxu1 %v3978_v30 }
 0x21a   :  { %1041 = vmatpush1.bf16.msra.mxu1 %v3976_v31  ;;  %v367_v31 = vld [vmem:[#allocation13] ss:$2 sm:$0x3] }
 0x21b   :  { %1042 = vmatprep.subr.bf16.mxu1 %v3981_v32 }
 0x21e   :  { %1043 = vmatpush1.bf16.msra.mxu1 %v3979_v33  ;;  %v4600_v33 = vsub.s32 1, %v4587_v52 }
 0x21f   :  { %1044 = vmatprep.subr.bf16.mxu1 %v3984_v34 }
 0x222   :  { %1045 = vmatpush1.bf16.msra.mxu1 %v3982_v35 }
 0x223   :  { %1046 = vmatprep.subr.bf16.mxu1 %v3987_v36 }
 0x226   :  { %1047 = vmatpush1.bf16.msra.mxu1 %v3985_v37 }
 0x227   :  { %1048 = vmatprep.subr.bf16.mxu1 %v3990_v38 }
 0x22a   :  { %1049 = vmatpush1.bf16.msra.mxu1 %v3988_v39 }
 0x22b   :  { %1050 = vmatprep.subr.bf16.mxu1 %v3993_v40 }
 0x22e   :  { %1051 = vmatpush1.bf16.msra.mxu1 %v3991_v41 }
 0x22f   :  { %1061 = vmatprep.subr.bf16.mxu1 %v3996_v42 }
 0x2c4   :  { %v500_v43 = vpop.f32.mrb[0].mxu1 }
 0x2c5   :  { %v507_v44 = vrot.slane %v500_v43, 4  ;;  %v521_v45 = vmul.f32 %v500_v43, %v500_v43  ;;  %v502_v46 = vpop.f32.mrb[1].mxu1 }
 0x2c6   :  { %v513_v47 = vrot.slane %v502_v46, 4  ;;  %v522_v48 = vmul.f32 %v502_v46, %v502_v46  ;;  %v504_v49 = vpop.f32.mrb[2].mxu1 }
 0x2c7   :  { %v508_v50 = vadd.f32 %v507_v44, %v500_v43  ;;  %v523_v51 = vrot.slane %v521_v45, 4  ;;  %v505_v53 = vpop.f32.mrb[3].mxu1  ;;  %v369_v44 = vld [vmem:[#allocation13 + $0x1] ss:$2 sm:$0x3] }
 0x2c8   :  { %v514_v55 = vadd.f32 %v513_v47, %v502_v46  ;;  %v529_v56 = vrot.slane %v522_v48, 4 }
 0x2c9   :  { %v509_v57 = vrot.slane %v508_v50, 2  ;;  %v524_v58 = vadd.f32 %v523_v51, %v521_v45 }
 0x2ca   :  { %v515_v59 = vrot.slane %v514_v55, 2  ;;  %v530_v60 = vadd.f32 %v529_v56, %v522_v48 }
 0x2cb   :  { %v510_v61 = vadd.f32 %v509_v57, %v508_v50  ;;  %v525_v62 = vrot.slane %v524_v58, 2 }
 0x2cc   :  { %v516_v63 = vadd.f32 %v515_v59, %v514_v55  ;;  %v531_v0 = vrot.slane %v530_v60, 2 }
 0x2cd   :  { %v511_v1 = vrot.slane %v510_v61, 1  ;;  %v526_v2 = vadd.f32 %v525_v62, %v524_v58 }
 0x2ce   :  { %v517_v3 = vrot.slane %v516_v63, 1  ;;  %v532_v4 = vadd.f32 %v531_v0, %v530_v60 }
 0x2cf   :  { %v512_v5 = vadd.f32 %v511_v1, %v510_v61  ;;  %v527_v6 = vrot.slane %v526_v2, 1 }
 0x2d0   :  { %v518_v7 = vadd.f32 %v517_v3, %v516_v63  ;;  %v533_v8 = vrot.slane %v532_v4, 1 }
 0x2d1   :  { %v519_v9 = vmul.f32 0.125, %v512_v5  ;;  %v528_v10 = vadd.f32 %v527_v6, %v526_v2 }
 0x2d2   :  { %v520_v11 = vmul.f32 0.125, %v518_v7  ;;  %v534_v12 = vadd.f32 %v533_v8, %v532_v4  ;;  %v3994_v7 = vld [vmem:[#allocation14 + $0x8] ss:$16 sps:$4 sm:$0xff]  }
 0x2d3   :  { %v535_v13 = vmul.f32 0.125, %v528_v10  ;;  %v537_v14 = vmul.f32 %v519_v9, %v519_v9  ;;  %v3997_v10 = vld [vmem:[#allocation14 + $0x28] ss:$16 sps:$4 sm:$0xff]  }
 0x2d4   :  { %v536_v15 = vmul.f32 0.125, %v534_v12  ;;  %v538_v16 = vmul.f32 %v520_v11, %v520_v11  ;;  %v4000_v12 = vld [vmem:[#allocation14 + $0x48] ss:$16 sps:$4 sm:$0xff]  }
 0x2d5   :  { %v539_v17 = vsub.f32 %v535_v13, %v537_v14  ;;  %v4005_v13 = vld [vmem:[#allocation14 + $0x6c] ss:$16 sps:$4 sm:$0xff]   ;;  %v4003_v14 = vld [vmem:[#allocation14 + $0x68] ss:$16 sps:$4 sm:$0xff]  }
 0x2d6   :  { %v540_v18 = vsub.f32 %v536_v15, %v538_v16  ;;  %v4008_v15 = vld [vmem:[#allocation14 + $0x8c] ss:$16 sps:$4 sm:$0xff]   ;;  %v4006_v16 = vld [vmem:[#allocation14 + $0x88] ss:$16 sps:$4 sm:$0xff]  }
 0x2d7   :  { %v541_v19 = vmax.f32 %v539_v17, 0.0  ;;  %v4011_v17 = vld [vmem:[#allocation14 + $0xac] ss:$16 sps:$4 sm:$0xff]  }
 0x2d8   :  { %v542_v20 = vmax.f32 %v540_v18, 0.0  ;;  %v4009_v18 = vld [vmem:[#allocation14 + $0xa8] ss:$16 sps:$4 sm:$0xff]  }
 0x2d9   :  { %v543_v21 = vadd.f32 1e-05, %v541_v19  ;;  %v4014_v19 = vld [vmem:[#allocation14 + $0xcc] ss:$16 sps:$4 sm:$0xff]  }
 0x2da   :  { %v544_v22 = vadd.f32 1e-05, %v542_v20  ;;  %v4012_v20 = vld [vmem:[#allocation14 + $0xc8] ss:$16 sps:$4 sm:$0xff]  }
 0x2db   :  { %4046 = vrsqrt.f32 %v543_v21  ;;  %v4017_v21 = vld [vmem:[#allocation14 + $0xec] ss:$16 sps:$4 sm:$0xff]  }
 0x2dc   :  { %4048 = vrsqrt.f32 %v544_v22  ;;  %v4015_v22 = vld [vmem:[#allocation14 + $0xe8] ss:$16 sps:$4 sm:$0xff]  }
 0x2e5   :  { %v4047_v26 = vpop.eup %4046 }
 0x2e6   :  { %v4049_v28 = vpop.eup %4048 }
 0x2e7   :  { %v549_v29 = vcombine.low %v4047_v26, %v4049_v28  ;;  %v4021_v26 = vld [vmem:[#allocation14 + $0x128] ss:$16 sps:$4 sm:$0xff]   ;;  %v4026_v28 = vld [vmem:[#allocation14 + $0x14c] ss:$16 sps:$4 sm:$0xff]  }
 0x2e9   :  { %v556_v30 = vrot.slane %v549_v29, %v4595_v27  ;;  %v4024_v29 = vld [vmem:[#allocation14 + $0x148] ss:$16 sps:$4 sm:$0xff]  }
 0x2eb   :  { %v563_v32 = vrot.slane %v556_v30, %v4595_v27  ;;  %v4029_v30 = vld [vmem:[#allocation14 + $0x16c] ss:$16 sps:$4 sm:$0xff]  }
 0x2ed   :  { %v565_v34 = vmul.f32 %v563_v32, %v367_v31  ;;  %v4027_v31 = vld [vmem:[#allocation14 + $0x168] ss:$16 sps:$4 sm:$0xff]   ;;  %v4032_v32 = vld [vmem:[#allocation14 + $0x18c] ss:$16 sps:$4 sm:$0xff]  }
 0x2ef   :  { %v570_v35 = vrot.slane %v565_v34, %v4590_v54  ;;  %v574_v36 = vrot.slane %v565_v34, %v4600_v33  ;;  %v4030_v34 = vld [vmem:[#allocation14 + $0x188] ss:$16 sps:$4 sm:$0xff]  }
 0x2f1   :  { %v577_v37 = vmul.f32 %v570_v35, %v519_v9  ;;  %v578_v38 = vmul.f32 %v574_v36, %v520_v11  ;;  %v598_v39 = vmul.f32 %v570_v35, %v500_v43  ;;  %v599_v40 = vmul.f32 %v574_v36, %v502_v46  ;;  %v3999_v9 = vld [vmem:[#allocation14 + $0x2c] ss:$16 sps:$4 sm:$0xff]   ;;  %v4033_v36 = vld [vmem:[#allocation14 + $0x1a8] ss:$16 sps:$4 sm:$0xff]  }
 0x2f2   :  { %v4002_v11 = vld [vmem:[#allocation14 + $0x4c] ss:$16 sps:$4 sm:$0xff]  }
 0x2f3   :  { %v581_v41 = vcombine.low %v577_v37, %v578_v38  ;;  %v4035_v35 = vld [vmem:[#allocation14 + $0x1ac] ss:$16 sps:$4 sm:$0xff]   ;;  %v4036_v38 = vld [vmem:[#allocation14 + $0x1c8] ss:$16 sps:$4 sm:$0xff]  }
 0x2f4   :  { %v4038_v37 = vld [vmem:[#allocation14 + $0x1cc] ss:$16 sps:$4 sm:$0xff]  }
 0x2f5   :  { %v588_v42 = vrot.slane %v581_v41, %v4595_v27 }
 0x2f7   :  { %v595_v45 = vrot.slane %v588_v42, %v4595_v27 }
 0x2f9   :  { %v597_v47 = vsub.f32 %v369_v44, %v595_v45 }
 0x2fb   :  { %v604_v48 = vrot.slane %v597_v47, %v4590_v54  ;;  %v608_v49 = vrot.slane %v597_v47, %v4600_v33 }
 0x2fd   :  { %v611_v50 = vadd.f32 %v604_v48, %v598_v39  ;;  %v612_v51 = vadd.f32 %v608_v49, %v599_v40  ;;  %v4041_v39 = vld [vmem:[#allocation14 + $0x1ec] ss:$16 sps:$4 sm:$0xff]   ;;  %v4039_v40 = vld [vmem:[#allocation14 + $0x1e8] ss:$16 sps:$4 sm:$0xff]  }
 0x2ff   :  { %v616_v53 = vmul.f32 %v612_v51, %v612_v51  ;;  %v615_v55 = vmul.f32 %v611_v50, %v611_v50  ;;  %v614_v0 = vmul.f32 0.5, %v612_v51  ;;  %v613_v2 = vmul.f32 0.5, %v611_v50 }
 0x301   :  { %v618_v56 = vmul.f32 %v616_v53, %v612_v51  ;;  %v617_v57 = vmul.f32 %v615_v55, %v611_v50 }
 0x303   :  { %v620_v58 = vmul.f32 0.044715, %v618_v56  ;;  %v619_v43 = vmul.f32 0.044715, %v617_v57 }
 0x305   :  { %v622_v46 = vadd.f32 %v620_v58, %v612_v51  ;;  %v621_v59 = vadd.f32 %v619_v43, %v611_v50 }
 0x307   :  { %v624_v60 = vmul.f32 0.7978846, %v622_v46  ;;  %v623_v61 = vmul.f32 0.7978846, %v621_v59 }
 0x309   :  { %4050 = vtanh.f32 %v624_v60 }
 0x30a   :  { %4052 = vtanh.f32 %v623_v61 }
 0x313   :  { %v4051_v62 = vpop.eup %4050 }
 0x314   :  { %v4053_v63 = vpop.eup %4052  ;;  %v628_v1 = vadd.f32 1.0, %v4051_v62 }
 0x315   :  { %v627_v3 = vadd.f32 1.0, %v4053_v63 }
 0x316   :  { %v630_v4 = vmul.f32 %v628_v1, %v614_v0 }
 0x317   :  { %v629_v5 = vmul.f32 %v627_v3, %v613_v2 }
 0x318   :  { %v632_v6 = vpack.c.bf16 %v630_v4, %v630_v4 }
 0x319   :  { %v4608_v8 = vpack.c.bf16 %v629_v5, %v629_v5 }
 0x31a   :  { %1052 = vmatprep.mubr.bf16.mxu1 %v632_v6 }
 0x31b   :  { %1053 = vmatmul.mubr.bf16.vlgmr.msra.gmra.mrb[4].mxu1 %v4608_v8 }
 0x31c   :  { %1062 = vmatpush1.bf16.msra.mxu1 %v3994_v7  ;;  %1093 = vmatprep.mubr.bf16.mxu1 %v632_v6 }
 0x31d   :  { %1063 = vmatprep.subr.bf16.mxu1 %v3999_v9 }
 0x320   :  { %1064 = vmatpush1.bf16.msra.mxu1 %v3997_v10 }
 0x321   :  { %1065 = vmatprep.subr.bf16.mxu1 %v4002_v11 }
 0x324   :  { %1066 = vmatpush1.bf16.msra.mxu1 %v4000_v12 }
 0x325   :  { %1067 = vmatprep.subr.bf16.mxu1 %v4005_v13 }
 0x328   :  { %1068 = vmatpush1.bf16.msra.mxu1 %v4003_v14 }
 0x329   :  { %1069 = vmatprep.subr.bf16.mxu1 %v4008_v15 }
 0x32c   :  { %1070 = vmatpush1.bf16.msra.mxu1 %v4006_v16 }
 0x32d   :  { %1071 = vmatprep.subr.bf16.mxu1 %v4011_v17 }
 0x330   :  { %1072 = vmatpush1.bf16.msra.mxu1 %v4009_v18 }
 0x331   :  { %1073 = vmatprep.subr.bf16.mxu1 %v4014_v19 }
 0x334   :  { %1074 = vmatpush1.bf16.msra.mxu1 %v4012_v20 }
 0x335   :  { %1075 = vmatprep.subr.bf16.mxu1 %v4017_v21 }
 0x338   :  { %1076 = vmatpush1.bf16.msra.mxu1 %v4015_v22 }
 0x339   :  { %1077 = vmatprep.subr.bf16.mxu1 %v4020_v23 }
 0x33c   :  { %1078 = vmatpush1.bf16.msra.mxu1 %v4018_v24 }
 0x33d   :  { %1079 = vmatprep.subr.bf16.mxu1 %v4023_v25 }
 0x340   :  { %1080 = vmatpush1.bf16.msra.mxu1 %v4021_v26 }
 0x341   :  { %1081 = vmatprep.subr.bf16.mxu1 %v4026_v28 }
 0x344   :  { %1082 = vmatpush1.bf16.msra.mxu1 %v4024_v29 }
 0x345   :  { %1083 = vmatprep.subr.bf16.mxu1 %v4029_v30 }
 0x348   :  { %1084 = vmatpush1.bf16.msra.mxu1 %v4027_v31 }
 0x349   :  { %1085 = vmatprep.subr.bf16.mxu1 %v4032_v32 }
 0x34c   :  { %1086 = vmatpush1.bf16.msra.mxu1 %v4030_v34 }
 0x34d   :  { %1087 = vmatprep.subr.bf16.mxu1 %v4035_v35 }
 0x350   :  { %1088 = vmatpush1.bf16.msra.mxu1 %v4033_v36 }
 0x351   :  { %1089 = vmatprep.subr.bf16.mxu1 %v4038_v37 }
 0x354   :  { %1090 = vmatpush1.bf16.msra.mxu1 %v4036_v38 }
 0x355   :  { %1091 = vmatprep.subr.bf16.mxu1 %v4041_v39 }
 0x358   :  { %1092 = vmatpush1.bf16.msra.mxu1 %v4039_v40 }
 0x35b   :  { %1094 = vmatmul.mubr.bf16.vlgmr.msra.gmra.mrb[8].mxu1 %v4608_v8 }
 0x3ee   :  { %v4612_v41 = vpop.f32.mrb[4].mxu1 }
 0x3ef   :  { %v1102_v42 = vrot.slane %v4612_v41, 4  ;;  %v1130_v44 = vmul.f32 %v4612_v41, %v4612_v41  ;;  %v4617_v45 = vpop.f32.mrb[5].mxu1 }
 0x3f0   :  { %v1108_v47 = vrot.slane %v4617_v45, 4  ;;  %v1131_v48 = vmul.f32 %v4617_v45, %v4617_v45  ;;  %v1058_v49 = vpop.f32.mrb[6].mxu1 }
 0x3f1   :  { %v1103_v50 = vadd.f32 %v1102_v42, %v4612_v41  ;;  %v1134_v51 = vrot.slane %v1130_v44, 4  ;;  %v1059_v53 = vpop.f32.mrb[7].mxu1 }
 0x3f2   :  { %v1109_v55 = vadd.f32 %v1108_v47, %v4617_v45  ;;  %v1140_v56 = vrot.slane %v1131_v48, 4 }
 0x3f3   :  { %v1104_v57 = vrot.slane %v1103_v50, 2  ;;  %v1135_v58 = vadd.f32 %v1134_v51, %v1130_v44 }
 0x3f4   :  { %v1110_v43 = vrot.slane %v1109_v55, 2  ;;  %v1141_v46 = vadd.f32 %v1140_v56, %v1131_v48 }
 0x3f5   :  { %v1105_v59 = vadd.f32 %v1104_v57, %v1103_v50  ;;  %v1136_v60 = vrot.slane %v1135_v58, 2 }
 0x3f6   :  { %v1111_v61 = vadd.f32 %v1110_v43, %v1109_v55  ;;  %v1142_v62 = vrot.slane %v1141_v46, 2 }
 0x3f7   :  { %v1106_v63 = vrot.slane %v1105_v59, 1  ;;  %v1137_v0 = vadd.f32 %v1136_v60, %v1135_v58 }
 0x3f8   :  { %v1112_v1 = vrot.slane %v1111_v61, 1  ;;  %v1143_v2 = vadd.f32 %v1142_v62, %v1141_v46 }
 0x3f9   :  { %v1107_v3 = vadd.f32 %v1106_v63, %v1105_v59  ;;  %v1138_v4 = vrot.slane %v1137_v0, 1 }
 0x3fa   :  { %v1113_v5 = vadd.f32 %v1112_v1, %v1111_v61  ;;  %v1144_v6 = vrot.slane %v1143_v2, 1 }
 0x3fb   :  { %v4624_v7 = vmul.f32 0.125, %v1107_v3  ;;  %v1139_v8 = vadd.f32 %v1138_v4, %v1137_v0 }
 0x3fc   :  { %v4626_v9 = vmul.f32 0.125, %v1113_v5  ;;  %v1145_v10 = vadd.f32 %v1144_v6, %v1143_v2 }
 0x3fd   :  { %v1158_v11 = vmul.f32 0.125, %v1139_v8  ;;  %v1162_v12 = vmul.f32 %v4624_v7, %v4624_v7 }
 0x3fe   :  { %v1159_v13 = vmul.f32 0.125, %v1145_v10  ;;  %v1163_v14 = vmul.f32 %v4626_v9, %v4626_v9 }
 0x3ff   :  { %v1166_v15 = vsub.f32 %v1158_v11, %v1162_v12 }
 0x400   :  { %v1167_v16 = vsub.f32 %v1159_v13, %v1163_v14 }
 0x401   :  { %v1170_v17 = vmax.f32 %v1166_v15, 0.0 }
 0x402   :  { %v1171_v18 = vmax.f32 %v1167_v16, 0.0  ;;  %v633_v16 = vld [vmem:[#allocation16] ss:$2 sm:$0xf] }
 0x403   :  { %v1174_v19 = vadd.f32 1e-05, %v1170_v17 }
 0x404   :  { %v1175_v20 = vadd.f32 1e-05, %v1171_v18  ;;  %v4648_v18 = vsub.s32 2, %v4587_v52 }
 0x405   :  { %4054 = vrsqrt.f32 %v1174_v19  ;;  %v4651_v19 = vsub.s32 3, %v4587_v52 }
 0x406   :  { %4056 = vrsqrt.f32 %v1175_v20 }
 0x40f   :  { %v4055_v21 = vpop.eup %4054 }
 0x410   :  { %v4057_v22 = vpop.eup %4056 }
 0x411   :  { %v1186_v23 = vcombine.low %v4055_v21, %v4057_v22 }
 0x413   :  { %v1194_v13 = vrot.slane %v1186_v23, %v4595_v27 }
 0x42e   :  { %v4632_v24 = vpop.f32.mrb[8].mxu1 }
 0x42f   :  { %v1114_v25 = vrot.slane %v4632_v24, 4  ;;  %v1132_v26 = vmul.f32 %v4632_v24, %v4632_v24  ;;  %v4637_v28 = vpop.f32.mrb[9].mxu1 }
 0x430   :  { %v1120_v29 = vrot.slane %v4637_v28, 4  ;;  %v1133_v30 = vmul.f32 %v4637_v28, %v4637_v28  ;;  %v1099_v31 = vpop.f32.mrb[10].mxu1 }
 0x431   :  { %v1115_v32 = vadd.f32 %v1114_v25, %v4632_v24  ;;  %v1146_v34 = vrot.slane %v1132_v26, 4  ;;  %v1100_v35 = vpop.f32.mrb[11].mxu1 }
 0x432   :  { %v1121_v36 = vadd.f32 %v1120_v29, %v4637_v28  ;;  %v1152_v37 = vrot.slane %v1133_v30, 4 }
 0x433   :  { %v1116_v38 = vrot.slane %v1115_v32, 2  ;;  %v1147_v39 = vadd.f32 %v1146_v34, %v1132_v26 }
 0x434   :  { %v1122_v40 = vrot.slane %v1121_v36, 2  ;;  %v1153_v42 = vadd.f32 %v1152_v37, %v1133_v30 }
 0x435   :  { %v1117_v44 = vadd.f32 %v1116_v38, %v1115_v32  ;;  %v1148_v47 = vrot.slane %v1147_v39, 2 }
 0x436   :  { %v1123_v48 = vadd.f32 %v1122_v40, %v1121_v36  ;;  %v1154_v49 = vrot.slane %v1153_v42, 2 }
 0x437   :  { %v1118_v50 = vrot.slane %v1117_v44, 1  ;;  %v1149_v51 = vadd.f32 %v1148_v47, %v1147_v39 }
 0x438   :  { %v1124_v53 = vrot.slane %v1123_v48, 1  ;;  %v1155_v55 = vadd.f32 %v1154_v49, %v1153_v42 }
 0x439   :  { %v1119_v56 = vadd.f32 %v1118_v50, %v1117_v44  ;;  %v1150_v57 = vrot.slane %v1149_v51, 1 }
 0x43a   :  { %v1125_v58 = vadd.f32 %v1124_v53, %v1123_v48  ;;  %v1156_v43 = vrot.slane %v1155_v55, 1 }
 0x43b   :  { %v1128_v46 = vmul.f32 0.125, %v1119_v56  ;;  %v1151_v59 = vadd.f32 %v1150_v57, %v1149_v51 }
 0x43c   :  { %v1129_v60 = vmul.f32 0.125, %v1125_v58  ;;  %v1157_v61 = vadd.f32 %v1156_v43, %v1155_v55 }
 0x43d   :  { %v1160_v62 = vmul.f32 0.125, %v1151_v59  ;;  %v1164_v63 = vmul.f32 %v1128_v46, %v1128_v46 }
 0x43e   :  { %v1161_v0 = vmul.f32 0.125, %v1157_v61  ;;  %v1165_v1 = vmul.f32 %v1129_v60, %v1129_v60 }
 0x43f   :  { %v1168_v2 = vsub.f32 %v1160_v62, %v1164_v63 }
 0x440   :  { %v1169_v3 = vsub.f32 %v1161_v0, %v1165_v1 }
 0x441   :  { %v1172_v4 = vmax.f32 %v1168_v2, 0.0 }
 0x442   :  { %v1173_v5 = vmax.f32 %v1169_v3, 0.0 }
 0x443   :  { %v1176_v6 = vadd.f32 1e-05, %v1172_v4 }
 0x444   :  { %v1177_v8 = vadd.f32 1e-05, %v1173_v5 }
 0x445   :  { %4058 = vrsqrt.f32 %v1176_v6 }
 0x446   :  { %4060 = vrsqrt.f32 %v1177_v8 }
 0x44f   :  { %v4059_v10 = vpop.eup %4058 }
 0x450   :  { %v4061_v11 = vpop.eup %4060 }
 0x451   :  { %v1187_v12 = vcombine.low %v4059_v10, %v4061_v11 }
 0x453   :  { %v1201_v14 = vrot.slane %v1187_v12, %v4595_v27 }
 0x455   :  { %v1202_v15 = vcombine.low %v1194_v13, %v1201_v14 }
 0x457   :  { %v1209_v17 = vrot.slane %v1202_v15, %v4595_v27 }
 0x459   :  { %v1211_v20 = vmul.f32 %v1209_v17, %v633_v16 }
 0x45b   :  { %v1216_v21 = vrot.slane %v1211_v20, %v4590_v54  ;;  %v1220_v22 = vrot.slane %v1211_v20, %v4600_v33  ;;  %v1224_v25 = vrot.slane %v1211_v20, %v4648_v18  ;;  %v1228_v23 = vrot.slane %v1211_v20, %v4651_v19 }
 0x45d   :  { %v1233_v26 = vmul.f32 %v1216_v21, %v4624_v7  ;;  %v1234_v29 = vmul.f32 %v1220_v22, %v4626_v9  ;;  %v1235_v30 = vmul.f32 %v1224_v25, %v1128_v46  ;;  %v1236_v31 = vmul.f32 %v1228_v23, %v1129_v60  ;;  %v635_v7 = vld [vmem:[#allocation16 + $0x1] ss:$2 sm:$0xf] }
 0x45e   :  { %v1267_v32 = vmul.f32 %v1216_v21, %v4612_v41  ;;  %v1268_v34 = vmul.f32 %v1220_v22, %v4617_v45  ;;  %v1269_v35 = vmul.f32 %v1224_v25, %v4632_v24  ;;  %v1270_v36 = vmul.f32 %v1228_v23, %v4637_v28 }
 0x45f   :  { %v1241_v37 = vcombine.low %v1233_v26, %v1234_v29  ;;  %v1242_v38 = vcombine.low %v1235_v30, %v1236_v31 }
 0x461   :  { %v1249_v39 = vrot.slane %v1241_v37, %v4595_v27  ;;  %v1256_v40 = vrot.slane %v1242_v38, %v4595_v27 }
 0x463   :  { %v1257_v42 = vcombine.low %v1249_v39, %v1256_v40 }
 0x465   :  { %v1264_v9 = vrot.slane %v1257_v42, %v4595_v27 }
 0x467   :  { %v1266_v44 = vsub.f32 %v635_v7, %v1264_v9 }
 0x469   :  { %v1275_v47 = vrot.slane %v1266_v44, %v4590_v54  ;;  %v1279_v41 = vrot.slane %v1266_v44, %v4600_v33  ;;  %v1283_v45 = vrot.slane %v1266_v44, %v4648_v18  ;;  %v1287_v24 = vrot.slane %v1266_v44, %v4651_v19 }
 0x46b   :  { %v1292_v28 = vadd.f32 %v1275_v47, %v1267_v32  ;;  %v1293_v48 = vadd.f32 %v1279_v41, %v1268_v34  ;;  %v1294_v49 = vadd.f32 %v1283_v45, %v1269_v35  ;;  %v1295_v50 = vadd.f32 %v1287_v24, %v1270_v36 }
 0x46d   :  { %v1300_v51 = vmul.f32 %v1292_v28, %v1292_v28  ;;  %v1301_v53 = vmul.f32 %v1293_v48, %v1293_v48  ;;  %v1302_v55 = vmul.f32 %v1294_v49, %v1294_v49  ;;  %v1303_v56 = vmul.f32 %v1295_v50, %v1295_v50 }
 0x46e   :  { %v1296_v11 = vmul.f32 0.5, %v1292_v28  ;;  %v1297_v14 = vmul.f32 0.5, %v1293_v48  ;;  %v1298_v17 = vmul.f32 0.5, %v1294_v49  ;;  %v1299_v22 = vmul.f32 0.5, %v1295_v50 }
 0x46f   :  { %v1304_v57 = vmul.f32 %v1300_v51, %v1292_v28  ;;  %v1305_v58 = vmul.f32 %v1301_v53, %v1293_v48  ;;  %v1306_v43 = vmul.f32 %v1302_v55, %v1294_v49  ;;  %v1307_v46 = vmul.f32 %v1303_v56, %v1295_v50 }
 0x471   :  { %v1308_v59 = vmul.f32 0.044715, %v1304_v57  ;;  %v1309_v60 = vmul.f32 0.044715, %v1305_v58  ;;  %v1310_v61 = vmul.f32 0.044715, %v1306_v43 }
 0x472   :  { %v1311_v62 = vmul.f32 0.044715, %v1307_v46 }
 0x473   :  { %v1312_v63 = vadd.f32 %v1308_v59, %v1292_v28  ;;  %v1313_v0 = vadd.f32 %v1309_v60, %v1293_v48  ;;  %v1314_v1 = vadd.f32 %v1310_v61, %v1294_v49 }
 0x474   :  { %v1315_v2 = vadd.f32 %v1311_v62, %v1295_v50 }
 0x475   :  { %v1316_v3 = vmul.f32 0.7978846, %v1312_v63  ;;  %v1317_v4 = vmul.f32 0.7978846, %v1313_v0  ;;  %v1318_v5 = vmul.f32 0.7978846, %v1314_v1 }
 0x476   :  { %v1319_v6 = vmul.f32 0.7978846, %v1315_v2 }
 0x477   :  { %4062 = vtanh.f32 %v1316_v3 }
 0x478   :  { %4064 = vtanh.f32 %v1317_v4 }
 0x479   :  { %4066 = vtanh.f32 %v1318_v5 }
 0x47a   :  { %4068 = vtanh.f32 %v1319_v6 }
 0x481   :  { %v4063_v8 = vpop.eup %4062 }
 0x482   :  { %v4065_v10 = vpop.eup %4064  ;;  %v1324_v12 = vadd.f32 1.0, %v4063_v8 }
 0x483   :  { %v4067_v13 = vpop.eup %4066  ;;  %v1325_v15 = vadd.f32 1.0, %v4065_v10 }
 0x484   :  { %v4069_v16 = vpop.eup %4068  ;;  %v1326_v20 = vadd.f32 1.0, %v4067_v13  ;;  %v1328_v21 = vmul.f32 %v1324_v12, %v1296_v11 }
 0x485   :  { %v1327_v25 = vadd.f32 1.0, %v4069_v16  ;;  %v1329_v23 = vmul.f32 %v1325_v15, %v1297_v14 }
 0x486   :  { %v1330_v26 = vmul.f32 %v1326_v20, %v1298_v17  ;;  %v4670_v29 = vpack.c.bf16 %v1328_v21, %v1328_v21 }
 0x487   :  { %v1331_v30 = vmul.f32 %v1327_v25, %v1299_v22  ;;  %v4672_v31 = vpack.c.bf16 %v1329_v23, %v1329_v23 }
 0x488   :  { %v4674_v32 = vpack.c.bf16 %v1330_v26, %v1330_v26 }
 0x489   :  { %v4676_v34 = vpack.c.bf16 %v1331_v30, %v1331_v30 }
 0x48a   :  { %4360 = dma.done.wait [#allocation4], 32768 }
 0x48b   :  { %4361 = vsyncadd [#allocation4], 4294934528  ;;  %1631 = vmatprep.mubr.bf16.mxu0 %v4672_v31  ;;  %1713 = vmatprep.mubr.bf16.mxu1 %v4672_v31  ;;  %v1344_v35 = vld [vmem:[#allocation2 + $0x8] sm:$0xff]  ;;  %v1346_v36 = vld [vmem:[#allocation2 + $0x18] sm:$0xff] }
 0x48c   :  { %v1343_v37 = vld [vmem:[#allocation2] sm:$0xff]  ;;  %1599 = vmatprep.subr.bf16.mxu0 %v1344_v35  ;;  %1681 = vmatprep.subr.bf16.mxu1 %v1346_v36  ;;  %v1345_v38 = vld [vmem:[#allocation2 + $0x10] sm:$0xff]  ;;  %v1352_v39 = vld [vmem:[#allocation2 + $0x48] sm:$0xff] }
 0x48d   :  { %v1354_v40 = vld [vmem:[#allocation2 + $0x58] sm:$0xff]  ;;  %1600 = vmatpush1.bf16.msra.mxu0 %v1343_v37  ;;  %1682 = vmatpush1.bf16.msra.mxu1 %v1345_v38  ;;  %v1351_v42 = vld [vmem:[#allocation2 + $0x40] sm:$0xff]  ;;  %v1353_v7 = vld [vmem:[#allocation2 + $0x50] sm:$0xff] }
 0x48e   :  { %1601 = vmatprep.subr.bf16.mxu0 %v1352_v39  ;;  %1683 = vmatprep.subr.bf16.mxu1 %v1354_v40  ;;  %v1360_v9 = vld [vmem:[#allocation2 + $0x88] sm:$0xff]  ;;  %v1362_v44 = vld [vmem:[#allocation2 + $0x98] sm:$0xff]  ;;  %v1359_v47 = vld [vmem:[#allocation2 + $0x80] sm:$0xff] }
 0x48f   :  { %v1361_v41 = vld [vmem:[#allocation2 + $0x90] sm:$0xff]  ;;  %v1368_v45 = vld [vmem:[#allocation2 + $0xc8] sm:$0xff]  ;;  %v1370_v24 = vld [vmem:[#allocation2 + $0xd8] sm:$0xff] }
 0x490   :  { %v1367_v28 = vld [vmem:[#allocation2 + $0xc0] sm:$0xff]  ;;  %v1369_v48 = vld [vmem:[#allocation2 + $0xd0] sm:$0xff]  ;;  %v1376_v49 = vld [vmem:[#allocation2 + $0x108] sm:$0xff] }
 0x491   :  { %1602 = vmatpush1.bf16.msra.mxu0 %v1351_v42  ;;  %1684 = vmatpush1.bf16.msra.mxu1 %v1353_v7  ;;  %v1378_v50 = vld [vmem:[#allocation2 + $0x118] sm:$0xff]  ;;  %v1375_v51 = vld [vmem:[#allocation2 + $0x100] sm:$0xff]  ;;  %v1377_v53 = vld [vmem:[#allocation2 + $0x110] sm:$0xff] }
 0x492   :  { %1603 = vmatprep.subr.bf16.mxu0 %v1360_v9  ;;  %1685 = vmatprep.subr.bf16.mxu1 %v1362_v44  ;;  %v1384_v55 = vld [vmem:[#allocation2 + $0x148] sm:$0xff]  ;;  %v1386_v56 = vld [vmem:[#allocation2 + $0x158] sm:$0xff]  ;;  %v1383_v57 = vld [vmem:[#allocation2 + $0x140] sm:$0xff] }
 0x493   :  { %v1385_v58 = vld [vmem:[#allocation2 + $0x150] sm:$0xff]  ;;  %v1392_v43 = vld [vmem:[#allocation2 + $0x188] sm:$0xff]  ;;  %v1394_v46 = vld [vmem:[#allocation2 + $0x198] sm:$0xff] }
 0x494   :  { %v1391_v59 = vld [vmem:[#allocation2 + $0x180] sm:$0xff]  ;;  %v1393_v60 = vld [vmem:[#allocation2 + $0x190] sm:$0xff]  ;;  %v1400_v61 = vld [vmem:[#allocation2 + $0x1c8] sm:$0xff] }
 0x495   :  { %1604 = vmatpush1.bf16.msra.mxu0 %v1359_v47  ;;  %1686 = vmatpush1.bf16.msra.mxu1 %v1361_v41  ;;  %v1402_v62 = vld [vmem:[#allocation2 + $0x1d8] sm:$0xff]  ;;  %v1399_v63 = vld [vmem:[#allocation2 + $0x1c0] sm:$0xff]  ;;  %v1401_v0 = vld [vmem:[#allocation2 + $0x1d0] sm:$0xff] }
 0x496   :  { %1605 = vmatprep.subr.bf16.mxu0 %v1368_v45  ;;  %1687 = vmatprep.subr.bf16.mxu1 %v1370_v24  ;;  %v1408_v1 = vld [vmem:[#allocation2 + $0x208] sm:$0xff]  ;;  %v1410_v2 = vld [vmem:[#allocation2 + $0x218] sm:$0xff]  ;;  %v1407_v3 = vld [vmem:[#allocation2 + $0x200] sm:$0xff] }
 0x497   :  { %v1409_v4 = vld [vmem:[#allocation2 + $0x210] sm:$0xff]  ;;  %v1416_v5 = vld [vmem:[#allocation2 + $0x248] sm:$0xff]  ;;  %v1418_v6 = vld [vmem:[#allocation2 + $0x258] sm:$0xff] }
 0x498   :  { %v1415_v8 = vld [vmem:[#allocation2 + $0x240] sm:$0xff]  ;;  %v1417_v10 = vld [vmem:[#allocation2 + $0x250] sm:$0xff]  ;;  %v1424_v11 = vld [vmem:[#allocation2 + $0x288] sm:$0xff] }
 0x499   :  { %1606 = vmatpush1.bf16.msra.mxu0 %v1367_v28  ;;  %1688 = vmatpush1.bf16.msra.mxu1 %v1369_v48  ;;  %v1426_v12 = vld [vmem:[#allocation2 + $0x298] sm:$0xff]  ;;  %v1423_v13 = vld [vmem:[#allocation2 + $0x280] sm:$0xff]  ;;  %v1425_v14 = vld [vmem:[#allocation2 + $0x290] sm:$0xff] }
 0x49a   :  { %1607 = vmatprep.subr.bf16.mxu0 %v1376_v49  ;;  %1689 = vmatprep.subr.bf16.mxu1 %v1378_v50  ;;  %v1432_v15 = vld [vmem:[#allocation2 + $0x2c8] sm:$0xff]  ;;  %v1434_v16 = vld [vmem:[#allocation2 + $0x2d8] sm:$0xff]  ;;  %v1431_v17 = vld [vmem:[#allocation2 + $0x2c0] sm:$0xff] }
 0x49b   :  { %v1433_v20 = vld [vmem:[#allocation2 + $0x2d0] sm:$0xff]  ;;  %v1440_v21 = vld [vmem:[#allocation2 + $0x308] sm:$0xff]  ;;  %v1442_v22 = vld [vmem:[#allocation2 + $0x318] sm:$0xff] }
 0x49c   :  { %v1439_v25 = vld [vmem:[#allocation2 + $0x300] sm:$0xff]  ;;  %v1441_v23 = vld [vmem:[#allocation2 + $0x310] sm:$0xff]  ;;  %v1448_v26 = vld [vmem:[#allocation2 + $0x348] sm:$0xff] }
 0x49d   :  { %1608 = vmatpush1.bf16.msra.mxu0 %v1375_v51  ;;  %1690 = vmatpush1.bf16.msra.mxu1 %v1377_v53  ;;  %v1450_v30 = vld [vmem:[#allocation2 + $0x358] sm:$0xff]  ;;  %v1447_v35 = vld [vmem:[#allocation2 + $0x340] sm:$0xff]  ;;  %v1449_v36 = vld [vmem:[#allocation2 + $0x350] sm:$0xff] }
 0x49e   :  { %1609 = vmatprep.subr.bf16.mxu0 %v1384_v55  ;;  %1691 = vmatprep.subr.bf16.mxu1 %v1386_v56  ;;  %v1456_v37 = vld [vmem:[#allocation2 + $0x388] sm:$0xff]  ;;  %v1458_v38 = vld [vmem:[#allocation2 + $0x398] sm:$0xff]  ;;  %v1455_v39 = vld [vmem:[#allocation2 + $0x380] sm:$0xff] }
 0x49f   :  { %v1457_v40 = vld [vmem:[#allocation2 + $0x390] sm:$0xff]  ;;  %v1464_v42 = vld [vmem:[#allocation2 + $0x3c8] sm:$0xff]  ;;  %v1466_v7 = vld [vmem:[#allocation2 + $0x3d8] sm:$0xff] }
 0x4a0   :  { %v1463_v9 = vld [vmem:[#allocation2 + $0x3c0] sm:$0xff]  ;;  %v1465_v44 = vld [vmem:[#allocation2 + $0x3d0] sm:$0xff]  ;;  %v1472_v47 = vld [vmem:[#allocation2 + $0x408] sm:$0xff] }
 0x4a1   :  { %1610 = vmatpush1.bf16.msra.mxu0 %v1383_v57  ;;  %1692 = vmatpush1.bf16.msra.mxu1 %v1385_v58  ;;  %v1474_v41 = vld [vmem:[#allocation2 + $0x418] sm:$0xff]  ;;  %v1471_v45 = vld [vmem:[#allocation2 + $0x400] sm:$0xff]  ;;  %v1473_v24 = vld [vmem:[#allocation2 + $0x410] sm:$0xff] }
 0x4a2   :  { %1611 = vmatprep.subr.bf16.mxu0 %v1392_v43  ;;  %1693 = vmatprep.subr.bf16.mxu1 %v1394_v46  ;;  %v1480_v28 = vld [vmem:[#allocation2 + $0x448] sm:$0xff]  ;;  %v1482_v48 = vld [vmem:[#allocation2 + $0x458] sm:$0xff]  ;;  %v1479_v49 = vld [vmem:[#allocation2 + $0x440] sm:$0xff] }
 0x4a3   :  { %v1481_v50 = vld [vmem:[#allocation2 + $0x450] sm:$0xff]  ;;  %v1488_v51 = vld [vmem:[#allocation2 + $0x488] sm:$0xff]  ;;  %v1490_v53 = vld [vmem:[#allocation2 + $0x498] sm:$0xff] }
 0x4a4   :  { %v1487_v55 = vld [vmem:[#allocation2 + $0x480] sm:$0xff]  ;;  %v1489_v56 = vld [vmem:[#allocation2 + $0x490] sm:$0xff]  ;;  %v1496_v57 = vld [vmem:[#allocation2 + $0x4c8] sm:$0xff] }
 0x4a5   :  { %1612 = vmatpush1.bf16.msra.mxu0 %v1391_v59  ;;  %1694 = vmatpush1.bf16.msra.mxu1 %v1393_v60  ;;  %v1498_v58 = vld [vmem:[#allocation2 + $0x4d8] sm:$0xff]  ;;  %v1495_v43 = vld [vmem:[#allocation2 + $0x4c0] sm:$0xff]  ;;  %v1497_v46 = vld [vmem:[#allocation2 + $0x4d0] sm:$0xff] }
 0x4a6   :  { %1613 = vmatprep.subr.bf16.mxu0 %v1400_v61  ;;  %1695 = vmatprep.subr.bf16.mxu1 %v1402_v62  ;;  %v1504_v59 = vld [vmem:[#allocation2 + $0x508] sm:$0xff]  ;;  %v1506_v60 = vld [vmem:[#allocation2 + $0x518] sm:$0xff]  ;;  %v1503_v61 = vld [vmem:[#allocation2 + $0x500] sm:$0xff] }
 0x4a7   :  { %v1505_v62 = vld [vmem:[#allocation2 + $0x510] sm:$0xff] }
 0x4a9   :  { %1614 = vmatpush1.bf16.msra.mxu0 %v1399_v63  ;;  %1696 = vmatpush1.bf16.msra.mxu1 %v1401_v0  ;;  %v1512_v63 = vld [vmem:[#allocation2 + $0x548] sm:$0xff]  ;;  %v1514_v0 = vld [vmem:[#allocation2 + $0x558] sm:$0xff] }
 0x4aa   :  { %1615 = vmatprep.subr.bf16.mxu0 %v1408_v1  ;;  %1697 = vmatprep.subr.bf16.mxu1 %v1410_v2  ;;  %v1511_v1 = vld [vmem:[#allocation2 + $0x540] sm:$0xff]  ;;  %v1513_v2 = vld [vmem:[#allocation2 + $0x550] sm:$0xff] }
 0x4ad   :  { %1616 = vmatpush1.bf16.msra.mxu0 %v1407_v3  ;;  %1698 = vmatpush1.bf16.msra.mxu1 %v1409_v4  ;;  %v1520_v3 = vld [vmem:[#allocation2 + $0x588] sm:$0xff]  ;;  %v1522_v4 = vld [vmem:[#allocation2 + $0x598] sm:$0xff] }
 0x4ae   :  { %1617 = vmatprep.subr.bf16.mxu0 %v1416_v5  ;;  %1699 = vmatprep.subr.bf16.mxu1 %v1418_v6  ;;  %v1519_v5 = vld [vmem:[#allocation2 + $0x580] sm:$0xff]  ;;  %v1521_v6 = vld [vmem:[#allocation2 + $0x590] sm:$0xff] }
 0x4b1   :  { %1618 = vmatpush1.bf16.msra.mxu0 %v1415_v8  ;;  %1700 = vmatpush1.bf16.msra.mxu1 %v1417_v10  ;;  %v1528_v8 = vld [vmem:[#allocation2 + $0x5c8] sm:$0xff]  ;;  %v1530_v10 = vld [vmem:[#allocation2 + $0x5d8] sm:$0xff] }
 0x4b2   :  { %1619 = vmatprep.subr.bf16.mxu0 %v1424_v11  ;;  %1701 = vmatprep.subr.bf16.mxu1 %v1426_v12  ;;  %v1527_v11 = vld [vmem:[#allocation2 + $0x5c0] sm:$0xff]  ;;  %v1529_v12 = vld [vmem:[#allocation2 + $0x5d0] sm:$0xff] }
 0x4b5   :  { %1620 = vmatpush1.bf16.msra.mxu0 %v1423_v13  ;;  %1702 = vmatpush1.bf16.msra.mxu1 %v1425_v14  ;;  %v1536_v13 = vld [vmem:[#allocation2 + $0x608] sm:$0xff]  ;;  %v1538_v14 = vld [vmem:[#allocation2 + $0x618] sm:$0xff] }
 0x4b6   :  { %1621 = vmatprep.subr.bf16.mxu0 %v1432_v15  ;;  %1703 = vmatprep.subr.bf16.mxu1 %v1434_v16  ;;  %v1535_v15 = vld [vmem:[#allocation2 + $0x600] sm:$0xff]  ;;  %v1537_v16 = vld [vmem:[#allocation2 + $0x610] sm:$0xff] }
 0x4b9   :  { %1622 = vmatpush1.bf16.msra.mxu0 %v1431_v17  ;;  %1704 = vmatpush1.bf16.msra.mxu1 %v1433_v20  ;;  %v1544_v17 = vld [vmem:[#allocation2 + $0x648] sm:$0xff]  ;;  %v1546_v20 = vld [vmem:[#allocation2 + $0x658] sm:$0xff] }
 0x4ba   :  { %1623 = vmatprep.subr.bf16.mxu0 %v1440_v21  ;;  %1705 = vmatprep.subr.bf16.mxu1 %v1442_v22  ;;  %v1543_v21 = vld [vmem:[#allocation2 + $0x640] sm:$0xff]  ;;  %v1545_v22 = vld [vmem:[#allocation2 + $0x650] sm:$0xff] }
 0x4bd   :  { %1624 = vmatpush1.bf16.msra.mxu0 %v1439_v25  ;;  %1706 = vmatpush1.bf16.msra.mxu1 %v1441_v23  ;;  %v1552_v25 = vld [vmem:[#allocation2 + $0x688] sm:$0xff]  ;;  %v1554_v23 = vld [vmem:[#allocation2 + $0x698] sm:$0xff] }
 0x4be   :  { %1625 = vmatprep.subr.bf16.mxu0 %v1448_v26  ;;  %1707 = vmatprep.subr.bf16.mxu1 %v1450_v30  ;;  %v1551_v26 = vld [vmem:[#allocation2 + $0x680] sm:$0xff]  ;;  %v1553_v30 = vld [vmem:[#allocation2 + $0x690] sm:$0xff] }
 0x4c1   :  { %1626 = vmatpush1.bf16.msra.mxu0 %v1447_v35  ;;  %1708 = vmatpush1.bf16.msra.mxu1 %v1449_v36  ;;  %v1560_v35 = vld [vmem:[#allocation2 + $0x6c8] sm:$0xff]  ;;  %v1562_v36 = vld [vmem:[#allocation2 + $0x6d8] sm:$0xff] }
 0x4c2   :  { %1627 = vmatprep.subr.bf16.mxu0 %v1456_v37  ;;  %1709 = vmatprep.subr.bf16.mxu1 %v1458_v38  ;;  %v1559_v37 = vld [vmem:[#allocation2 + $0x6c0] sm:$0xff]  ;;  %v1561_v38 = vld [vmem:[#allocation2 + $0x6d0] sm:$0xff] }
 0x4c5   :  { %1628 = vmatpush1.bf16.msra.mxu0 %v1455_v39  ;;  %1710 = vmatpush1.bf16.msra.mxu1 %v1457_v40  ;;  %v1568_v39 = vld [vmem:[#allocation2 + $0x708] sm:$0xff]  ;;  %v1570_v40 = vld [vmem:[#allocation2 + $0x718] sm:$0xff] }
 0x4c6   :  { %1629 = vmatprep.subr.bf16.mxu0 %v1464_v42  ;;  %1711 = vmatprep.subr.bf16.mxu1 %v1466_v7  ;;  %v1567_v42 = vld [vmem:[#allocation2 + $0x700] sm:$0xff]  ;;  %v1569_v7 = vld [vmem:[#allocation2 + $0x710] sm:$0xff] }
 0x4c9   :  { %1630 = vmatpush1.bf16.msra.mxu0 %v1463_v9  ;;  %1712 = vmatpush1.bf16.msra.mxu1 %v1465_v44  ;;  %v1576_v9 = vld [vmem:[#allocation2 + $0x748] sm:$0xff]  ;;  %v1578_v44 = vld [vmem:[#allocation2 + $0x758] sm:$0xff] }
 0x4ca   :  { %1640 = vmatprep.subr.bf16.mxu0 %v1472_v47  ;;  %1722 = vmatprep.subr.bf16.mxu1 %v1474_v41  ;;  %v1575_v47 = vld [vmem:[#allocation2 + $0x740] sm:$0xff]  ;;  %v1577_v41 = vld [vmem:[#allocation2 + $0x750] sm:$0xff] }
 0x4cc   :  { %1632 = vmatmul.mubr.bf16.vlgmr.msra.gmra.mrb[4].mxu0 %v4670_v29  ;;  %1714 = vmatmul.mubr.bf16.vlgmr.msra.gmra.mrb[12].mxu1 %v4670_v29 }
 0x4cd   :  { %1641 = vmatpush1.bf16.msra.mxu0 %v1471_v45  ;;  %1723 = vmatpush1.bf16.msra.mxu1 %v1473_v24  ;;  %v1584_v45 = vld [vmem:[#allocation2 + $0x788] sm:$0xff]  ;;  %v1586_v24 = vld [vmem:[#allocation2 + $0x798] sm:$0xff] }
 0x4ce   :  { %1642 = vmatprep.subr.bf16.mxu0 %v1480_v28  ;;  %1724 = vmatprep.subr.bf16.mxu1 %v1482_v48  ;;  %v1583_v28 = vld [vmem:[#allocation2 + $0x780] sm:$0xff]  ;;  %v1585_v48 = vld [vmem:[#allocation2 + $0x790] sm:$0xff] }
 0x4cf   :  { %1672 = vmatprep.mubr.bf16.mxu0 %v4676_v34  ;;  %1754 = vmatprep.mubr.bf16.mxu1 %v4676_v34 }
 0x4d1   :  { %1643 = vmatpush1.bf16.msra.mxu0 %v1479_v49  ;;  %1725 = vmatpush1.bf16.msra.mxu1 %v1481_v50  ;;  %v1592_v49 = vld [vmem:[#allocation2 + $0x7c8] sm:$0xff]  ;;  %v1594_v50 = vld [vmem:[#allocation2 + $0x7d8] sm:$0xff] }
 0x4d2   :  { %1644 = vmatprep.subr.bf16.mxu0 %v1488_v51  ;;  %1726 = vmatprep.subr.bf16.mxu1 %v1490_v53  ;;  %v1591_v51 = vld [vmem:[#allocation2 + $0x7c0] sm:$0xff]  ;;  %v1593_v53 = vld [vmem:[#allocation2 + $0x7d0] sm:$0xff] }
 0x4d5   :  { %1645 = vmatpush1.bf16.msra.mxu0 %v1487_v55  ;;  %1727 = vmatpush1.bf16.msra.mxu1 %v1489_v56  ;;  %v1348_v55 = vld [vmem:[#allocation2 + $0x28] sm:$0xff]  ;;  %v1350_v56 = vld [vmem:[#allocation2 + $0x38] sm:$0xff] }
 0x4d6   :  { %1646 = vmatprep.subr.bf16.mxu0 %v1496_v57  ;;  %1728 = vmatprep.subr.bf16.mxu1 %v1498_v58  ;;  %v1347_v57 = vld [vmem:[#allocation2 + $0x20] sm:$0xff]  ;;  %v1349_v58 = vld [vmem:[#allocation2 + $0x30] sm:$0xff] }
 0x4d9   :  { %1647 = vmatpush1.bf16.msra.mxu0 %v1495_v43  ;;  %1729 = vmatpush1.bf16.msra.mxu1 %v1497_v46  ;;  %v1356_v43 = vld [vmem:[#allocation2 + $0x68] sm:$0xff]  ;;  %v1358_v46 = vld [vmem:[#allocation2 + $0x78] sm:$0xff] }
 0x4da   :  { %1648 = vmatprep.subr.bf16.mxu0 %v1504_v59  ;;  %1730 = vmatprep.subr.bf16.mxu1 %v1506_v60  ;;  %v1355_v59 = vld [vmem:[#allocation2 + $0x60] sm:$0xff]  ;;  %v1357_v60 = vld [vmem:[#allocation2 + $0x70] sm:$0xff] }
 0x4dd   :  { %1649 = vmatpush1.bf16.msra.mxu0 %v1503_v61  ;;  %1731 = vmatpush1.bf16.msra.mxu1 %v1505_v62  ;;  %v1364_v61 = vld [vmem:[#allocation2 + $0xa8] sm:$0xff]  ;;  %v1366_v62 = vld [vmem:[#allocation2 + $0xb8] sm:$0xff] }
 0x4de   :  { %1650 = vmatprep.subr.bf16.mxu0 %v1512_v63  ;;  %1732 = vmatprep.subr.bf16.mxu1 %v1514_v0  ;;  %v1363_v63 = vld [vmem:[#allocation2 + $0xa0] sm:$0xff]  ;;  %v1365_v0 = vld [vmem:[#allocation2 + $0xb0] sm:$0xff] }
 0x4e1   :  { %1651 = vmatpush1.bf16.msra.mxu0 %v1511_v1  ;;  %1733 = vmatpush1.bf16.msra.mxu1 %v1513_v2  ;;  %v1372_v1 = vld [vmem:[#allocation2 + $0xe8] sm:$0xff]  ;;  %v1374_v2 = vld [vmem:[#allocation2 + $0xf8] sm:$0xff] }
 0x4e2   :  { %1652 = vmatprep.subr.bf16.mxu0 %v1520_v3  ;;  %1734 = vmatprep.subr.bf16.mxu1 %v1522_v4  ;;  %v1371_v3 = vld [vmem:[#allocation2 + $0xe0] sm:$0xff]  ;;  %v1373_v4 = vld [vmem:[#allocation2 + $0xf0] sm:$0xff] }
 0x4e5   :  { %1653 = vmatpush1.bf16.msra.mxu0 %v1519_v5  ;;  %1735 = vmatpush1.bf16.msra.mxu1 %v1521_v6  ;;  %v1380_v5 = vld [vmem:[#allocation2 + $0x128] sm:$0xff]  ;;  %v1382_v6 = vld [vmem:[#allocation2 + $0x138] sm:$0xff] }
 0x4e6   :  { %1654 = vmatprep.subr.bf16.mxu0 %v1528_v8  ;;  %1736 = vmatprep.subr.bf16.mxu1 %v1530_v10  ;;  %v1381_v8 = vld [vmem:[#allocation2 + $0x130] sm:$0xff]  ;;  %v1388_v10 = vld [vmem:[#allocation2 + $0x168] sm:$0xff] }
 0x4e9   :  { %1655 = vmatpush1.bf16.msra.mxu0 %v1527_v11  ;;  %1737 = vmatpush1.bf16.msra.mxu1 %v1529_v12  ;;  %v1390_v11 = vld [vmem:[#allocation2 + $0x178] sm:$0xff]  ;;  %v1387_v12 = vld [vmem:[#allocation2 + $0x160] sm:$0xff] }
 0x4ea   :  { %1656 = vmatprep.subr.bf16.mxu0 %v1536_v13  ;;  %1738 = vmatprep.subr.bf16.mxu1 %v1538_v14  ;;  %v1389_v13 = vld [vmem:[#allocation2 + $0x170] sm:$0xff]  ;;  %v1396_v14 = vld [vmem:[#allocation2 + $0x1a8] sm:$0xff] }
 0x4ed   :  { %1657 = vmatpush1.bf16.msra.mxu0 %v1535_v15  ;;  %1739 = vmatpush1.bf16.msra.mxu1 %v1537_v16  ;;  %v1398_v15 = vld [vmem:[#allocation2 + $0x1b8] sm:$0xff]  ;;  %v1395_v16 = vld [vmem:[#allocation2 + $0x1a0] sm:$0xff] }
 0x4ee   :  { %1658 = vmatprep.subr.bf16.mxu0 %v1544_v17  ;;  %1740 = vmatprep.subr.bf16.mxu1 %v1546_v20  ;;  %v1397_v17 = vld [vmem:[#allocation2 + $0x1b0] sm:$0xff]  ;;  %v1404_v20 = vld [vmem:[#allocation2 + $0x1e8] sm:$0xff] }
 0x4f1   :  { %1659 = vmatpush1.bf16.msra.mxu0 %v1543_v21  ;;  %1741 = vmatpush1.bf16.msra.mxu1 %v1545_v22  ;;  %v1406_v21 = vld [vmem:[#allocation2 + $0x1f8] sm:$0xff]  ;;  %v1403_v22 = vld [vmem:[#allocation2 + $0x1e0] sm:$0xff] }
 0x4f2   :  { %1660 = vmatprep.subr.bf16.mxu0 %v1552_v25  ;;  %1742 = vmatprep.subr.bf16.mxu1 %v1554_v23  ;;  %v1405_v25 = vld [vmem:[#allocation2 + $0x1f0] sm:$0xff]  ;;  %v1412_v23 = vld [vmem:[#allocation2 + $0x228] sm:$0xff] }
 0x4f5   :  { %1661 = vmatpush1.bf16.msra.mxu0 %v1551_v26  ;;  %1743 = vmatpush1.bf16.msra.mxu1 %v1553_v30  ;;  %v1414_v26 = vld [vmem:[#allocation2 + $0x238] sm:$0xff]  ;;  %v1411_v30 = vld [vmem:[#allocation2 + $0x220] sm:$0xff] }
 0x4f6   :  { %1662 = vmatprep.subr.bf16.mxu0 %v1560_v35  ;;  %1744 = vmatprep.subr.bf16.mxu1 %v1562_v36  ;;  %v1413_v35 = vld [vmem:[#allocation2 + $0x230] sm:$0xff]  ;;  %v1420_v36 = vld [vmem:[#allocation2 + $0x268] sm:$0xff] }
 0x4f9   :  { %1663 = vmatpush1.bf16.msra.mxu0 %v1559_v37  ;;  %1745 = vmatpush1.bf16.msra.mxu1 %v1561_v38  ;;  %v1422_v37 = vld [vmem:[#allocation2 + $0x278] sm:$0xff]  ;;  %v1419_v38 = vld [vmem:[#allocation2 + $0x260] sm:$0xff] }
 0x4fa   :  { %1664 = vmatprep.subr.bf16.mxu0 %v1568_v39  ;;  %1746 = vmatprep.subr.bf16.mxu1 %v1570_v40  ;;  %v1421_v39 = vld [vmem:[#allocation2 + $0x270] sm:$0xff]  ;;  %v1428_v40 = vld [vmem:[#allocation2 + $0x2a8] sm:$0xff] }
 0x4fd   :  { %1665 = vmatpush1.bf16.msra.mxu0 %v1567_v42  ;;  %1747 = vmatpush1.bf16.msra.mxu1 %v1569_v7  ;;  %v1430_v42 = vld [vmem:[#allocation2 + $0x2b8] sm:$0xff]  ;;  %v1427_v7 = vld [vmem:[#allocation2 + $0x2a0] sm:$0xff] }
 0x4fe   :  { %1666 = vmatprep.subr.bf16.mxu0 %v1576_v9  ;;  %1748 = vmatprep.subr.bf16.mxu1 %v1578_v44  ;;  %v1429_v9 = vld [vmem:[#allocation2 + $0x2b0] sm:$0xff]  ;;  %v1436_v44 = vld [vmem:[#allocation2 + $0x2e8] sm:$0xff] }
 0x501   :  { %1667 = vmatpush1.bf16.msra.mxu0 %v1575_v47  ;;  %1749 = vmatpush1.bf16.msra.mxu1 %v1577_v41  ;;  %v1438_v47 = vld [vmem:[#allocation2 + $0x2f8] sm:$0xff]  ;;  %v1435_v41 = vld [vmem:[#allocation2 + $0x2e0] sm:$0xff] }
 0x502   :  { %1668 = vmatprep.subr.bf16.mxu0 %v1584_v45  ;;  %1750 = vmatprep.subr.bf16.mxu1 %v1586_v24  ;;  %v1437_v45 = vld [vmem:[#allocation2 + $0x2f0] sm:$0xff]  ;;  %v1444_v24 = vld [vmem:[#allocation2 + $0x328] sm:$0xff] }
 0x505   :  { %1669 = vmatpush1.bf16.msra.mxu0 %v1583_v28  ;;  %1751 = vmatpush1.bf16.msra.mxu1 %v1585_v48  ;;  %v1446_v28 = vld [vmem:[#allocation2 + $0x338] sm:$0xff]  ;;  %v1443_v48 = vld [vmem:[#allocation2 + $0x320] sm:$0xff] }
 0x506   :  { %1670 = vmatprep.subr.bf16.mxu0 %v1592_v49  ;;  %1752 = vmatprep.subr.bf16.mxu1 %v1594_v50  ;;  %v1445_v49 = vld [vmem:[#allocation2 + $0x330] sm:$0xff]  ;;  %v1452_v50 = vld [vmem:[#allocation2 + $0x368] sm:$0xff] }
 0x509   :  { %1671 = vmatpush1.bf16.msra.mxu0 %v1591_v51  ;;  %1753 = vmatpush1.bf16.msra.mxu1 %v1593_v53  ;;  %v1454_v51 = vld [vmem:[#allocation2 + $0x378] sm:$0xff]  ;;  %v1451_v53 = vld [vmem:[#allocation2 + $0x360] sm:$0xff] }
 0x50a   :  { %1763 = vmatprep.subr.bf16.mxu0 %v1348_v55  ;;  %1845 = vmatprep.subr.bf16.mxu1 %v1350_v56  ;;  %v1453_v55 = vld [vmem:[#allocation2 + $0x370] sm:$0xff]  ;;  %v1460_v56 = vld [vmem:[#allocation2 + $0x3a8] sm:$0xff] }
 0x50c   :  { %1673 = vmatmul.mubr.bf16.vlgmr.msra.gmra.mrb[4].mxu0 %v4674_v32  ;;  %1755 = vmatmul.mubr.bf16.vlgmr.msra.gmra.mrb[12].mxu1 %v4674_v32 }
 0x50d   :  { %1764 = vmatpush1.bf16.msra.mxu0 %v1347_v57  ;;  %1846 = vmatpush1.bf16.msra.mxu1 %v1349_v58  ;;  %v1462_v57 = vld [vmem:[#allocation2 + $0x3b8] sm:$0xff]  ;;  %v1459_v58 = vld [vmem:[#allocation2 + $0x3a0] sm:$0xff] }
 0x50e   :  { %1765 = vmatprep.subr.bf16.mxu0 %v1356_v43  ;;  %1847 = vmatprep.subr.bf16.mxu1 %v1358_v46  ;;  %v1461_v43 = vld [vmem:[#allocation2 + $0x3b0] sm:$0xff]  ;;  %v1468_v46 = vld [vmem:[#allocation2 + $0x3e8] sm:$0xff] }
 0x50f   :  { %1795 = vmatprep.mubr.bf16.mxu0 %v4672_v31  ;;  %1877 = vmatprep.mubr.bf16.mxu1 %v4672_v31  ;;  %v1379_v31 = vld [vmem:[#allocation2 + $0x120] sm:$0xff] }
 0x511   :  { %1766 = vmatpush1.bf16.msra.mxu0 %v1355_v59  ;;  %1848 = vmatpush1.bf16.msra.mxu1 %v1357_v60  ;;  %v1470_v59 = vld [vmem:[#allocation2 + $0x3f8] sm:$0xff]  ;;  %v1467_v60 = vld [vmem:[#allocation2 + $0x3e0] sm:$0xff] }
 0x512   :  { %1767 = vmatprep.subr.bf16.mxu0 %v1364_v61  ;;  %1849 = vmatprep.subr.bf16.mxu1 %v1366_v62  ;;  %v1469_v61 = vld [vmem:[#allocation2 + $0x3f0] sm:$0xff]  ;;  %v1476_v62 = vld [vmem:[#allocation2 + $0x428] sm:$0xff] }
 0x515   :  { %1768 = vmatpush1.bf16.msra.mxu0 %v1363_v63  ;;  %1850 = vmatpush1.bf16.msra.mxu1 %v1365_v0  ;;  %v1478_v63 = vld [vmem:[#allocation2 + $0x438] sm:$0xff]  ;;  %v1475_v0 = vld [vmem:[#allocation2 + $0x420] sm:$0xff] }
 0x516   :  { %1769 = vmatprep.subr.bf16.mxu0 %v1372_v1  ;;  %1851 = vmatprep.subr.bf16.mxu1 %v1374_v2  ;;  %v1477_v1 = vld [vmem:[#allocation2 + $0x430] sm:$0xff]  ;;  %v1484_v2 = vld [vmem:[#allocation2 + $0x468] sm:$0xff] }
 0x519   :  { %1770 = vmatpush1.bf16.msra.mxu0 %v1371_v3  ;;  %1852 = vmatpush1.bf16.msra.mxu1 %v1373_v4  ;;  %v1486_v3 = vld [vmem:[#allocation2 + $0x478] sm:$0xff]  ;;  %v1483_v4 = vld [vmem:[#allocation2 + $0x460] sm:$0xff] }
 0x51a   :  { %1771 = vmatprep.subr.bf16.mxu0 %v1380_v5  ;;  %1853 = vmatprep.subr.bf16.mxu1 %v1382_v6  ;;  %v1485_v5 = vld [vmem:[#allocation2 + $0x470] sm:$0xff]  ;;  %v1492_v6 = vld [vmem:[#allocation2 + $0x4a8] sm:$0xff] }
 0x51d   :  { %1772 = vmatpush1.bf16.msra.mxu0 %v1379_v31  ;;  %1854 = vmatpush1.bf16.msra.mxu1 %v1381_v8  ;;  %v1494_v31 = vld [vmem:[#allocation2 + $0x4b8] sm:$0xff]  ;;  %v1491_v8 = vld [vmem:[#allocation2 + $0x4a0] sm:$0xff] }
 0x51e   :  { %1773 = vmatprep.subr.bf16.mxu0 %v1388_v10  ;;  %1855 = vmatprep.subr.bf16.mxu1 %v1390_v11  ;;  %v1493_v10 = vld [vmem:[#allocation2 + $0x4b0] sm:$0xff]  ;;  %v1500_v11 = vld [vmem:[#allocation2 + $0x4e8] sm:$0xff] }
 0x521   :  { %1774 = vmatpush1.bf16.msra.mxu0 %v1387_v12  ;;  %1856 = vmatpush1.bf16.msra.mxu1 %v1389_v13  ;;  %v1499_v12 = vld [vmem:[#allocation2 + $0x4e0] sm:$0xff]  ;;  %v1501_v13 = vld [vmem:[#allocation2 + $0x4f0] sm:$0xff] }
 0x522   :  { %1775 = vmatprep.subr.bf16.mxu0 %v1396_v14  ;;  %1857 = vmatprep.subr.bf16.mxu1 %v1398_v15  ;;  %v1508_v14 = vld [vmem:[#allocation2 + $0x528] sm:$0xff]  ;;  %v1510_v15 = vld [vmem:[#allocation2 + $0x538] sm:$0xff] }
 0x525   :  { %1776 = vmatpush1.bf16.msra.mxu0 %v1395_v16  ;;  %1858 = vmatpush1.bf16.msra.mxu1 %v1397_v17  ;;  %v1509_v16 = vld [vmem:[#allocation2 + $0x530] sm:$0xff]  ;;  %v1516_v17 = vld [vmem:[#allocation2 + $0x568] sm:$0xff] }
 0x526   :  { %1777 = vmatprep.subr.bf16.mxu0 %v1404_v20  ;;  %1859 = vmatprep.subr.bf16.mxu1 %v1406_v21  ;;  %v1518_v20 = vld [vmem:[#allocation2 + $0x578] sm:$0xff]  ;;  %v1515_v21 = vld [vmem:[#allocation2 + $0x560] sm:$0xff] }
 0x529   :  { %1778 = vmatpush1.bf16.msra.mxu0 %v1403_v22  ;;  %1860 = vmatpush1.bf16.msra.mxu1 %v1405_v25  ;;  %v1517_v22 = vld [vmem:[#allocation2 + $0x570] sm:$0xff]  ;;  %v1524_v25 = vld [vmem:[#allocation2 + $0x5a8] sm:$0xff] }
 0x52a   :  { %1779 = vmatprep.subr.bf16.mxu0 %v1412_v23  ;;  %1861 = vmatprep.subr.bf16.mxu1 %v1414_v26  ;;  %v1526_v23 = vld [vmem:[#allocation2 + $0x5b8] sm:$0xff]  ;;  %v1523_v26 = vld [vmem:[#allocation2 + $0x5a0] sm:$0xff] }
 0x52d   :  { %1780 = vmatpush1.bf16.msra.mxu0 %v1411_v30  ;;  %1862 = vmatpush1.bf16.msra.mxu1 %v1413_v35  ;;  %v1525_v30 = vld [vmem:[#allocation2 + $0x5b0] sm:$0xff]  ;;  %v1532_v35 = vld [vmem:[#allocation2 + $0x5e8] sm:$0xff] }
 0x52e   :  { %1781 = vmatprep.subr.bf16.mxu0 %v1420_v36  ;;  %1863 = vmatprep.subr.bf16.mxu1 %v1422_v37  ;;  %v1534_v36 = vld [vmem:[#allocation2 + $0x5f8] sm:$0xff]  ;;  %v1531_v37 = vld [vmem:[#allocation2 + $0x5e0] sm:$0xff] }
 0x531   :  { %1782 = vmatpush1.bf16.msra.mxu0 %v1419_v38  ;;  %1864 = vmatpush1.bf16.msra.mxu1 %v1421_v39  ;;  %v1533_v38 = vld [vmem:[#allocation2 + $0x5f0] sm:$0xff]  ;;  %v1540_v39 = vld [vmem:[#allocation2 + $0x628] sm:$0xff] }
 0x532   :  { %1783 = vmatprep.subr.bf16.mxu0 %v1428_v40  ;;  %1865 = vmatprep.subr.bf16.mxu1 %v1430_v42  ;;  %v1542_v40 = vld [vmem:[#allocation2 + $0x638] sm:$0xff]  ;;  %v1539_v42 = vld [vmem:[#allocation2 + $0x620] sm:$0xff] }
 0x535   :  { %1784 = vmatpush1.bf16.msra.mxu0 %v1427_v7  ;;  %1866 = vmatpush1.bf16.msra.mxu1 %v1429_v9  ;;  %v1541_v7 = vld [vmem:[#allocation2 + $0x630] sm:$0xff]  ;;  %v1548_v9 = vld [vmem:[#allocation2 + $0x668] sm:$0xff] }
 0x536   :  { %1785 = vmatprep.subr.bf16.mxu0 %v1436_v44  ;;  %1867 = vmatprep.subr.bf16.mxu1 %v1438_v47  ;;  %v1550_v44 = vld [vmem:[#allocation2 + $0x678] sm:$0xff]  ;;  %v1547_v47 = vld [vmem:[#allocation2 + $0x660] sm:$0xff] }
 0x539   :  { %1786 = vmatpush1.bf16.msra.mxu0 %v1435_v41  ;;  %1868 = vmatpush1.bf16.msra.mxu1 %v1437_v45  ;;  %v1549_v41 = vld [vmem:[#allocation2 + $0x670] sm:$0xff]  ;;  %v1556_v45 = vld [vmem:[#allocation2 + $0x6a8] sm:$0xff] }
 0x53a   :  { %1787 = vmatprep.subr.bf16.mxu0 %v1444_v24  ;;  %1869 = vmatprep.subr.bf16.mxu1 %v1446_v28  ;;  %v1558_v24 = vld [vmem:[#allocation2 + $0x6b8] sm:$0xff]  ;;  %v1555_v28 = vld [vmem:[#allocation2 + $0x6a0] sm:$0xff] }
 0x53d   :  { %1788 = vmatpush1.bf16.msra.mxu0 %v1443_v48  ;;  %1870 = vmatpush1.bf16.msra.mxu1 %v1445_v49  ;;  %v1557_v48 = vld [vmem:[#allocation2 + $0x6b0] sm:$0xff]  ;;  %v1564_v49 = vld [vmem:[#allocation2 + $0x6e8] sm:$0xff] }
 0x53e   :  { %1789 = vmatprep.subr.bf16.mxu0 %v1452_v50  ;;  %1871 = vmatprep.subr.bf16.mxu1 %v1454_v51  ;;  %v1566_v50 = vld [vmem:[#allocation2 + $0x6f8] sm:$0xff]  ;;  %v1563_v51 = vld [vmem:[#allocation2 + $0x6e0] sm:$0xff] }
 0x541   :  { %1790 = vmatpush1.bf16.msra.mxu0 %v1451_v53  ;;  %1872 = vmatpush1.bf16.msra.mxu1 %v1453_v55  ;;  %v1565_v53 = vld [vmem:[#allocation2 + $0x6f0] sm:$0xff]  ;;  %v1572_v55 = vld [vmem:[#allocation2 + $0x728] sm:$0xff] }
 0x542   :  { %1791 = vmatprep.subr.bf16.mxu0 %v1460_v56  ;;  %1873 = vmatprep.subr.bf16.mxu1 %v1462_v57  ;;  %v1574_v56 = vld [vmem:[#allocation2 + $0x738] sm:$0xff]  ;;  %v1571_v57 = vld [vmem:[#allocation2 + $0x720] sm:$0xff] }
 0x545   :  { %1792 = vmatpush1.bf16.msra.mxu0 %v1459_v58  ;;  %1874 = vmatpush1.bf16.msra.mxu1 %v1461_v43  ;;  %v1573_v58 = vld [vmem:[#allocation2 + $0x730] sm:$0xff]  ;;  %v1580_v43 = vld [vmem:[#allocation2 + $0x768] sm:$0xff] }
 0x546   :  { %1793 = vmatprep.subr.bf16.mxu0 %v1468_v46  ;;  %1875 = vmatprep.subr.bf16.mxu1 %v1470_v59  ;;  %v1582_v46 = vld [vmem:[#allocation2 + $0x778] sm:$0xff]  ;;  %v1579_v59 = vld [vmem:[#allocation2 + $0x760] sm:$0xff] }
 0x549   :  { %1794 = vmatpush1.bf16.msra.mxu0 %v1467_v60  ;;  %1876 = vmatpush1.bf16.msra.mxu1 %v1469_v61  ;;  %v1581_v60 = vld [vmem:[#allocation2 + $0x770] sm:$0xff]  ;;  %v1588_v61 = vld [vmem:[#allocation2 + $0x7a8] sm:$0xff] }
 0x54a   :  { %1804 = vmatprep.subr.bf16.mxu0 %v1476_v62  ;;  %1886 = vmatprep.subr.bf16.mxu1 %v1478_v63  ;;  %v1590_v62 = vld [vmem:[#allocation2 + $0x7b8] sm:$0xff]  ;;  %v1587_v63 = vld [vmem:[#allocation2 + $0x7a0] sm:$0xff] }
 0x54c   :  { %1796 = vmatmul.mubr.bf16.vlgmr.msra.gmra.mrb[8].mxu0 %v4670_v29  ;;  %1878 = vmatmul.mubr.bf16.vlgmr.msra.gmra.mrb[16].mxu1 %v4670_v29  ;;  %v1502_v29 = vld [vmem:[#allocation2 + $0x4f8] sm:$0xff] }
 0x54d   :  { %1805 = vmatpush1.bf16.msra.mxu0 %v1475_v0  ;;  %1887 = vmatpush1.bf16.msra.mxu1 %v1477_v1  ;;  %v1589_v0 = vld [vmem:[#allocation2 + $0x7b0] sm:$0xff]  ;;  %v1596_v1 = vld [vmem:[#allocation2 + $0x7e8] sm:$0xff] }
 0x54e   :  { %1806 = vmatprep.subr.bf16.mxu0 %v1484_v2  ;;  %1888 = vmatprep.subr.bf16.mxu1 %v1486_v3  ;;  %v1598_v2 = vld [vmem:[#allocation2 + $0x7f8] sm:$0xff]  ;;  %v1595_v3 = vld [vmem:[#allocation2 + $0x7e0] sm:$0xff] }
 0x54f   :  { %1836 = vmatprep.mubr.bf16.mxu0 %v4676_v34  ;;  %1918 = vmatprep.mubr.bf16.mxu1 %v4676_v34  ;;  %v1507_v34 = vld [vmem:[#allocation2 + $0x520] sm:$0xff] }
 0x551   :  { %1807 = vmatpush1.bf16.msra.mxu0 %v1483_v4  ;;  %1889 = vmatpush1.bf16.msra.mxu1 %v1485_v5  ;;  %v1597_v4 = vld [vmem:[#allocation2 + $0x7f0] sm:$0xff] }
 0x552   :  { %1808 = vmatprep.subr.bf16.mxu0 %v1492_v6  ;;  %1890 = vmatprep.subr.bf16.mxu1 %v1494_v31 }
 0x555   :  { %1809 = vmatpush1.bf16.msra.mxu0 %v1491_v8  ;;  %1891 = vmatpush1.bf16.msra.mxu1 %v1493_v10 }
 0x556   :  { %1810 = vmatprep.subr.bf16.mxu0 %v1500_v11  ;;  %1892 = vmatprep.subr.bf16.mxu1 %v1502_v29 }
 0x559   :  { %1811 = vmatpush1.bf16.msra.mxu0 %v1499_v12  ;;  %1893 = vmatpush1.bf16.msra.mxu1 %v1501_v13 }
 0x55a   :  { %1812 = vmatprep.subr.bf16.mxu0 %v1508_v14  ;;  %1894 = vmatprep.subr.bf16.mxu1 %v1510_v15 }
 0x55d   :  { %1813 = vmatpush1.bf16.msra.mxu0 %v1507_v34  ;;  %1895 = vmatpush1.bf16.msra.mxu1 %v1509_v16 }
 0x55e   :  { %1814 = vmatprep.subr.bf16.mxu0 %v1516_v17  ;;  %1896 = vmatprep.subr.bf16.mxu1 %v1518_v20 }
 0x561   :  { %1815 = vmatpush1.bf16.msra.mxu0 %v1515_v21  ;;  %1897 = vmatpush1.bf16.msra.mxu1 %v1517_v22 }
 0x562   :  { %1816 = vmatprep.subr.bf16.mxu0 %v1524_v25  ;;  %1898 = vmatprep.subr.bf16.mxu1 %v1526_v23 }
 0x565   :  { %1817 = vmatpush1.bf16.msra.mxu0 %v1523_v26  ;;  %1899 = vmatpush1.bf16.msra.mxu1 %v1525_v30 }
 0x566   :  { %1818 = vmatprep.subr.bf16.mxu0 %v1532_v35  ;;  %1900 = vmatprep.subr.bf16.mxu1 %v1534_v36 }
 0x569   :  { %1819 = vmatpush1.bf16.msra.mxu0 %v1531_v37  ;;  %1901 = vmatpush1.bf16.msra.mxu1 %v1533_v38 }
 0x56a   :  { %1820 = vmatprep.subr.bf16.mxu0 %v1540_v39  ;;  %1902 = vmatprep.subr.bf16.mxu1 %v1542_v40 }
 0x56d   :  { %1821 = vmatpush1.bf16.msra.mxu0 %v1539_v42  ;;  %1903 = vmatpush1.bf16.msra.mxu1 %v1541_v7 }
 0x56e   :  { %1822 = vmatprep.subr.bf16.mxu0 %v1548_v9  ;;  %1904 = vmatprep.subr.bf16.mxu1 %v1550_v44 }
 0x571   :  { %1823 = vmatpush1.bf16.msra.mxu0 %v1547_v47  ;;  %1905 = vmatpush1.bf16.msra.mxu1 %v1549_v41 }
 0x572   :  { %1824 = vmatprep.subr.bf16.mxu0 %v1556_v45  ;;  %1906 = vmatprep.subr.bf16.mxu1 %v1558_v24 }
 0x575   :  { %1825 = vmatpush1.bf16.msra.mxu0 %v1555_v28  ;;  %1907 = vmatpush1.bf16.msra.mxu1 %v1557_v48 }
 0x576   :  { %1826 = vmatprep.subr.bf16.mxu0 %v1564_v49  ;;  %1908 = vmatprep.subr.bf16.mxu1 %v1566_v50 }
 0x579   :  { %1827 = vmatpush1.bf16.msra.mxu0 %v1563_v51  ;;  %1909 = vmatpush1.bf16.msra.mxu1 %v1565_v53 }
 0x57a   :  { %1828 = vmatprep.subr.bf16.mxu0 %v1572_v55  ;;  %1910 = vmatprep.subr.bf16.mxu1 %v1574_v56 }
 0x57d   :  { %1829 = vmatpush1.bf16.msra.mxu0 %v1571_v57  ;;  %1911 = vmatpush1.bf16.msra.mxu1 %v1573_v58 }
 0x57e   :  { %1830 = vmatprep.subr.bf16.mxu0 %v1580_v43  ;;  %1912 = vmatprep.subr.bf16.mxu1 %v1582_v46 }
 0x581   :  { %1831 = vmatpush1.bf16.msra.mxu0 %v1579_v59  ;;  %1913 = vmatpush1.bf16.msra.mxu1 %v1581_v60 }
 0x582   :  { %1832 = vmatprep.subr.bf16.mxu0 %v1588_v61  ;;  %1914 = vmatprep.subr.bf16.mxu1 %v1590_v62 }
 0x585   :  { %1833 = vmatpush1.bf16.msra.mxu0 %v1587_v63  ;;  %1915 = vmatpush1.bf16.msra.mxu1 %v1589_v0 }
 0x586   :  { %1834 = vmatprep.subr.bf16.mxu0 %v1596_v1  ;;  %1916 = vmatprep.subr.bf16.mxu1 %v1598_v2 }
 0x589   :  { %1835 = vmatpush1.bf16.msra.mxu0 %v1595_v3  ;;  %1917 = vmatpush1.bf16.msra.mxu1 %v1597_v4 }
 0x58c   :  { %1837 = vmatmul.mubr.bf16.vlgmr.msra.gmra.mrb[8].mxu0 %v4674_v32  ;;  %1919 = vmatmul.mubr.bf16.vlgmr.msra.gmra.mrb[16].mxu1 %v4674_v32 }
 0x5df   :  { %v4694_v5 = vpop.f32.mrb[4].mxu0  ;;  %v4696_v6 = vpop.f32.mrb[12].mxu1 }
 0x5e0   :  { %v1927_v31 = vrot.slane %v4694_v5, 4  ;;  %v1983_v8 = vmul.f32 %v4694_v5, %v4694_v5  ;;  %v1939_v10 = vrot.slane %v4696_v6, 4  ;;  %v1985_v11 = vmul.f32 %v4696_v6, %v4696_v6  ;;  %v4704_v29 = vpop.f32.mrb[5].mxu0  ;;  %v4706_v12 = vpop.f32.mrb[13].mxu1 }
 0x5e1   :  { %v1933_v32 = vrot.slane %v4704_v29, 4  ;;  %v1984_v13 = vmul.f32 %v4704_v29, %v4704_v29  ;;  %v1945_v14 = vrot.slane %v4706_v12, 4  ;;  %v1986_v15 = vmul.f32 %v4706_v12, %v4706_v12  ;;  %v1678_v34 = vpop.f32.mrb[6].mxu0  ;;  %v1760_v16 = vpop.f32.mrb[14].mxu1 }
 0x5e2   :  { %v1928_v17 = vadd.f32 %v1927_v31, %v4694_v5  ;;  %v1991_v20 = vrot.slane %v1983_v8, 4  ;;  %v1940_v21 = vadd.f32 %v1939_v10, %v4696_v6  ;;  %v2003_v22 = vrot.slane %v1985_v11, 4  ;;  %v1679_v25 = vpop.f32.mrb[7].mxu0  ;;  %v1761_v23 = vpop.f32.mrb[15].mxu1 }
 0x5e3   :  { %v1934_v26 = vadd.f32 %v1933_v32, %v4704_v29  ;;  %v1997_v30 = vrot.slane %v1984_v13, 4  ;;  %v1946_v35 = vadd.f32 %v1945_v14, %v4706_v12  ;;  %v2009_v36 = vrot.slane %v1986_v15, 4 }
 0x5e4   :  { %v1929_v37 = vrot.slane %v1928_v17, 2  ;;  %v1992_v38 = vadd.f32 %v1991_v20, %v1983_v8  ;;  %v1941_v39 = vrot.slane %v1940_v21, 2  ;;  %v2004_v40 = vadd.f32 %v2003_v22, %v1985_v11 }
 0x5e5   :  { %v1935_v42 = vrot.slane %v1934_v26, 2  ;;  %v1998_v7 = vadd.f32 %v1997_v30, %v1984_v13  ;;  %v1947_v9 = vrot.slane %v1946_v35, 2  ;;  %v2010_v44 = vadd.f32 %v2009_v36, %v1986_v15 }
 0x5e6   :  { %v1930_v47 = vadd.f32 %v1929_v37, %v1928_v17  ;;  %v1993_v41 = vrot.slane %v1992_v38, 2  ;;  %v1942_v45 = vadd.f32 %v1941_v39, %v1940_v21  ;;  %v2005_v24 = vrot.slane %v2004_v40, 2 }
 0x5e7   :  { %v1936_v28 = vadd.f32 %v1935_v42, %v1934_v26  ;;  %v1999_v48 = vrot.slane %v1998_v7, 2  ;;  %v1948_v49 = vadd.f32 %v1947_v9, %v1946_v35  ;;  %v2011_v50 = vrot.slane %v2010_v44, 2 }
 0x5e8   :  { %v1931_v51 = vrot.slane %v1930_v47, 1  ;;  %v1994_v53 = vadd.f32 %v1993_v41, %v1992_v38  ;;  %v1943_v55 = vrot.slane %v1942_v45, 1  ;;  %v2006_v56 = vadd.f32 %v2005_v24, %v2004_v40 }
 0x5e9   :  { %v1937_v57 = vrot.slane %v1936_v28, 1  ;;  %v2000_v58 = vadd.f32 %v1999_v48, %v1998_v7  ;;  %v1949_v43 = vrot.slane %v1948_v49, 1  ;;  %v2012_v46 = vadd.f32 %v2011_v50, %v2010_v44 }
 0x5ea   :  { %v1932_v59 = vadd.f32 %v1931_v51, %v1930_v47  ;;  %v1995_v60 = vrot.slane %v1994_v53, 1  ;;  %v1944_v61 = vadd.f32 %v1943_v55, %v1942_v45  ;;  %v2007_v62 = vrot.slane %v2006_v56, 1 }
 0x5eb   :  { %v1938_v63 = vadd.f32 %v1937_v57, %v1936_v28  ;;  %v2001_v0 = vrot.slane %v2000_v58, 1  ;;  %v1950_v1 = vadd.f32 %v1949_v43, %v1948_v49  ;;  %v2013_v2 = vrot.slane %v2012_v46, 1 }
 0x5ec   :  { %v4718_v3 = vmul.f32 0.125, %v1932_v59  ;;  %v1996_v4 = vadd.f32 %v1995_v60, %v1994_v53  ;;  %v4720_v31 = vmul.f32 0.125, %v1944_v61  ;;  %v2008_v8 = vadd.f32 %v2007_v62, %v2006_v56 }
 0x5ed   :  { %v4722_v10 = vmul.f32 0.125, %v1938_v63  ;;  %v2002_v11 = vadd.f32 %v2001_v0, %v2000_v58  ;;  %v4724_v32 = vmul.f32 0.125, %v1950_v1  ;;  %v2014_v13 = vadd.f32 %v2013_v2, %v2012_v46 }
 0x5ee   :  { %v2039_v14 = vmul.f32 0.125, %v1996_v4  ;;  %v2047_v15 = vmul.f32 %v4718_v3, %v4718_v3  ;;  %v2041_v34 = vmul.f32 0.125, %v2008_v8  ;;  %v2049_v16 = vmul.f32 %v4720_v31, %v4720_v31 }
 0x5ef   :  { %v2040_v17 = vmul.f32 0.125, %v2002_v11  ;;  %v2048_v20 = vmul.f32 %v4722_v10, %v4722_v10  ;;  %v2042_v21 = vmul.f32 0.125, %v2014_v13  ;;  %v2050_v22 = vmul.f32 %v4724_v32, %v4724_v32 }
 0x5f0   :  { %v2055_v25 = vsub.f32 %v2039_v14, %v2047_v15  ;;  %v2057_v23 = vsub.f32 %v2041_v34, %v2049_v16 }
 0x5f1   :  { %v2056_v26 = vsub.f32 %v2040_v17, %v2048_v20  ;;  %v2058_v30 = vsub.f32 %v2042_v21, %v2050_v22 }
 0x5f2   :  { %v2063_v35 = vmax.f32 %v2055_v25, 0.0  ;;  %v2065_v36 = vmax.f32 %v2057_v23, 0.0 }
 0x5f3   :  { %v2064_v37 = vmax.f32 %v2056_v26, 0.0  ;;  %v2066_v38 = vmax.f32 %v2058_v30, 0.0 }
 0x5f4   :  { %v2071_v39 = vadd.f32 1e-05, %v2063_v35  ;;  %v2073_v40 = vadd.f32 1e-05, %v2065_v36 }
 0x5f5   :  { %v2072_v42 = vadd.f32 1e-05, %v2064_v37  ;;  %v2074_v7 = vadd.f32 1e-05, %v2066_v38 }
 0x5f6   :  { %4070 = vrsqrt.f32 %v2071_v39 }
 0x5f7   :  { %4072 = vrsqrt.f32 %v2073_v40 }
 0x5f8   :  { %4074 = vrsqrt.f32 %v2072_v42 }
 0x5f9   :  { %4076 = vrsqrt.f32 %v2074_v7 }
 0x600   :  { %v4071_v9 = vpop.eup %4070 }
 0x601   :  { %v4073_v44 = vpop.eup %4072 }
 0x602   :  { %v4075_v47 = vpop.eup %4074 }
 0x603   :  { %v4077_v41 = vpop.eup %4076  ;;  %v2095_v45 = vcombine.low %v4071_v9, %v4075_v47 }
 0x604   :  { %v2096_v24 = vcombine.low %v4073_v44, %v4077_v41 }
 0x605   :  { %v4735_v28 = vrot.slane %v2095_v45, %v4595_v27 }
 0x606   :  { %v4738_v48 = vrot.slane %v2096_v24, %v4595_v27 }
 0x608   :  { %v2127_v49 = vcombine.low %v4735_v28, %v4738_v48 }
 0x65f   :  { %v4742_v50 = vpop.f32.mrb[8].mxu0  ;;  %v4744_v51 = vpop.f32.mrb[16].mxu1 }
 0x660   :  { %v1951_v53 = vrot.slane %v4742_v50, 4  ;;  %v1987_v55 = vmul.f32 %v4742_v50, %v4742_v50  ;;  %v1963_v56 = vrot.slane %v4744_v51, 4  ;;  %v1989_v57 = vmul.f32 %v4744_v51, %v4744_v51  ;;  %v4752_v58 = vpop.f32.mrb[9].mxu0  ;;  %v4754_v43 = vpop.f32.mrb[17].mxu1 }
 0x661   :  { %v1957_v46 = vrot.slane %v4752_v58, 4  ;;  %v1988_v59 = vmul.f32 %v4752_v58, %v4752_v58  ;;  %v1969_v60 = vrot.slane %v4754_v43, 4  ;;  %v1990_v61 = vmul.f32 %v4754_v43, %v4754_v43  ;;  %v1842_v62 = vpop.f32.mrb[10].mxu0  ;;  %v1924_v63 = vpop.f32.mrb[18].mxu1 }
 0x662   :  { %v1952_v0 = vadd.f32 %v1951_v53, %v4742_v50  ;;  %v2015_v1 = vrot.slane %v1987_v55, 4  ;;  %v1964_v2 = vadd.f32 %v1963_v56, %v4744_v51  ;;  %v2027_v4 = vrot.slane %v1989_v57, 4  ;;  %v1843_v8 = vpop.f32.mrb[11].mxu0  ;;  %v1925_v11 = vpop.f32.mrb[19].mxu1 }
 0x663   :  { %v1958_v13 = vadd.f32 %v1957_v46, %v4752_v58  ;;  %v2021_v14 = vrot.slane %v1988_v59, 4  ;;  %v1970_v15 = vadd.f32 %v1969_v60, %v4754_v43  ;;  %v2033_v34 = vrot.slane %v1990_v61, 4 }
 0x664   :  { %v1953_v16 = vrot.slane %v1952_v0, 2  ;;  %v2016_v17 = vadd.f32 %v2015_v1, %v1987_v55  ;;  %v1965_v20 = vrot.slane %v1964_v2, 2  ;;  %v2028_v21 = vadd.f32 %v2027_v4, %v1989_v57 }
 0x665   :  { %v1959_v22 = vrot.slane %v1958_v13, 2  ;;  %v2022_v25 = vadd.f32 %v2021_v14, %v1988_v59  ;;  %v1971_v23 = vrot.slane %v1970_v15, 2  ;;  %v2034_v26 = vadd.f32 %v2033_v34, %v1990_v61 }
 0x666   :  { %v1954_v30 = vadd.f32 %v1953_v16, %v1952_v0  ;;  %v2017_v35 = vrot.slane %v2016_v17, 2  ;;  %v1966_v36 = vadd.f32 %v1965_v20, %v1964_v2  ;;  %v2029_v37 = vrot.slane %v2028_v21, 2 }
 0x667   :  { %v1960_v38 = vadd.f32 %v1959_v22, %v1958_v13  ;;  %v2023_v39 = vrot.slane %v2022_v25, 2  ;;  %v1972_v40 = vadd.f32 %v1971_v23, %v1970_v15  ;;  %v2035_v42 = vrot.slane %v2034_v26, 2 }
 0x668   :  { %v1955_v7 = vrot.slane %v1954_v30, 1  ;;  %v2018_v9 = vadd.f32 %v2017_v35, %v2016_v17  ;;  %v1967_v44 = vrot.slane %v1966_v36, 1  ;;  %v2030_v47 = vadd.f32 %v2029_v37, %v2028_v21 }
 0x669   :  { %v1961_v41 = vrot.slane %v1960_v38, 1  ;;  %v2024_v45 = vadd.f32 %v2023_v39, %v2022_v25  ;;  %v1973_v24 = vrot.slane %v1972_v40, 1  ;;  %v2036_v53 = vadd.f32 %v2035_v42, %v2034_v26 }
 0x66a   :  { %v1956_v55 = vadd.f32 %v1955_v7, %v1954_v30  ;;  %v2019_v56 = vrot.slane %v2018_v9, 1  ;;  %v1968_v57 = vadd.f32 %v1967_v44, %v1966_v36  ;;  %v2031_v46 = vrot.slane %v2030_v47, 1 }
 0x66b   :  { %v1962_v59 = vadd.f32 %v1961_v41, %v1960_v38  ;;  %v2025_v60 = vrot.slane %v2024_v45, 1  ;;  %v1974_v61 = vadd.f32 %v1973_v24, %v1972_v40  ;;  %v2037_v62 = vrot.slane %v2036_v53, 1 }
 0x66c   :  { %v1979_v63 = vmul.f32 0.125, %v1956_v55  ;;  %v2020_v0 = vadd.f32 %v2019_v56, %v2018_v9  ;;  %v1981_v1 = vmul.f32 0.125, %v1968_v57  ;;  %v2032_v2 = vadd.f32 %v2031_v46, %v2030_v47 }
 0x66d   :  { %v1980_v4 = vmul.f32 0.125, %v1962_v59  ;;  %v2026_v8 = vadd.f32 %v2025_v60, %v2024_v45  ;;  %v1982_v11 = vmul.f32 0.125, %v1974_v61  ;;  %v2038_v13 = vadd.f32 %v2037_v62, %v2036_v53  ;;  %v1340_v59 = vld [vmem:[#allocation17] ss:$2 sm:$0xff] }
 0x66e   :  { %v2043_v14 = vmul.f32 0.125, %v2020_v0  ;;  %v2051_v15 = vmul.f32 %v1979_v63, %v1979_v63  ;;  %v2045_v34 = vmul.f32 0.125, %v2032_v2  ;;  %v2053_v16 = vmul.f32 %v1981_v1, %v1981_v1 }
 0x66f   :  { %v2044_v17 = vmul.f32 0.125, %v2026_v8  ;;  %v2052_v20 = vmul.f32 %v1980_v4, %v1980_v4  ;;  %v2046_v21 = vmul.f32 0.125, %v2038_v13  ;;  %v2054_v22 = vmul.f32 %v1982_v11, %v1982_v11 }
 0x670   :  { %v2059_v25 = vsub.f32 %v2043_v14, %v2051_v15  ;;  %v2061_v23 = vsub.f32 %v2045_v34, %v2053_v16  ;;  %v2135_v57 = vrot.slane %v2127_v49, %v4595_v27  ;;  %v4774_v61 = vsub.s32 4, %v4587_v52 }
 0x671   :  { %v2060_v26 = vsub.f32 %v2044_v17, %v2052_v20  ;;  %v2062_v30 = vsub.f32 %v2046_v21, %v2054_v22  ;;  %v4777_v62 = vsub.s32 5, %v4587_v52  ;;  %v4780_v0 = vsub.s32 6, %v4587_v52 }
 0x672   :  { %v2067_v35 = vmax.f32 %v2059_v25, 0.0  ;;  %v2069_v36 = vmax.f32 %v2061_v23, 0.0  ;;  %v2177_v2 = vsub.s32 7, %v4587_v52 }
 0x673   :  { %v2068_v37 = vmax.f32 %v2060_v26, 0.0  ;;  %v2070_v38 = vmax.f32 %v2062_v30, 0.0 }
 0x674   :  { %v2075_v39 = vadd.f32 1e-05, %v2067_v35  ;;  %v2077_v40 = vadd.f32 1e-05, %v2069_v36 }
 0x675   :  { %v2076_v42 = vadd.f32 1e-05, %v2068_v37  ;;  %v2078_v7 = vadd.f32 1e-05, %v2070_v38 }
 0x676   :  { %4078 = vrsqrt.f32 %v2075_v39 }
 0x677   :  { %4080 = vrsqrt.f32 %v2077_v40 }
 0x678   :  { %4082 = vrsqrt.f32 %v2076_v42 }
 0x679   :  { %4084 = vrsqrt.f32 %v2078_v7  ;;  %v1342_v7 = vld [vmem:[#allocation17 + $0x1] ss:$2 sm:$0xff] }
 0x680   :  { %v4079_v9 = vpop.eup %4078 }
 0x681   :  { %v4081_v44 = vpop.eup %4080 }
 0x682   :  { %v4083_v47 = vpop.eup %4082 }
 0x683   :  { %v4085_v41 = vpop.eup %4084  ;;  %v2097_v45 = vcombine.low %v4079_v9, %v4083_v47 }
 0x684   :  { %v2098_v24 = vcombine.low %v4081_v44, %v4085_v41 }
 0x685   :  { %v2119_v53 = vrot.slane %v2097_v45, %v4595_v27 }
 0x686   :  { %v2126_v55 = vrot.slane %v2098_v24, %v4595_v27 }
 0x688   :  { %v2128_v56 = vcombine.low %v2119_v53, %v2126_v55 }
 0x68a   :  { %v2142_v46 = vrot.slane %v2128_v56, %v4595_v27 }
 0x68c   :  { %v2143_v60 = vcombine.low %v2135_v57, %v2142_v46 }
 0x68e   :  { %v2145_v8 = vmul.f32 %v2143_v60, %v1340_v59 }
 0x690   :  { %v2150_v13 = vrot.slane %v2145_v8, %v4590_v54  ;;  %v2154_v28 = vrot.slane %v2145_v8, %v4600_v33  ;;  %v2158_v48 = vrot.slane %v2145_v8, %v4648_v18  ;;  %v2162_v49 = vrot.slane %v2145_v8, %v4651_v19 }
 0x691   :  { %v2166_v14 = vrot.slane %v2145_v8, %v4774_v61  ;;  %v2170_v15 = vrot.slane %v2145_v8, %v4777_v62  ;;  %v2174_v34 = vrot.slane %v2145_v8, %v4780_v0  ;;  %v2178_v16 = vrot.slane %v2145_v8, %v2177_v2 }
 0x692   :  { %v2187_v17 = vmul.f32 %v2150_v13, %v4718_v3  ;;  %v2188_v52 = vmul.f32 %v2154_v28, %v4722_v10  ;;  %v2189_v20 = vmul.f32 %v2158_v48, %v4720_v31  ;;  %v2190_v21 = vmul.f32 %v2162_v49, %v4724_v32 }
 0x693   :  { %v2191_v22 = vmul.f32 %v2166_v14, %v1979_v63  ;;  %v2192_v25 = vmul.f32 %v2170_v15, %v1980_v4  ;;  %v2193_v23 = vmul.f32 %v2174_v34, %v1981_v1  ;;  %v2194_v26 = vmul.f32 %v2178_v16, %v1982_v11 }
 0x694   :  { %v2203_v30 = vcombine.low %v2187_v17, %v2188_v52  ;;  %v2204_v35 = vcombine.low %v2189_v20, %v2190_v21  ;;  %v2254_v36 = vmul.f32 %v2150_v13, %v4694_v5  ;;  %v2255_v37 = vmul.f32 %v2154_v28, %v4704_v29 }
 0x695   :  { %v2205_v38 = vcombine.low %v2191_v22, %v2192_v25  ;;  %v2206_v39 = vcombine.low %v2193_v23, %v2194_v26  ;;  %v2256_v3 = vmul.f32 %v2158_v48, %v4696_v6  ;;  %v2257_v10 = vmul.f32 %v2162_v49, %v4706_v12 }
 0x696   :  { %v2213_v31 = vrot.slane %v2203_v30, %v4595_v27  ;;  %v2220_v32 = vrot.slane %v2204_v35, %v4595_v27  ;;  %v2258_v63 = vmul.f32 %v2166_v14, %v4742_v50  ;;  %v2259_v1 = vmul.f32 %v2170_v15, %v4752_v58 }
 0x697   :  { %v2227_v4 = vrot.slane %v2205_v38, %v4595_v27  ;;  %v2234_v5 = vrot.slane %v2206_v39, %v4595_v27  ;;  %v2260_v29 = vmul.f32 %v2174_v34, %v4744_v51  ;;  %v2261_v11 = vmul.f32 %v2178_v16, %v4754_v43 }
 0x698   :  { %v2235_v40 = vcombine.low %v2213_v31, %v2220_v32 }
 0x699   :  { %v2236_v6 = vcombine.low %v2227_v4, %v2234_v5 }
 0x69a   :  { %v2243_v12 = vrot.slane %v2235_v40, %v4595_v27 }
 0x69b   :  { %v2250_v42 = vrot.slane %v2236_v6, %v4595_v27 }
 0x69d   :  { %v2251_v9 = vcombine.low %v2243_v12, %v2250_v42 }
 0x69f   :  { %v2253_v44 = vsub.f32 %v1342_v7, %v2251_v9 }
 0x6a1   :  { %v2266_v50 = vrot.slane %v2253_v44, %v4590_v54  ;;  %v2270_v58 = vrot.slane %v2253_v44, %v4600_v33  ;;  %v2274_v47 = vrot.slane %v2253_v44, %v4648_v18  ;;  %v2278_v41 = vrot.slane %v2253_v44, %v4651_v19 }
 0x6a2   :  { %v2282_v51 = vrot.slane %v2253_v44, %v4774_v61  ;;  %v2286_v43 = vrot.slane %v2253_v44, %v4777_v62  ;;  %v2290_v45 = vrot.slane %v2253_v44, %v4780_v0  ;;  %v2294_v24 = vrot.slane %v2253_v44, %v2177_v2 }
 0x6a3   :  { %v2303_v53 = vadd.f32 %v2266_v50, %v2254_v36  ;;  %v2304_v27 = vadd.f32 %v2270_v58, %v2255_v37  ;;  %v2305_v55 = vadd.f32 %v2274_v47, %v2256_v3  ;;  %v4815_v56 = vadd.f32 %v2278_v41, %v2257_v10 }
 0x6a4   :  { %v4817_v57 = vadd.f32 %v2282_v51, %v2258_v63  ;;  %v4819_v46 = vadd.f32 %v2286_v43, %v2259_v1  ;;  %v4821_v59 = vadd.f32 %v2290_v45, %v2260_v29  ;;  %v4823_v60 = vadd.f32 %v2294_v24, %v2261_v11 }
 0x6a5   :  { %v2319_v8 = vmul.f32 %v2303_v53, %v2303_v53  ;;  %v2320_v13 = vmul.f32 %v2304_v27, %v2304_v27  ;;  %v2321_v28 = vmul.f32 %v2305_v55, %v2305_v55  ;;  %v2322_v48 = vmul.f32 %v4815_v56, %v4815_v56 }
 0x6a6   :  { %v2323_v2 = vmul.f32 %v4817_v57, %v4817_v57  ;;  %v2324_v49 = vmul.f32 %v4819_v46, %v4819_v46  ;;  %v2325_v14 = vmul.f32 %v4821_v59, %v4821_v59  ;;  %v2326_v15 = vmul.f32 %v4823_v60, %v4823_v60 }
 0x6a7   :  { %v2327_v34 = vmul.f32 %v2319_v8, %v2303_v53  ;;  %v2328_v16 = vmul.f32 %v2320_v13, %v2304_v27  ;;  %v2329_v17 = vmul.f32 %v2321_v28, %v2305_v55  ;;  %v2330_v52 = vmul.f32 %v2322_v48, %v4815_v56 }
 0x6a8   :  { %v2331_v20 = vmul.f32 %v2323_v2, %v4817_v57  ;;  %v2332_v21 = vmul.f32 %v2324_v49, %v4819_v46  ;;  %v2333_v22 = vmul.f32 %v2325_v14, %v4821_v59  ;;  %v2334_v25 = vmul.f32 %v2326_v15, %v4823_v60 }
 0x6a9   :  { %v2335_v23 = vmul.f32 0.044715, %v2327_v34  ;;  %v2336_v26 = vmul.f32 0.044715, %v2328_v16  ;;  %v2337_v30 = vmul.f32 0.044715, %v2329_v17 }
 0x6aa   :  { %v2338_v35 = vmul.f32 0.044715, %v2330_v52  ;;  %v2339_v36 = vmul.f32 0.044715, %v2331_v20  ;;  %v2340_v37 = vmul.f32 0.044715, %v2332_v21 }
 0x6ab   :  { %v2341_v38 = vmul.f32 0.044715, %v2333_v22  ;;  %v2342_v39 = vmul.f32 0.044715, %v2334_v25  ;;  %v2343_v3 = vadd.f32 %v2335_v23, %v2303_v53  ;;  %v2344_v10 = vadd.f32 %v2336_v26, %v2304_v27 }
 0x6ac   :  { %v2345_v31 = vadd.f32 %v2337_v30, %v2305_v55  ;;  %v2346_v32 = vadd.f32 %v2338_v35, %v4815_v56  ;;  %v2347_v63 = vadd.f32 %v2339_v36, %v4817_v57  ;;  %v2348_v1 = vadd.f32 %v2340_v37, %v4819_v46 }
 0x6ad   :  { %v2349_v4 = vadd.f32 %v2341_v38, %v4821_v59  ;;  %v2351_v5 = vmul.f32 0.7978846, %v2343_v3  ;;  %v2352_v29 = vmul.f32 0.7978846, %v2344_v10  ;;  %v2350_v11 = vadd.f32 %v2342_v39, %v4823_v60 }
 0x6ae   :  { %v2353_v40 = vmul.f32 0.7978846, %v2345_v31  ;;  %v2354_v6 = vmul.f32 0.7978846, %v2346_v32  ;;  %v2355_v12 = vmul.f32 0.7978846, %v2347_v63 }
 0x6af   :  { %4086 = vtanh.f32 %v2351_v5  ;;  %v2356_v42 = vmul.f32 0.7978846, %v2348_v1  ;;  %v2357_v7 = vmul.f32 0.7978846, %v2349_v4  ;;  %v2358_v9 = vmul.f32 0.7978846, %v2350_v11 }
 0x6b0   :  { %4088 = vtanh.f32 %v2352_v29  ;;  %v2311_v58 = vmul.f32 0.5, %v2303_v53  ;;  %v2312_v51 = vmul.f32 0.5, %v2304_v27  ;;  %v2313_v24 = vmul.f32 0.5, %v2305_v55 }
 0x6b1   :  { %4090 = vtanh.f32 %v2353_v40  ;;  %v2314_v48 = vmul.f32 0.5, %v4815_v56  ;;  %v2315_v15 = vmul.f32 0.5, %v4817_v57  ;;  %v2316_v27 = vmul.f32 0.5, %v4819_v46 }
 0x6b2   :  { %4092 = vtanh.f32 %v2354_v6  ;;  %v2317_v22 = vmul.f32 0.5, %v4821_v59  ;;  %v2318_v57 = vmul.f32 0.5, %v4823_v60 }
 0x6b3   :  { %4094 = vtanh.f32 %v2355_v12 }
 0x6b4   :  { %4096 = vtanh.f32 %v2356_v42 }
 0x6b5   :  { %4098 = vtanh.f32 %v2357_v7 }
 0x6b6   :  { %4100 = vtanh.f32 %v2358_v9 }
 0x6b9   :  { %v4087_v44 = vpop.eup %4086 }
 0x6ba   :  { %v4089_v50 = vpop.eup %4088  ;;  %v2367_v47 = vadd.f32 1.0, %v4087_v44 }
 0x6bb   :  { %v4091_v41 = vpop.eup %4090  ;;  %v2368_v43 = vadd.f32 1.0, %v4089_v50 }
 0x6bc   :  { %v4093_v45 = vpop.eup %4092  ;;  %v2369_v8 = vadd.f32 1.0, %v4091_v41  ;;  %v2375_v13 = vmul.f32 %v2367_v47, %v2311_v58 }
 0x6bd   :  { %v4095_v28 = vpop.eup %4094  ;;  %v2370_v2 = vadd.f32 1.0, %v4093_v45  ;;  %v2376_v49 = vmul.f32 %v2368_v43, %v2312_v51 }
 0x6be   :  { %v4097_v14 = vpop.eup %4096  ;;  %v2371_v34 = vadd.f32 1.0, %v4095_v28  ;;  %v2377_v16 = vmul.f32 %v2369_v8, %v2313_v24  ;;  %v4847_v17 = vpack.c.bf16 %v2375_v13, %v2375_v13 }
 0x6bf   :  { %v4099_v53 = vpop.eup %4098  ;;  %v2372_v52 = vadd.f32 1.0, %v4097_v14  ;;  %v2378_v20 = vmul.f32 %v2370_v2, %v2314_v48  ;;  %v4850_v55 = vpack.c.bf16 %v2376_v49, %v2376_v49 }
 0x6c0   :  { %v4101_v21 = vpop.eup %4100  ;;  %v2373_v56 = vadd.f32 1.0, %v4099_v53  ;;  %v2379_v25 = vmul.f32 %v2371_v34, %v2315_v15  ;;  %v4853_v23 = vpack.c.bf16 %v2377_v16, %v2377_v16 }
 0x6c1   :  { %v2374_v26 = vadd.f32 1.0, %v4101_v21  ;;  %v2380_v30 = vmul.f32 %v2372_v52, %v2316_v27  ;;  %v4856_v35 = vpack.c.bf16 %v2378_v20, %v2378_v20 }
 0x6c2   :  { %v2381_v36 = vmul.f32 %v2373_v56, %v2317_v22  ;;  %v4858_v37 = vpack.c.bf16 %v2379_v25, %v2379_v25 }
 0x6c3   :  { %v2382_v46 = vmul.f32 %v2374_v26, %v2318_v57  ;;  %v4860_v38 = vpack.c.bf16 %v2380_v30, %v2380_v30 }
 0x6c4   :  { %v4862_v39 = vpack.c.bf16 %v2381_v36, %v2381_v36 }
 0x6c5   :  { %v4864_v3 = vpack.c.bf16 %v2382_v46, %v2382_v46 }
 0x6c6   :  { %4362 = dma.done.wait [#allocation4 + $0x1], 57344 }
 0x6c7   :  { %4363 = vsyncadd [#allocation4 + $0x1], 4294909952  ;;  %2912 = vmatprep.mubr.bf16.mxu0 %v4850_v55  ;;  %3076 = vmatprep.mubr.bf16.mxu1 %v4850_v55  ;;  %v2396_v59 = vld [vmem:[#allocation3 + $0x8] sm:$0xff]  ;;  %v2398_v60 = vld [vmem:[#allocation3 + $0x18] sm:$0xff]  ;;  %s4397_s9 = smov [#allocation20]  }
 0x6c8   :  { %v2395_v10 = vld [vmem:[#allocation3] sm:$0xff]  ;;  %2880 = vmatprep.subr.bf16.mxu0 %v2396_v59  ;;  %3044 = vmatprep.subr.bf16.mxu1 %v2398_v60  ;;  %v2397_v31 = vld [vmem:[#allocation3 + $0x10] sm:$0xff]  ;;  %v2402_v1 = vld [vmem:[#allocation3 + $0x38] sm:$0xff]  ;;  %s3587_s27 = sshll.u32 %s4397_s9, 4  ;;  %s3588_s27 = int_to_ptr.vmem [resolvable:$true] %s3587_s27 }
 0x6c9   :  { %v2403_v32 = vld [vmem:[#allocation3 + $0x40] sm:$0xff]  ;;  %v2405_v63 = vld [vmem:[#allocation3 + $0x50] sm:$0xff]  ;;  %2881 = vmatpush1.bf16.msra.mxu0 %v2395_v10  ;;  %3045 = vmatpush1.bf16.msra.mxu1 %v2397_v31  ;;  %v2404_v4 = vld [vmem:[#allocation3 + $0x48] sm:$0xff]  ;;  %s4328_s28 = scalar_lea.vmem %s3588_s27, 896  ;;  %p4333_p3 = scmp.lt.s32.totalorder %s3588_s27, %s3588_s27 }
 0x6ca   :  { %2882 = vmatprep.subr.bf16.mxu0 %v2403_v32  ;;  %3046 = vmatprep.subr.bf16.mxu1 %v2405_v63  ;;  %v2410_v5 = vld [vmem:[#allocation3 + $0x78] sm:$0xff]  ;;  %v2412_v29 = vld [vmem:[#allocation3 + $0x88] sm:$0xff]  ;;  %v2409_v11 = vld [vmem:[#allocation3 + $0x70] sm:$0xff]  ;;  %p4329_p2 = scmp.ne.s32.totalorder %s3588_s27, %s4328_s28  ;;  %p4334_p4 = scmp.lt.s32.totalorder %s4328_s28, %s4328_s28 }
 0x6cb   :  { %v2411_v40 = vld [vmem:[#allocation3 + $0x80] sm:$0xff]  ;;  %v2417_v6 = vld [vmem:[#allocation3 + $0xb0] sm:$0xff]  ;;  %v2416_v42 = vld [vmem:[#allocation3 + $0xa8] sm:$0xff] }
 0x6cc   :  { %v2419_v12 = vld [vmem:[#allocation3 + $0xc0] sm:$0xff]  ;;  %v2418_v7 = vld [vmem:[#allocation3 + $0xb8] sm:$0xff]  ;;  %v2424_v9 = vld [vmem:[#allocation3 + $0xe8] sm:$0xff]  ;;  %p4335_p5 = por %p4334_p4, %p4333_p3 }
 0x6cd   :  { %2883 = vmatpush1.bf16.msra.mxu0 %v2402_v1  ;;  %3047 = vmatpush1.bf16.msra.mxu1 %v2404_v4  ;;  %v2426_v44 = vld [vmem:[#allocation3 + $0xf8] sm:$0xff]  ;;  %v2423_v50 = vld [vmem:[#allocation3 + $0xe0] sm:$0xff]  ;;  %v2425_v58 = vld [vmem:[#allocation3 + $0xf0] sm:$0xff] }
 0x6ce   :  { %2884 = vmatprep.subr.bf16.mxu0 %v2410_v5  ;;  %3048 = vmatprep.subr.bf16.mxu1 %v2412_v29  ;;  %v2431_v47 = vld [vmem:[#allocation3 + $0x120] sm:$0xff]  ;;  %v2433_v41 = vld [vmem:[#allocation3 + $0x130] sm:$0xff]  ;;  %v2430_v51 = vld [vmem:[#allocation3 + $0x118] sm:$0xff]  ;;  %p4336_p6 = pnand %p4335_p5, %p4329_p2 }
 0x6cf   :  { %v2432_v43 = vld [vmem:[#allocation3 + $0x128] sm:$0xff]  ;;  %v2438_v45 = vld [vmem:[#allocation3 + $0x158] sm:$0xff]  ;;  %v2437_v8 = vld [vmem:[#allocation3 + $0x150] sm:$0xff] }
 0x6d0   :  { %v2440_v24 = vld [vmem:[#allocation3 + $0x168] sm:$0xff]  ;;  %v2439_v13 = vld [vmem:[#allocation3 + $0x160] sm:$0xff]  ;;  %v2445_v28 = vld [vmem:[#allocation3 + $0x190] sm:$0xff] }
 0x6d1   :  { %2885 = vmatpush1.bf16.msra.mxu0 %v2409_v11  ;;  %3049 = vmatpush1.bf16.msra.mxu1 %v2411_v40  ;;  %v2447_v48 = vld [vmem:[#allocation3 + $0x1a0] sm:$0xff]  ;;  %v2444_v2 = vld [vmem:[#allocation3 + $0x188] sm:$0xff]  ;;  %v2446_v49 = vld [vmem:[#allocation3 + $0x198] sm:$0xff] }
 0x6d2   :  { %2886 = vmatprep.subr.bf16.mxu0 %v2417_v6  ;;  %3050 = vmatprep.subr.bf16.mxu1 %v2419_v12  ;;  %v2452_v14 = vld [vmem:[#allocation3 + $0x1c8] sm:$0xff]  ;;  %v2454_v15 = vld [vmem:[#allocation3 + $0x1d8] sm:$0xff]  ;;  %v2451_v34 = vld [vmem:[#allocation3 + $0x1c0] sm:$0xff] }
 0x6d3   :  { %v2453_v16 = vld [vmem:[#allocation3 + $0x1d0] sm:$0xff]  ;;  %v2459_v53 = vld [vmem:[#allocation3 + $0x200] sm:$0xff]  ;;  %v2458_v52 = vld [vmem:[#allocation3 + $0x1f8] sm:$0xff] }
 0x6d4   :  { %v2461_v27 = vld [vmem:[#allocation3 + $0x210] sm:$0xff]  ;;  %v2460_v20 = vld [vmem:[#allocation3 + $0x208] sm:$0xff]  ;;  %v2466_v21 = vld [vmem:[#allocation3 + $0x238] sm:$0xff] }
 0x6d5   :  { %2887 = vmatpush1.bf16.msra.mxu0 %v2416_v42  ;;  %3051 = vmatpush1.bf16.msra.mxu1 %v2418_v7  ;;  %v2468_v22 = vld [vmem:[#allocation3 + $0x248] sm:$0xff]  ;;  %v2465_v56 = vld [vmem:[#allocation3 + $0x230] sm:$0xff]  ;;  %v2467_v25 = vld [vmem:[#allocation3 + $0x240] sm:$0xff] }
 0x6d6   :  { %2888 = vmatprep.subr.bf16.mxu0 %v2424_v9  ;;  %3052 = vmatprep.subr.bf16.mxu1 %v2426_v44  ;;  %v2473_v57 = vld [vmem:[#allocation3 + $0x270] sm:$0xff]  ;;  %v2475_v26 = vld [vmem:[#allocation3 + $0x280] sm:$0xff]  ;;  %v2472_v30 = vld [vmem:[#allocation3 + $0x268] sm:$0xff] }
 0x6d7   :  { %v2474_v36 = vld [vmem:[#allocation3 + $0x278] sm:$0xff]  ;;  %v2480_v46 = vld [vmem:[#allocation3 + $0x2a8] sm:$0xff]  ;;  %v2479_v60 = vld [vmem:[#allocation3 + $0x2a0] sm:$0xff] }
 0x6d8   :  { %v2482_v59 = vld [vmem:[#allocation3 + $0x2b8] sm:$0xff]  ;;  %v2481_v10 = vld [vmem:[#allocation3 + $0x2b0] sm:$0xff]  ;;  %v2487_v31 = vld [vmem:[#allocation3 + $0x2e0] sm:$0xff] }
 0x6d9   :  { %2889 = vmatpush1.bf16.msra.mxu0 %v2423_v50  ;;  %3053 = vmatpush1.bf16.msra.mxu1 %v2425_v58  ;;  %v2489_v32 = vld [vmem:[#allocation3 + $0x2f0] sm:$0xff]  ;;  %v2486_v63 = vld [vmem:[#allocation3 + $0x2d8] sm:$0xff]  ;;  %v2488_v1 = vld [vmem:[#allocation3 + $0x2e8] sm:$0xff] }
 0x6da   :  { %2890 = vmatprep.subr.bf16.mxu0 %v2431_v47  ;;  %3054 = vmatprep.subr.bf16.mxu1 %v2433_v41  ;;  %v2494_v4 = vld [vmem:[#allocation3 + $0x318] sm:$0xff]  ;;  %v2496_v5 = vld [vmem:[#allocation3 + $0x328] sm:$0xff]  ;;  %v2493_v29 = vld [vmem:[#allocation3 + $0x310] sm:$0xff] }
 0x6db   :  { %v2495_v11 = vld [vmem:[#allocation3 + $0x320] sm:$0xff]  ;;  %v2501_v40 = vld [vmem:[#allocation3 + $0x350] sm:$0xff]  ;;  %v2500_v12 = vld [vmem:[#allocation3 + $0x348] sm:$0xff] }
 0x6dc   :  { %v2503_v6 = vld [vmem:[#allocation3 + $0x360] sm:$0xff]  ;;  %v2502_v42 = vld [vmem:[#allocation3 + $0x358] sm:$0xff]  ;;  %v2508_v7 = vld [vmem:[#allocation3 + $0x388] sm:$0xff] }
 0x6dd   :  { %2891 = vmatpush1.bf16.msra.mxu0 %v2430_v51  ;;  %3055 = vmatpush1.bf16.msra.mxu1 %v2432_v43  ;;  %v2510_v9 = vld [vmem:[#allocation3 + $0x398] sm:$0xff]  ;;  %v2507_v44 = vld [vmem:[#allocation3 + $0x380] sm:$0xff]  ;;  %v2509_v50 = vld [vmem:[#allocation3 + $0x390] sm:$0xff] }
 0x6de   :  { %2892 = vmatprep.subr.bf16.mxu0 %v2438_v45  ;;  %3056 = vmatprep.subr.bf16.mxu1 %v2440_v24  ;;  %v2515_v58 = vld [vmem:[#allocation3 + $0x3c0] sm:$0xff]  ;;  %v2517_v47 = vld [vmem:[#allocation3 + $0x3d0] sm:$0xff]  ;;  %v2514_v41 = vld [vmem:[#allocation3 + $0x3b8] sm:$0xff] }
 0x6df   :  { %v2516_v51 = vld [vmem:[#allocation3 + $0x3c8] sm:$0xff]  ;;  %v2522_v43 = vld [vmem:[#allocation3 + $0x3f8] sm:$0xff]  ;;  %v2521_v24 = vld [vmem:[#allocation3 + $0x3f0] sm:$0xff] }
 0x6e0   :  { %v2524_v45 = vld [vmem:[#allocation3 + $0x408] sm:$0xff] }
 0x6e1   :  { %2893 = vmatpush1.bf16.msra.mxu0 %v2437_v8  ;;  %3057 = vmatpush1.bf16.msra.mxu1 %v2439_v13  ;;  %v2523_v8 = vld [vmem:[#allocation3 + $0x400] sm:$0xff]  ;;  %v2529_v13 = vld [vmem:[#allocation3 + $0x430] sm:$0xff] }
 0x6e2   :  { %2894 = vmatprep.subr.bf16.mxu0 %v2445_v28  ;;  %3058 = vmatprep.subr.bf16.mxu1 %v2447_v48  ;;  %v2531_v28 = vld [vmem:[#allocation3 + $0x440] sm:$0xff]  ;;  %v2528_v48 = vld [vmem:[#allocation3 + $0x428] sm:$0xff] }
 0x6e5   :  { %2895 = vmatpush1.bf16.msra.mxu0 %v2444_v2  ;;  %3059 = vmatpush1.bf16.msra.mxu1 %v2446_v49  ;;  %v2530_v2 = vld [vmem:[#allocation3 + $0x438] sm:$0xff]  ;;  %v2536_v49 = vld [vmem:[#allocation3 + $0x468] sm:$0xff] }
 0x6e6   :  { %2896 = vmatprep.subr.bf16.mxu0 %v2452_v14  ;;  %3060 = vmatprep.subr.bf16.mxu1 %v2454_v15  ;;  %v2538_v14 = vld [vmem:[#allocation3 + $0x478] sm:$0xff]  ;;  %v2535_v15 = vld [vmem:[#allocation3 + $0x460] sm:$0xff] }
 0x6e9   :  { %2897 = vmatpush1.bf16.msra.mxu0 %v2451_v34  ;;  %3061 = vmatpush1.bf16.msra.mxu1 %v2453_v16  ;;  %v2537_v34 = vld [vmem:[#allocation3 + $0x470] sm:$0xff]  ;;  %v2543_v16 = vld [vmem:[#allocation3 + $0x4a0] sm:$0xff] }
 0x6ea   :  { %2898 = vmatprep.subr.bf16.mxu0 %v2459_v53  ;;  %3062 = vmatprep.subr.bf16.mxu1 %v2461_v27  ;;  %v2545_v53 = vld [vmem:[#allocation3 + $0x4b0] sm:$0xff]  ;;  %v2542_v27 = vld [vmem:[#allocation3 + $0x498] sm:$0xff] }
 0x6ed   :  { %2899 = vmatpush1.bf16.msra.mxu0 %v2458_v52  ;;  %3063 = vmatpush1.bf16.msra.mxu1 %v2460_v20  ;;  %v2544_v52 = vld [vmem:[#allocation3 + $0x4a8] sm:$0xff]  ;;  %v2550_v20 = vld [vmem:[#allocation3 + $0x4d8] sm:$0xff] }
 0x6ee   :  { %2900 = vmatprep.subr.bf16.mxu0 %v2466_v21  ;;  %3064 = vmatprep.subr.bf16.mxu1 %v2468_v22  ;;  %v2552_v21 = vld [vmem:[#allocation3 + $0x4e8] sm:$0xff]  ;;  %v2549_v22 = vld [vmem:[#allocation3 + $0x4d0] sm:$0xff] }
 0x6f1   :  { %2901 = vmatpush1.bf16.msra.mxu0 %v2465_v56  ;;  %3065 = vmatpush1.bf16.msra.mxu1 %v2467_v25  ;;  %v2551_v56 = vld [vmem:[#allocation3 + $0x4e0] sm:$0xff]  ;;  %v2557_v25 = vld [vmem:[#allocation3 + $0x510] sm:$0xff] }
 0x6f2   :  { %2902 = vmatprep.subr.bf16.mxu0 %v2473_v57  ;;  %3066 = vmatprep.subr.bf16.mxu1 %v2475_v26  ;;  %v2559_v57 = vld [vmem:[#allocation3 + $0x520] sm:$0xff]  ;;  %v2556_v26 = vld [vmem:[#allocation3 + $0x508] sm:$0xff] }
 0x6f5   :  { %2903 = vmatpush1.bf16.msra.mxu0 %v2472_v30  ;;  %3067 = vmatpush1.bf16.msra.mxu1 %v2474_v36  ;;  %v2558_v30 = vld [vmem:[#allocation3 + $0x518] sm:$0xff]  ;;  %v2564_v36 = vld [vmem:[#allocation3 + $0x548] sm:$0xff] }
 0x6f6   :  { %2904 = vmatprep.subr.bf16.mxu0 %v2480_v46  ;;  %3068 = vmatprep.subr.bf16.mxu1 %v2482_v59  ;;  %v2566_v46 = vld [vmem:[#allocation3 + $0x558] sm:$0xff]  ;;  %v2563_v59 = vld [vmem:[#allocation3 + $0x540] sm:$0xff] }
 0x6f9   :  { %2905 = vmatpush1.bf16.msra.mxu0 %v2479_v60  ;;  %3069 = vmatpush1.bf16.msra.mxu1 %v2481_v10  ;;  %v2565_v60 = vld [vmem:[#allocation3 + $0x550] sm:$0xff]  ;;  %v2571_v10 = vld [vmem:[#allocation3 + $0x580] sm:$0xff] }
 0x6fa   :  { %2906 = vmatprep.subr.bf16.mxu0 %v2487_v31  ;;  %3070 = vmatprep.subr.bf16.mxu1 %v2489_v32  ;;  %v2573_v31 = vld [vmem:[#allocation3 + $0x590] sm:$0xff]  ;;  %v2570_v32 = vld [vmem:[#allocation3 + $0x578] sm:$0xff] }
 0x6fd   :  { %2907 = vmatpush1.bf16.msra.mxu0 %v2486_v63  ;;  %3071 = vmatpush1.bf16.msra.mxu1 %v2488_v1  ;;  %v2572_v63 = vld [vmem:[#allocation3 + $0x588] sm:$0xff]  ;;  %v2578_v1 = vld [vmem:[#allocation3 + $0x5b8] sm:$0xff] }
 0x6fe   :  { %2908 = vmatprep.subr.bf16.mxu0 %v2494_v4  ;;  %3072 = vmatprep.subr.bf16.mxu1 %v2496_v5  ;;  %v2580_v4 = vld [vmem:[#allocation3 + $0x5c8] sm:$0xff]  ;;  %v2577_v5 = vld [vmem:[#allocation3 + $0x5b0] sm:$0xff] }
 0x701   :  { %2909 = vmatpush1.bf16.msra.mxu0 %v2493_v29  ;;  %3073 = vmatpush1.bf16.msra.mxu1 %v2495_v11  ;;  %v2579_v29 = vld [vmem:[#allocation3 + $0x5c0] sm:$0xff]  ;;  %v2585_v11 = vld [vmem:[#allocation3 + $0x5f0] sm:$0xff] }
 0x702   :  { %2910 = vmatprep.subr.bf16.mxu0 %v2501_v40  ;;  %3074 = vmatprep.subr.bf16.mxu1 %v2503_v6  ;;  %v2587_v40 = vld [vmem:[#allocation3 + $0x600] sm:$0xff]  ;;  %v2584_v6 = vld [vmem:[#allocation3 + $0x5e8] sm:$0xff] }
 0x705   :  { %2911 = vmatpush1.bf16.msra.mxu0 %v2500_v12  ;;  %3075 = vmatpush1.bf16.msra.mxu1 %v2502_v42  ;;  %v2586_v12 = vld [vmem:[#allocation3 + $0x5f8] sm:$0xff]  ;;  %v2592_v42 = vld [vmem:[#allocation3 + $0x628] sm:$0xff] }
 0x706   :  { %2921 = vmatprep.subr.bf16.mxu0 %v2508_v7  ;;  %3085 = vmatprep.subr.bf16.mxu1 %v2510_v9  ;;  %v2594_v7 = vld [vmem:[#allocation3 + $0x638] sm:$0xff]  ;;  %v2591_v9 = vld [vmem:[#allocation3 + $0x620] sm:$0xff] }
 0x708   :  { %2913 = vmatmul.mubr.bf16.vlgmr.msra.gmra.mrb[12].mxu0 %v4847_v17  ;;  %3077 = vmatmul.mubr.bf16.vlgmr.msra.gmra.mrb[20].mxu1 %v4847_v17 }
 0x709   :  { %2922 = vmatpush1.bf16.msra.mxu0 %v2507_v44  ;;  %3086 = vmatpush1.bf16.msra.mxu1 %v2509_v50  ;;  %v2593_v44 = vld [vmem:[#allocation3 + $0x630] sm:$0xff]  ;;  %v2599_v50 = vld [vmem:[#allocation3 + $0x660] sm:$0xff] }
 0x70a   :  { %2923 = vmatprep.subr.bf16.mxu0 %v2515_v58  ;;  %3087 = vmatprep.subr.bf16.mxu1 %v2517_v47  ;;  %v2601_v58 = vld [vmem:[#allocation3 + $0x670] sm:$0xff]  ;;  %v2598_v47 = vld [vmem:[#allocation3 + $0x658] sm:$0xff] }
 0x70b   :  { %2953 = vmatprep.mubr.bf16.mxu0 %v4856_v35  ;;  %3117 = vmatprep.mubr.bf16.mxu1 %v4856_v35 }
 0x70d   :  { %2924 = vmatpush1.bf16.msra.mxu0 %v2514_v41  ;;  %3088 = vmatpush1.bf16.msra.mxu1 %v2516_v51  ;;  %v2600_v41 = vld [vmem:[#allocation3 + $0x668] sm:$0xff]  ;;  %v2606_v51 = vld [vmem:[#allocation3 + $0x698] sm:$0xff] }
 0x70e   :  { %2925 = vmatprep.subr.bf16.mxu0 %v2522_v43  ;;  %3089 = vmatprep.subr.bf16.mxu1 %v2524_v45  ;;  %v2608_v43 = vld [vmem:[#allocation3 + $0x6a8] sm:$0xff]  ;;  %v2605_v45 = vld [vmem:[#allocation3 + $0x690] sm:$0xff] }
 0x711   :  { %2926 = vmatpush1.bf16.msra.mxu0 %v2521_v24  ;;  %3090 = vmatpush1.bf16.msra.mxu1 %v2523_v8  ;;  %v2607_v24 = vld [vmem:[#allocation3 + $0x6a0] sm:$0xff]  ;;  %v2613_v8 = vld [vmem:[#allocation3 + $0x6d0] sm:$0xff] }
 0x712   :  { %2927 = vmatprep.subr.bf16.mxu0 %v2529_v13  ;;  %3091 = vmatprep.subr.bf16.mxu1 %v2531_v28  ;;  %v2615_v13 = vld [vmem:[#allocation3 + $0x6e0] sm:$0xff]  ;;  %v2612_v28 = vld [vmem:[#allocation3 + $0x6c8] sm:$0xff] }
 0x715   :  { %2928 = vmatpush1.bf16.msra.mxu0 %v2528_v48  ;;  %3092 = vmatpush1.bf16.msra.mxu1 %v2530_v2  ;;  %v2614_v48 = vld [vmem:[#allocation3 + $0x6d8] sm:$0xff]  ;;  %v2620_v2 = vld [vmem:[#allocation3 + $0x708] sm:$0xff] }
 0x716   :  { %2929 = vmatprep.subr.bf16.mxu0 %v2536_v49  ;;  %3093 = vmatprep.subr.bf16.mxu1 %v2538_v14  ;;  %v2622_v49 = vld [vmem:[#allocation3 + $0x718] sm:$0xff]  ;;  %v2619_v14 = vld [vmem:[#allocation3 + $0x700] sm:$0xff] }
 0x719   :  { %2930 = vmatpush1.bf16.msra.mxu0 %v2535_v15  ;;  %3094 = vmatpush1.bf16.msra.mxu1 %v2537_v34  ;;  %v2621_v15 = vld [vmem:[#allocation3 + $0x710] sm:$0xff]  ;;  %v2627_v34 = vld [vmem:[#allocation3 + $0x740] sm:$0xff] }
 0x71a   :  { %2931 = vmatprep.subr.bf16.mxu0 %v2543_v16  ;;  %3095 = vmatprep.subr.bf16.mxu1 %v2545_v53  ;;  %v2629_v16 = vld [vmem:[#allocation3 + $0x750] sm:$0xff]  ;;  %v2626_v53 = vld [vmem:[#allocation3 + $0x738] sm:$0xff] }
 0x71d   :  { %2932 = vmatpush1.bf16.msra.mxu0 %v2542_v27  ;;  %3096 = vmatpush1.bf16.msra.mxu1 %v2544_v52  ;;  %v2628_v27 = vld [vmem:[#allocation3 + $0x748] sm:$0xff]  ;;  %v2634_v52 = vld [vmem:[#allocation3 + $0x778] sm:$0xff] }
 0x71e   :  { %2933 = vmatprep.subr.bf16.mxu0 %v2550_v20  ;;  %3097 = vmatprep.subr.bf16.mxu1 %v2552_v21  ;;  %v2636_v20 = vld [vmem:[#allocation3 + $0x788] sm:$0xff]  ;;  %v2633_v21 = vld [vmem:[#allocation3 + $0x770] sm:$0xff] }
 0x721   :  { %2934 = vmatpush1.bf16.msra.mxu0 %v2549_v22  ;;  %3098 = vmatpush1.bf16.msra.mxu1 %v2551_v56  ;;  %v2635_v22 = vld [vmem:[#allocation3 + $0x780] sm:$0xff]  ;;  %v2641_v56 = vld [vmem:[#allocation3 + $0x7b0] sm:$0xff] }
 0x722   :  { %2935 = vmatprep.subr.bf16.mxu0 %v2557_v25  ;;  %3099 = vmatprep.subr.bf16.mxu1 %v2559_v57  ;;  %v2643_v25 = vld [vmem:[#allocation3 + $0x7c0] sm:$0xff]  ;;  %v2640_v57 = vld [vmem:[#allocation3 + $0x7a8] sm:$0xff] }
 0x725   :  { %2936 = vmatpush1.bf16.msra.mxu0 %v2556_v26  ;;  %3100 = vmatpush1.bf16.msra.mxu1 %v2558_v30  ;;  %v2642_v26 = vld [vmem:[#allocation3 + $0x7b8] sm:$0xff]  ;;  %v2648_v30 = vld [vmem:[#allocation3 + $0x7e8] sm:$0xff] }
 0x726   :  { %2937 = vmatprep.subr.bf16.mxu0 %v2564_v36  ;;  %3101 = vmatprep.subr.bf16.mxu1 %v2566_v46  ;;  %v2650_v36 = vld [vmem:[#allocation3 + $0x7f8] sm:$0xff]  ;;  %v2647_v46 = vld [vmem:[#allocation3 + $0x7e0] sm:$0xff] }
 0x729   :  { %2938 = vmatpush1.bf16.msra.mxu0 %v2563_v59  ;;  %3102 = vmatpush1.bf16.msra.mxu1 %v2565_v60  ;;  %v2649_v59 = vld [vmem:[#allocation3 + $0x7f0] sm:$0xff]  ;;  %v2655_v60 = vld [vmem:[#allocation3 + $0x820] sm:$0xff] }
 0x72a   :  { %2939 = vmatprep.subr.bf16.mxu0 %v2571_v10  ;;  %3103 = vmatprep.subr.bf16.mxu1 %v2573_v31  ;;  %v2657_v10 = vld [vmem:[#allocation3 + $0x830] sm:$0xff]  ;;  %v2654_v31 = vld [vmem:[#allocation3 + $0x818] sm:$0xff] }
 0x72d   :  { %2940 = vmatpush1.bf16.msra.mxu0 %v2570_v32  ;;  %3104 = vmatpush1.bf16.msra.mxu1 %v2572_v63  ;;  %v2656_v32 = vld [vmem:[#allocation3 + $0x828] sm:$0xff]  ;;  %v2662_v63 = vld [vmem:[#allocation3 + $0x858] sm:$0xff] }
 0x72e   :  { %2941 = vmatprep.subr.bf16.mxu0 %v2578_v1  ;;  %3105 = vmatprep.subr.bf16.mxu1 %v2580_v4  ;;  %v2664_v1 = vld [vmem:[#allocation3 + $0x868] sm:$0xff]  ;;  %v2661_v4 = vld [vmem:[#allocation3 + $0x850] sm:$0xff] }
 0x731   :  { %2942 = vmatpush1.bf16.msra.mxu0 %v2577_v5  ;;  %3106 = vmatpush1.bf16.msra.mxu1 %v2579_v29  ;;  %v2663_v5 = vld [vmem:[#allocation3 + $0x860] sm:$0xff]  ;;  %v2669_v29 = vld [vmem:[#allocation3 + $0x890] sm:$0xff] }
 0x732   :  { %2943 = vmatprep.subr.bf16.mxu0 %v2585_v11  ;;  %3107 = vmatprep.subr.bf16.mxu1 %v2587_v40  ;;  %v2671_v11 = vld [vmem:[#allocation3 + $0x8a0] sm:$0xff]  ;;  %v2668_v40 = vld [vmem:[#allocation3 + $0x888] sm:$0xff] }
 0x735   :  { %2944 = vmatpush1.bf16.msra.mxu0 %v2584_v6  ;;  %3108 = vmatpush1.bf16.msra.mxu1 %v2586_v12  ;;  %v2670_v6 = vld [vmem:[#allocation3 + $0x898] sm:$0xff]  ;;  %v2676_v12 = vld [vmem:[#allocation3 + $0x8c8] sm:$0xff] }
 0x736   :  { %2945 = vmatprep.subr.bf16.mxu0 %v2592_v42  ;;  %3109 = vmatprep.subr.bf16.mxu1 %v2594_v7  ;;  %v2678_v42 = vld [vmem:[#allocation3 + $0x8d8] sm:$0xff]  ;;  %v2675_v7 = vld [vmem:[#allocation3 + $0x8c0] sm:$0xff] }
 0x739   :  { %2946 = vmatpush1.bf16.msra.mxu0 %v2591_v9  ;;  %3110 = vmatpush1.bf16.msra.mxu1 %v2593_v44  ;;  %v2677_v9 = vld [vmem:[#allocation3 + $0x8d0] sm:$0xff]  ;;  %v2683_v44 = vld [vmem:[#allocation3 + $0x900] sm:$0xff] }
 0x73a   :  { %2947 = vmatprep.subr.bf16.mxu0 %v2599_v50  ;;  %3111 = vmatprep.subr.bf16.mxu1 %v2601_v58  ;;  %v2685_v50 = vld [vmem:[#allocation3 + $0x910] sm:$0xff]  ;;  %v2682_v58 = vld [vmem:[#allocation3 + $0x8f8] sm:$0xff] }
 0x73d   :  { %2948 = vmatpush1.bf16.msra.mxu0 %v2598_v47  ;;  %3112 = vmatpush1.bf16.msra.mxu1 %v2600_v41  ;;  %v2684_v47 = vld [vmem:[#allocation3 + $0x908] sm:$0xff]  ;;  %v2690_v41 = vld [vmem:[#allocation3 + $0x938] sm:$0xff] }
 0x73e   :  { %2949 = vmatprep.subr.bf16.mxu0 %v2606_v51  ;;  %3113 = vmatprep.subr.bf16.mxu1 %v2608_v43  ;;  %v2692_v51 = vld [vmem:[#allocation3 + $0x948] sm:$0xff]  ;;  %v2689_v43 = vld [vmem:[#allocation3 + $0x930] sm:$0xff] }
 0x741   :  { %2950 = vmatpush1.bf16.msra.mxu0 %v2605_v45  ;;  %3114 = vmatpush1.bf16.msra.mxu1 %v2607_v24  ;;  %v2691_v45 = vld [vmem:[#allocation3 + $0x940] sm:$0xff]  ;;  %v2697_v24 = vld [vmem:[#allocation3 + $0x970] sm:$0xff] }
 0x742   :  { %2951 = vmatprep.subr.bf16.mxu0 %v2613_v8  ;;  %3115 = vmatprep.subr.bf16.mxu1 %v2615_v13  ;;  %v2699_v8 = vld [vmem:[#allocation3 + $0x980] sm:$0xff]  ;;  %v2696_v13 = vld [vmem:[#allocation3 + $0x968] sm:$0xff] }
 0x745   :  { %2952 = vmatpush1.bf16.msra.mxu0 %v2612_v28  ;;  %3116 = vmatpush1.bf16.msra.mxu1 %v2614_v48  ;;  %v2698_v28 = vld [vmem:[#allocation3 + $0x978] sm:$0xff]  ;;  %v2704_v48 = vld [vmem:[#allocation3 + $0x9a8] sm:$0xff] }
 0x746   :  { %2962 = vmatprep.subr.bf16.mxu0 %v2620_v2  ;;  %3126 = vmatprep.subr.bf16.mxu1 %v2622_v49  ;;  %v2706_v2 = vld [vmem:[#allocation3 + $0x9b8] sm:$0xff]  ;;  %v2703_v49 = vld [vmem:[#allocation3 + $0x9a0] sm:$0xff] }
 0x748   :  { %2954 = vmatmul.mubr.bf16.vlgmr.msra.gmra.mrb[12].mxu0 %v4853_v23  ;;  %3118 = vmatmul.mubr.bf16.vlgmr.msra.gmra.mrb[20].mxu1 %v4853_v23 }
 0x749   :  { %2963 = vmatpush1.bf16.msra.mxu0 %v2619_v14  ;;  %3127 = vmatpush1.bf16.msra.mxu1 %v2621_v15  ;;  %v2705_v14 = vld [vmem:[#allocation3 + $0x9b0] sm:$0xff]  ;;  %v2711_v15 = vld [vmem:[#allocation3 + $0x9e0] sm:$0xff] }
 0x74a   :  { %2964 = vmatprep.subr.bf16.mxu0 %v2627_v34  ;;  %3128 = vmatprep.subr.bf16.mxu1 %v2629_v16  ;;  %v2713_v34 = vld [vmem:[#allocation3 + $0x9f0] sm:$0xff]  ;;  %v2710_v16 = vld [vmem:[#allocation3 + $0x9d8] sm:$0xff] }
 0x74b   :  { %2994 = vmatprep.mubr.bf16.mxu0 %v4860_v38  ;;  %3158 = vmatprep.mubr.bf16.mxu1 %v4860_v38 }
 0x74d   :  { %2965 = vmatpush1.bf16.msra.mxu0 %v2626_v53  ;;  %3129 = vmatpush1.bf16.msra.mxu1 %v2628_v27  ;;  %v2712_v53 = vld [vmem:[#allocation3 + $0x9e8] sm:$0xff]  ;;  %v2718_v27 = vld [vmem:[#allocation3 + $0xa18] sm:$0xff] }
 0x74e   :  { %2966 = vmatprep.subr.bf16.mxu0 %v2634_v52  ;;  %3130 = vmatprep.subr.bf16.mxu1 %v2636_v20  ;;  %v2720_v52 = vld [vmem:[#allocation3 + $0xa28] sm:$0xff]  ;;  %v2717_v20 = vld [vmem:[#allocation3 + $0xa10] sm:$0xff] }
 0x751   :  { %2967 = vmatpush1.bf16.msra.mxu0 %v2633_v21  ;;  %3131 = vmatpush1.bf16.msra.mxu1 %v2635_v22  ;;  %v2719_v21 = vld [vmem:[#allocation3 + $0xa20] sm:$0xff]  ;;  %v2725_v22 = vld [vmem:[#allocation3 + $0xa50] sm:$0xff] }
 0x752   :  { %2968 = vmatprep.subr.bf16.mxu0 %v2641_v56  ;;  %3132 = vmatprep.subr.bf16.mxu1 %v2643_v25  ;;  %v2727_v56 = vld [vmem:[#allocation3 + $0xa60] sm:$0xff]  ;;  %v2724_v25 = vld [vmem:[#allocation3 + $0xa48] sm:$0xff] }
 0x755   :  { %2969 = vmatpush1.bf16.msra.mxu0 %v2640_v57  ;;  %3133 = vmatpush1.bf16.msra.mxu1 %v2642_v26  ;;  %v2726_v57 = vld [vmem:[#allocation3 + $0xa58] sm:$0xff]  ;;  %v2732_v26 = vld [vmem:[#allocation3 + $0xa88] sm:$0xff] }
 0x756   :  { %2970 = vmatprep.subr.bf16.mxu0 %v2648_v30  ;;  %3134 = vmatprep.subr.bf16.mxu1 %v2650_v36  ;;  %v2734_v30 = vld [vmem:[#allocation3 + $0xa98] sm:$0xff]  ;;  %v2731_v36 = vld [vmem:[#allocation3 + $0xa80] sm:$0xff] }
 0x759   :  { %2971 = vmatpush1.bf16.msra.mxu0 %v2647_v46  ;;  %3135 = vmatpush1.bf16.msra.mxu1 %v2649_v59  ;;  %v2733_v46 = vld [vmem:[#allocation3 + $0xa90] sm:$0xff]  ;;  %v2739_v59 = vld [vmem:[#allocation3 + $0xac0] sm:$0xff] }
 0x75a   :  { %2972 = vmatprep.subr.bf16.mxu0 %v2655_v60  ;;  %3136 = vmatprep.subr.bf16.mxu1 %v2657_v10  ;;  %v2741_v60 = vld [vmem:[#allocation3 + $0xad0] sm:$0xff]  ;;  %v2738_v10 = vld [vmem:[#allocation3 + $0xab8] sm:$0xff] }
 0x75d   :  { %2973 = vmatpush1.bf16.msra.mxu0 %v2654_v31  ;;  %3137 = vmatpush1.bf16.msra.mxu1 %v2656_v32  ;;  %v2740_v31 = vld [vmem:[#allocation3 + $0xac8] sm:$0xff]  ;;  %v2746_v32 = vld [vmem:[#allocation3 + $0xaf8] sm:$0xff] }
 0x75e   :  { %2974 = vmatprep.subr.bf16.mxu0 %v2662_v63  ;;  %3138 = vmatprep.subr.bf16.mxu1 %v2664_v1  ;;  %v2748_v63 = vld [vmem:[#allocation3 + $0xb08] sm:$0xff]  ;;  %v2745_v1 = vld [vmem:[#allocation3 + $0xaf0] sm:$0xff] }
 0x761   :  { %2975 = vmatpush1.bf16.msra.mxu0 %v2661_v4  ;;  %3139 = vmatpush1.bf16.msra.mxu1 %v2663_v5  ;;  %v2747_v4 = vld [vmem:[#allocation3 + $0xb00] sm:$0xff]  ;;  %v2753_v5 = vld [vmem:[#allocation3 + $0xb30] sm:$0xff] }
 0x762   :  { %2976 = vmatprep.subr.bf16.mxu0 %v2669_v29  ;;  %3140 = vmatprep.subr.bf16.mxu1 %v2671_v11  ;;  %v2755_v29 = vld [vmem:[#allocation3 + $0xb40] sm:$0xff]  ;;  %v2752_v11 = vld [vmem:[#allocation3 + $0xb28] sm:$0xff] }
 0x765   :  { %2977 = vmatpush1.bf16.msra.mxu0 %v2668_v40  ;;  %3141 = vmatpush1.bf16.msra.mxu1 %v2670_v6  ;;  %v2754_v40 = vld [vmem:[#allocation3 + $0xb38] sm:$0xff]  ;;  %v2760_v6 = vld [vmem:[#allocation3 + $0xb68] sm:$0xff] }
 0x766   :  { %2978 = vmatprep.subr.bf16.mxu0 %v2676_v12  ;;  %3142 = vmatprep.subr.bf16.mxu1 %v2678_v42  ;;  %v2762_v12 = vld [vmem:[#allocation3 + $0xb78] sm:$0xff]  ;;  %v2759_v42 = vld [vmem:[#allocation3 + $0xb60] sm:$0xff] }
 0x769   :  { %2979 = vmatpush1.bf16.msra.mxu0 %v2675_v7  ;;  %3143 = vmatpush1.bf16.msra.mxu1 %v2677_v9  ;;  %v2761_v7 = vld [vmem:[#allocation3 + $0xb70] sm:$0xff]  ;;  %v2767_v9 = vld [vmem:[#allocation3 + $0xba0] sm:$0xff] }
 0x76a   :  { %2980 = vmatprep.subr.bf16.mxu0 %v2683_v44  ;;  %3144 = vmatprep.subr.bf16.mxu1 %v2685_v50  ;;  %v2769_v44 = vld [vmem:[#allocation3 + $0xbb0] sm:$0xff]  ;;  %v2766_v50 = vld [vmem:[#allocation3 + $0xb98] sm:$0xff] }
 0x76d   :  { %2981 = vmatpush1.bf16.msra.mxu0 %v2682_v58  ;;  %3145 = vmatpush1.bf16.msra.mxu1 %v2684_v47  ;;  %v2768_v58 = vld [vmem:[#allocation3 + $0xba8] sm:$0xff]  ;;  %v2774_v47 = vld [vmem:[#allocation3 + $0xbd8] sm:$0xff] }
 0x76e   :  { %2982 = vmatprep.subr.bf16.mxu0 %v2690_v41  ;;  %3146 = vmatprep.subr.bf16.mxu1 %v2692_v51  ;;  %v2776_v41 = vld [vmem:[#allocation3 + $0xbe8] sm:$0xff]  ;;  %v2773_v51 = vld [vmem:[#allocation3 + $0xbd0] sm:$0xff] }
 0x771   :  { %2983 = vmatpush1.bf16.msra.mxu0 %v2689_v43  ;;  %3147 = vmatpush1.bf16.msra.mxu1 %v2691_v45  ;;  %v2775_v43 = vld [vmem:[#allocation3 + $0xbe0] sm:$0xff]  ;;  %v2781_v45 = vld [vmem:[#allocation3 + $0xc10] sm:$0xff] }
 0x772   :  { %2984 = vmatprep.subr.bf16.mxu0 %v2697_v24  ;;  %3148 = vmatprep.subr.bf16.mxu1 %v2699_v8  ;;  %v2783_v24 = vld [vmem:[#allocation3 + $0xc20] sm:$0xff]  ;;  %v2780_v8 = vld [vmem:[#allocation3 + $0xc08] sm:$0xff] }
 0x775   :  { %2985 = vmatpush1.bf16.msra.mxu0 %v2696_v13  ;;  %3149 = vmatpush1.bf16.msra.mxu1 %v2698_v28  ;;  %v2782_v13 = vld [vmem:[#allocation3 + $0xc18] sm:$0xff]  ;;  %v2788_v28 = vld [vmem:[#allocation3 + $0xc48] sm:$0xff] }
 0x776   :  { %2986 = vmatprep.subr.bf16.mxu0 %v2704_v48  ;;  %3150 = vmatprep.subr.bf16.mxu1 %v2706_v2  ;;  %v2790_v48 = vld [vmem:[#allocation3 + $0xc58] sm:$0xff]  ;;  %v2787_v2 = vld [vmem:[#allocation3 + $0xc40] sm:$0xff] }
 0x779   :  { %2987 = vmatpush1.bf16.msra.mxu0 %v2703_v49  ;;  %3151 = vmatpush1.bf16.msra.mxu1 %v2705_v14  ;;  %v2789_v49 = vld [vmem:[#allocation3 + $0xc50] sm:$0xff]  ;;  %v2795_v14 = vld [vmem:[#allocation3 + $0xc80] sm:$0xff] }
 0x77a   :  { %2988 = vmatprep.subr.bf16.mxu0 %v2711_v15  ;;  %3152 = vmatprep.subr.bf16.mxu1 %v2713_v34  ;;  %v2797_v15 = vld [vmem:[#allocation3 + $0xc90] sm:$0xff]  ;;  %v2794_v34 = vld [vmem:[#allocation3 + $0xc78] sm:$0xff] }
 0x77d   :  { %2989 = vmatpush1.bf16.msra.mxu0 %v2710_v16  ;;  %3153 = vmatpush1.bf16.msra.mxu1 %v2712_v53  ;;  %v2796_v16 = vld [vmem:[#allocation3 + $0xc88] sm:$0xff]  ;;  %v2802_v53 = vld [vmem:[#allocation3 + $0xcb8] sm:$0xff] }
 0x77e   :  { %2990 = vmatprep.subr.bf16.mxu0 %v2718_v27  ;;  %3154 = vmatprep.subr.bf16.mxu1 %v2720_v52  ;;  %v2804_v27 = vld [vmem:[#allocation3 + $0xcc8] sm:$0xff]  ;;  %v2801_v52 = vld [vmem:[#allocation3 + $0xcb0] sm:$0xff] }
 0x781   :  { %2991 = vmatpush1.bf16.msra.mxu0 %v2717_v20  ;;  %3155 = vmatpush1.bf16.msra.mxu1 %v2719_v21  ;;  %v2803_v20 = vld [vmem:[#allocation3 + $0xcc0] sm:$0xff]  ;;  %v2809_v21 = vld [vmem:[#allocation3 + $0xcf0] sm:$0xff] }
 0x782   :  { %2992 = vmatprep.subr.bf16.mxu0 %v2725_v22  ;;  %3156 = vmatprep.subr.bf16.mxu1 %v2727_v56  ;;  %v2811_v22 = vld [vmem:[#allocation3 + $0xd00] sm:$0xff]  ;;  %v2808_v56 = vld [vmem:[#allocation3 + $0xce8] sm:$0xff] }
 0x785   :  { %2993 = vmatpush1.bf16.msra.mxu0 %v2724_v25  ;;  %3157 = vmatpush1.bf16.msra.mxu1 %v2726_v57  ;;  %v2810_v25 = vld [vmem:[#allocation3 + $0xcf8] sm:$0xff]  ;;  %v2816_v57 = vld [vmem:[#allocation3 + $0xd28] sm:$0xff] }
 0x786   :  { %3003 = vmatprep.subr.bf16.mxu0 %v2732_v26  ;;  %3167 = vmatprep.subr.bf16.mxu1 %v2734_v30  ;;  %v2818_v26 = vld [vmem:[#allocation3 + $0xd38] sm:$0xff]  ;;  %v2815_v30 = vld [vmem:[#allocation3 + $0xd20] sm:$0xff] }
 0x788   :  { %2995 = vmatmul.mubr.bf16.vlgmr.msra.gmra.mrb[12].mxu0 %v4858_v37  ;;  %3159 = vmatmul.mubr.bf16.vlgmr.msra.gmra.mrb[20].mxu1 %v4858_v37 }
 0x789   :  { %3004 = vmatpush1.bf16.msra.mxu0 %v2731_v36  ;;  %3168 = vmatpush1.bf16.msra.mxu1 %v2733_v46  ;;  %v2817_v36 = vld [vmem:[#allocation3 + $0xd30] sm:$0xff]  ;;  %v2823_v46 = vld [vmem:[#allocation3 + $0xd60] sm:$0xff] }
 0x78a   :  { %3005 = vmatprep.subr.bf16.mxu0 %v2739_v59  ;;  %3169 = vmatprep.subr.bf16.mxu1 %v2741_v60  ;;  %v2825_v59 = vld [vmem:[#allocation3 + $0xd70] sm:$0xff]  ;;  %v2822_v60 = vld [vmem:[#allocation3 + $0xd58] sm:$0xff] }
 0x78b   :  { %3035 = vmatprep.mubr.bf16.mxu0 %v4864_v3  ;;  %3199 = vmatprep.mubr.bf16.mxu1 %v4864_v3 }
 0x78d   :  { %3006 = vmatpush1.bf16.msra.mxu0 %v2738_v10  ;;  %3170 = vmatpush1.bf16.msra.mxu1 %v2740_v31  ;;  %v2824_v10 = vld [vmem:[#allocation3 + $0xd68] sm:$0xff]  ;;  %v2830_v31 = vld [vmem:[#allocation3 + $0xd98] sm:$0xff] }
 0x78e   :  { %3007 = vmatprep.subr.bf16.mxu0 %v2746_v32  ;;  %3171 = vmatprep.subr.bf16.mxu1 %v2748_v63  ;;  %v2832_v32 = vld [vmem:[#allocation3 + $0xda8] sm:$0xff]  ;;  %v2829_v63 = vld [vmem:[#allocation3 + $0xd90] sm:$0xff] }
 0x791   :  { %3008 = vmatpush1.bf16.msra.mxu0 %v2745_v1  ;;  %3172 = vmatpush1.bf16.msra.mxu1 %v2747_v4  ;;  %v2831_v1 = vld [vmem:[#allocation3 + $0xda0] sm:$0xff]  ;;  %v2837_v4 = vld [vmem:[#allocation3 + $0xdd0] sm:$0xff] }
 0x792   :  { %3009 = vmatprep.subr.bf16.mxu0 %v2753_v5  ;;  %3173 = vmatprep.subr.bf16.mxu1 %v2755_v29  ;;  %v2839_v5 = vld [vmem:[#allocation3 + $0xde0] sm:$0xff]  ;;  %v2836_v29 = vld [vmem:[#allocation3 + $0xdc8] sm:$0xff] }
 0x795   :  { %3010 = vmatpush1.bf16.msra.mxu0 %v2752_v11  ;;  %3174 = vmatpush1.bf16.msra.mxu1 %v2754_v40  ;;  %v2838_v11 = vld [vmem:[#allocation3 + $0xdd8] sm:$0xff]  ;;  %v2400_v40 = vld [vmem:[#allocation3 + $0x28] sm:$0xff] }
 0x796   :  { %3011 = vmatprep.subr.bf16.mxu0 %v2760_v6  ;;  %3175 = vmatprep.subr.bf16.mxu1 %v2762_v12  ;;  %v2457_v6 = vld [vmem:[#allocation3 + $0x1f0] sm:$0xff]  ;;  %v2399_v12 = vld [vmem:[#allocation3 + $0x20] sm:$0xff] }
 0x799   :  { %3012 = vmatpush1.bf16.msra.mxu0 %v2759_v42  ;;  %3176 = vmatpush1.bf16.msra.mxu1 %v2761_v7  ;;  %v2401_v42 = vld [vmem:[#allocation3 + $0x30] sm:$0xff]  ;;  %v2407_v7 = vld [vmem:[#allocation3 + $0x60] sm:$0xff] }
 0x79a   :  { %3013 = vmatprep.subr.bf16.mxu0 %v2767_v9  ;;  %3177 = vmatprep.subr.bf16.mxu1 %v2769_v44  ;;  %v2464_v9 = vld [vmem:[#allocation3 + $0x228] sm:$0xff]  ;;  %v2406_v44 = vld [vmem:[#allocation3 + $0x58] sm:$0xff] }
 0x79d   :  { %3014 = vmatpush1.bf16.msra.mxu0 %v2766_v50  ;;  %3178 = vmatpush1.bf16.msra.mxu1 %v2768_v58  ;;  %v2408_v50 = vld [vmem:[#allocation3 + $0x68] sm:$0xff]  ;;  %v2414_v58 = vld [vmem:[#allocation3 + $0x98] sm:$0xff] }
 0x79e   :  { %3015 = vmatprep.subr.bf16.mxu0 %v2774_v47  ;;  %3179 = vmatprep.subr.bf16.mxu1 %v2776_v41  ;;  %v2471_v47 = vld [vmem:[#allocation3 + $0x260] sm:$0xff]  ;;  %v2413_v41 = vld [vmem:[#allocation3 + $0x90] sm:$0xff] }
 0x7a1   :  { %3016 = vmatpush1.bf16.msra.mxu0 %v2773_v51  ;;  %3180 = vmatpush1.bf16.msra.mxu1 %v2775_v43  ;;  %v2415_v51 = vld [vmem:[#allocation3 + $0xa0] sm:$0xff]  ;;  %v2421_v43 = vld [vmem:[#allocation3 + $0xd0] sm:$0xff] }
 0x7a2   :  { %3017 = vmatprep.subr.bf16.mxu0 %v2781_v45  ;;  %3181 = vmatprep.subr.bf16.mxu1 %v2783_v24  ;;  %v2478_v45 = vld [vmem:[#allocation3 + $0x298] sm:$0xff]  ;;  %v2420_v24 = vld [vmem:[#allocation3 + $0xc8] sm:$0xff] }
 0x7a5   :  { %3018 = vmatpush1.bf16.msra.mxu0 %v2780_v8  ;;  %3182 = vmatpush1.bf16.msra.mxu1 %v2782_v13  ;;  %v2422_v8 = vld [vmem:[#allocation3 + $0xd8] sm:$0xff]  ;;  %v2428_v13 = vld [vmem:[#allocation3 + $0x108] sm:$0xff] }
 0x7a6   :  { %3019 = vmatprep.subr.bf16.mxu0 %v2788_v28  ;;  %3183 = vmatprep.subr.bf16.mxu1 %v2790_v48  ;;  %v2485_v28 = vld [vmem:[#allocation3 + $0x2d0] sm:$0xff] }
 0x7a7   :  { %v2429_v48 = vld [vmem:[#allocation3 + $0x110] sm:$0xff] }
 0x7a9   :  { %3020 = vmatpush1.bf16.msra.mxu0 %v2787_v2  ;;  %3184 = vmatpush1.bf16.msra.mxu1 %v2789_v49  ;;  %v2435_v2 = vld [vmem:[#allocation3 + $0x140] sm:$0xff]  ;;  %v2492_v49 = vld [vmem:[#allocation3 + $0x308] sm:$0xff] }
 0x7aa   :  { %3021 = vmatprep.subr.bf16.mxu0 %v2795_v14  ;;  %3185 = vmatprep.subr.bf16.mxu1 %v2797_v15  ;;  %v2434_v14 = vld [vmem:[#allocation3 + $0x138] sm:$0xff]  ;;  %v2436_v15 = vld [vmem:[#allocation3 + $0x148] sm:$0xff] }
 0x7ad   :  { %3022 = vmatpush1.bf16.msra.mxu0 %v2794_v34  ;;  %3186 = vmatpush1.bf16.msra.mxu1 %v2796_v16  ;;  %v2442_v34 = vld [vmem:[#allocation3 + $0x178] sm:$0xff]  ;;  %v2499_v16 = vld [vmem:[#allocation3 + $0x340] sm:$0xff] }
 0x7ae   :  { %3023 = vmatprep.subr.bf16.mxu0 %v2802_v53  ;;  %3187 = vmatprep.subr.bf16.mxu1 %v2804_v27  ;;  %v2441_v53 = vld [vmem:[#allocation3 + $0x170] sm:$0xff]  ;;  %v2443_v27 = vld [vmem:[#allocation3 + $0x180] sm:$0xff] }
 0x7b1   :  { %3024 = vmatpush1.bf16.msra.mxu0 %v2801_v52  ;;  %3188 = vmatpush1.bf16.msra.mxu1 %v2803_v20  ;;  %v2449_v52 = vld [vmem:[#allocation3 + $0x1b0] sm:$0xff]  ;;  %v2506_v20 = vld [vmem:[#allocation3 + $0x378] sm:$0xff] }
 0x7b2   :  { %3025 = vmatprep.subr.bf16.mxu0 %v2809_v21  ;;  %3189 = vmatprep.subr.bf16.mxu1 %v2811_v22  ;;  %v2448_v21 = vld [vmem:[#allocation3 + $0x1a8] sm:$0xff]  ;;  %v2450_v22 = vld [vmem:[#allocation3 + $0x1b8] sm:$0xff] }
 0x7b5   :  { %3026 = vmatpush1.bf16.msra.mxu0 %v2808_v56  ;;  %3190 = vmatpush1.bf16.msra.mxu1 %v2810_v25  ;;  %v2456_v56 = vld [vmem:[#allocation3 + $0x1e8] sm:$0xff]  ;;  %v2569_v25 = vld [vmem:[#allocation3 + $0x570] sm:$0xff] }
 0x7b6   :  { %3027 = vmatprep.subr.bf16.mxu0 %v2816_v57  ;;  %3191 = vmatprep.subr.bf16.mxu1 %v2818_v26  ;;  %v2455_v57 = vld [vmem:[#allocation3 + $0x1e0] sm:$0xff]  ;;  %v2513_v26 = vld [vmem:[#allocation3 + $0x3b0] sm:$0xff] }
 0x7b9   :  { %3028 = vmatpush1.bf16.msra.mxu0 %v2815_v30  ;;  %3192 = vmatpush1.bf16.msra.mxu1 %v2817_v36  ;;  %v2463_v30 = vld [vmem:[#allocation3 + $0x220] sm:$0xff]  ;;  %v2576_v36 = vld [vmem:[#allocation3 + $0x5a8] sm:$0xff] }
 0x7ba   :  { %3029 = vmatprep.subr.bf16.mxu0 %v2823_v46  ;;  %3193 = vmatprep.subr.bf16.mxu1 %v2825_v59  ;;  %v2462_v46 = vld [vmem:[#allocation3 + $0x218] sm:$0xff]  ;;  %v2520_v59 = vld [vmem:[#allocation3 + $0x3e8] sm:$0xff] }
 0x7bd   :  { %3030 = vmatpush1.bf16.msra.mxu0 %v2822_v60  ;;  %3194 = vmatpush1.bf16.msra.mxu1 %v2824_v10  ;;  %v2470_v60 = vld [vmem:[#allocation3 + $0x258] sm:$0xff]  ;;  %v2583_v10 = vld [vmem:[#allocation3 + $0x5e0] sm:$0xff] }
 0x7be   :  { %3031 = vmatprep.subr.bf16.mxu0 %v2830_v31  ;;  %3195 = vmatprep.subr.bf16.mxu1 %v2832_v32  ;;  %v2469_v31 = vld [vmem:[#allocation3 + $0x250] sm:$0xff]  ;;  %v2527_v32 = vld [vmem:[#allocation3 + $0x420] sm:$0xff] }
 0x7c1   :  { %3032 = vmatpush1.bf16.msra.mxu0 %v2829_v63  ;;  %3196 = vmatpush1.bf16.msra.mxu1 %v2831_v1  ;;  %v2477_v63 = vld [vmem:[#allocation3 + $0x290] sm:$0xff]  ;;  %v2590_v1 = vld [vmem:[#allocation3 + $0x618] sm:$0xff] }
 0x7c2   :  { %3033 = vmatprep.subr.bf16.mxu0 %v2837_v4  ;;  %3197 = vmatprep.subr.bf16.mxu1 %v2839_v5  ;;  %v2476_v4 = vld [vmem:[#allocation3 + $0x288] sm:$0xff]  ;;  %v2534_v5 = vld [vmem:[#allocation3 + $0x458] sm:$0xff] }
 0x7c5   :  { %3034 = vmatpush1.bf16.msra.mxu0 %v2836_v29  ;;  %3198 = vmatpush1.bf16.msra.mxu1 %v2838_v11  ;;  %v2484_v29 = vld [vmem:[#allocation3 + $0x2c8] sm:$0xff]  ;;  %v2597_v11 = vld [vmem:[#allocation3 + $0x650] sm:$0xff] }
 0x7c6   :  { %3208 = vmatprep.subr.bf16.mxu0 %v2400_v40  ;;  %3716 = vmatprep.subr.bf16.mxu1 %v2457_v6  ;;  %v2483_v40 = vld [vmem:[#allocation3 + $0x2c0] sm:$0xff]  ;;  %v2541_v6 = vld [vmem:[#allocation3 + $0x490] sm:$0xff] }
 0x7c8   :  { %3036 = vmatmul.mubr.bf16.vlgmr.msra.gmra.mrb[12].mxu0 %v4862_v39  ;;  %3200 = vmatmul.mubr.bf16.vlgmr.msra.gmra.mrb[20].mxu1 %v4862_v39 }
 0x7c9   :  { %3209 = vmatpush1.bf16.msra.mxu0 %v2399_v12  ;;  %3717 = vmatpush3.bf16.msra.mxu1 %v2401_v42  ;;  %v2491_v12 = vld [vmem:[#allocation3 + $0x300] sm:$0xff]  ;;  %v2604_v42 = vld [vmem:[#allocation3 + $0x688] sm:$0xff] }
 0x7ca   :  { %3210 = vmatprep.subr.bf16.mxu0 %v2407_v7  ;;  %3718 = vmatprep.subr.bf16.mxu1 %v2464_v9  ;;  %v2490_v7 = vld [vmem:[#allocation3 + $0x2f8] sm:$0xff]  ;;  %v2548_v9 = vld [vmem:[#allocation3 + $0x4c8] sm:$0xff] }
 0x7cb   :  { %3240 = vmatprep.mubr.bf16.mxu0 %v4850_v55  ;;  %3404 = vmatprep.mubr.bf16.mxu1 %v4850_v55  ;;  %v2427_v55 = vld [vmem:[#allocation3 + $0x100] sm:$0xff] }
 0x7cd   :  { %3211 = vmatpush1.bf16.msra.mxu0 %v2406_v44  ;;  %3719 = vmatpush3.bf16.msra.mxu1 %v2408_v50  ;;  %v2498_v44 = vld [vmem:[#allocation3 + $0x338] sm:$0xff]  ;;  %v2611_v50 = vld [vmem:[#allocation3 + $0x6c0] sm:$0xff] }
 0x7ce   :  { %3212 = vmatprep.subr.bf16.mxu0 %v2414_v58  ;;  %3720 = vmatprep.subr.bf16.mxu1 %v2471_v47  ;;  %v2497_v58 = vld [vmem:[#allocation3 + $0x330] sm:$0xff]  ;;  %v2555_v47 = vld [vmem:[#allocation3 + $0x500] sm:$0xff] }
 0x7d1   :  { %3213 = vmatpush1.bf16.msra.mxu0 %v2413_v41  ;;  %3721 = vmatpush3.bf16.msra.mxu1 %v2415_v51  ;;  %v2505_v41 = vld [vmem:[#allocation3 + $0x370] sm:$0xff]  ;;  %v2618_v51 = vld [vmem:[#allocation3 + $0x6f8] sm:$0xff] }
 0x7d2   :  { %3214 = vmatprep.subr.bf16.mxu0 %v2421_v43  ;;  %3722 = vmatprep.subr.bf16.mxu1 %v2478_v45  ;;  %v2504_v43 = vld [vmem:[#allocation3 + $0x368] sm:$0xff]  ;;  %v2562_v45 = vld [vmem:[#allocation3 + $0x538] sm:$0xff] }
 0x7d5   :  { %3215 = vmatpush1.bf16.msra.mxu0 %v2420_v24  ;;  %3723 = vmatpush3.bf16.msra.mxu1 %v2422_v8  ;;  %v2512_v24 = vld [vmem:[#allocation3 + $0x3a8] sm:$0xff]  ;;  %v2681_v8 = vld [vmem:[#allocation3 + $0x8f0] sm:$0xff] }
 0x7d6   :  { %3216 = vmatprep.subr.bf16.mxu0 %v2428_v13  ;;  %3724 = vmatprep.subr.bf16.mxu1 %v2485_v28  ;;  %v2511_v13 = vld [vmem:[#allocation3 + $0x3a0] sm:$0xff]  ;;  %v2625_v28 = vld [vmem:[#allocation3 + $0x730] sm:$0xff] }
 0x7d9   :  { %3217 = vmatpush1.bf16.msra.mxu0 %v2427_v55  ;;  %3725 = vmatpush3.bf16.msra.mxu1 %v2429_v48  ;;  %v2519_v55 = vld [vmem:[#allocation3 + $0x3e0] sm:$0xff]  ;;  %v2688_v48 = vld [vmem:[#allocation3 + $0x928] sm:$0xff] }
 0x7da   :  { %3218 = vmatprep.subr.bf16.mxu0 %v2435_v2  ;;  %3726 = vmatprep.subr.bf16.mxu1 %v2492_v49  ;;  %v2518_v2 = vld [vmem:[#allocation3 + $0x3d8] sm:$0xff]  ;;  %v2632_v49 = vld [vmem:[#allocation3 + $0x768] sm:$0xff] }
 0x7dd   :  { %3219 = vmatpush1.bf16.msra.mxu0 %v2434_v14  ;;  %3727 = vmatpush3.bf16.msra.mxu1 %v2436_v15  ;;  %v2526_v14 = vld [vmem:[#allocation3 + $0x418] sm:$0xff]  ;;  %v2695_v15 = vld [vmem:[#allocation3 + $0x960] sm:$0xff] }
 0x7de   :  { %3220 = vmatprep.subr.bf16.mxu0 %v2442_v34  ;;  %3728 = vmatprep.subr.bf16.mxu1 %v2499_v16  ;;  %v2525_v34 = vld [vmem:[#allocation3 + $0x410] sm:$0xff] }
 0x7df   :  { %v2533_v16 = vld [vmem:[#allocation3 + $0x450] sm:$0xff] }
 0x7e1   :  { %3221 = vmatpush1.bf16.msra.mxu0 %v2441_v53  ;;  %3729 = vmatpush3.bf16.msra.mxu1 %v2443_v27  ;;  %v2702_v53 = vld [vmem:[#allocation3 + $0x998] sm:$0xff]  ;;  %v2532_v27 = vld [vmem:[#allocation3 + $0x448] sm:$0xff] }
 0x7e2   :  { %3222 = vmatprep.subr.bf16.mxu0 %v2449_v52  ;;  %3730 = vmatprep.subr.bf16.mxu1 %v2506_v20  ;;  %v2646_v52 = vld [vmem:[#allocation3 + $0x7d8] sm:$0xff]  ;;  %v2540_v20 = vld [vmem:[#allocation3 + $0x488] sm:$0xff] }
 0x7e5   :  { %3223 = vmatpush1.bf16.msra.mxu0 %v2448_v21  ;;  %3731 = vmatpush3.bf16.msra.mxu1 %v2450_v22  ;;  %v2709_v21 = vld [vmem:[#allocation3 + $0x9d0] sm:$0xff] }
 0x7e6   :  { %3224 = vmatprep.subr.bf16.mxu0 %v2456_v56  ;;  %3738 = vmatprep.subr.bf16.mxu1 %v2569_v25  ;;  %v2653_v22 = vld [vmem:[#allocation3 + $0x810] sm:$0xff]  ;;  %v2547_v56 = vld [vmem:[#allocation3 + $0x4c0] sm:$0xff]  ;;  %v2716_v25 = vld [vmem:[#allocation3 + $0xa08] sm:$0xff] }
 0x7e8   :  { %3405 = vmatmul.mubr.bf16.vlgmr.msra.gmra.mrb[24].mxu1 %v4847_v17 }
 0x7e9   :  { %3225 = vmatpush1.bf16.msra.mxu0 %v2455_v57  ;;  %3739 = vmatpush3.bf16.msra.mxu1 %v2513_v26  ;;  %v2546_v57 = vld [vmem:[#allocation3 + $0x4b8] sm:$0xff]  ;;  %v2660_v26 = vld [vmem:[#allocation3 + $0x848] sm:$0xff] }
 0x7ea   :  { %3226 = vmatprep.subr.bf16.mxu0 %v2463_v30  ;;  %3740 = vmatprep.subr.bf16.mxu1 %v2576_v36  ;;  %v2554_v30 = vld [vmem:[#allocation3 + $0x4f8] sm:$0xff]  ;;  %v2723_v36 = vld [vmem:[#allocation3 + $0xa40] sm:$0xff] }
 0x7eb   :  { %3444 = vmatprep.mubr.bf16.mxu1 %v4856_v35 }
 0x7ed   :  { %3227 = vmatpush1.bf16.msra.mxu0 %v2462_v46  ;;  %3741 = vmatpush3.bf16.msra.mxu1 %v2520_v59  ;;  %v2553_v46 = vld [vmem:[#allocation3 + $0x4f0] sm:$0xff]  ;;  %v2667_v59 = vld [vmem:[#allocation3 + $0x880] sm:$0xff] }
 0x7ee   :  { %3228 = vmatprep.subr.bf16.mxu0 %v2470_v60  ;;  %3742 = vmatprep.subr.bf16.mxu1 %v2583_v10  ;;  %v2561_v60 = vld [vmem:[#allocation3 + $0x530] sm:$0xff]  ;;  %v2730_v10 = vld [vmem:[#allocation3 + $0xa78] sm:$0xff] }
 0x7f1   :  { %3229 = vmatpush1.bf16.msra.mxu0 %v2469_v31  ;;  %3743 = vmatpush3.bf16.msra.mxu1 %v2527_v32  ;;  %v2560_v31 = vld [vmem:[#allocation3 + $0x528] sm:$0xff]  ;;  %v2674_v32 = vld [vmem:[#allocation3 + $0x8b8] sm:$0xff] }
 0x7f2   :  { %3230 = vmatprep.subr.bf16.mxu0 %v2477_v63  ;;  %3744 = vmatprep.subr.bf16.mxu1 %v2590_v1  ;;  %v2568_v63 = vld [vmem:[#allocation3 + $0x568] sm:$0xff]  ;;  %v2793_v1 = vld [vmem:[#allocation3 + $0xc70] sm:$0xff] }
 0x7f5   :  { %3231 = vmatpush1.bf16.msra.mxu0 %v2476_v4  ;;  %3745 = vmatpush3.bf16.msra.mxu1 %v2534_v5  ;;  %v2567_v4 = vld [vmem:[#allocation3 + $0x560] sm:$0xff]  ;;  %v2737_v5 = vld [vmem:[#allocation3 + $0xab0] sm:$0xff] }
 0x7f6   :  { %3232 = vmatprep.subr.bf16.mxu0 %v2484_v29  ;;  %3746 = vmatprep.subr.bf16.mxu1 %v2597_v11  ;;  %v2575_v29 = vld [vmem:[#allocation3 + $0x5a0] sm:$0xff]  ;;  %v2800_v11 = vld [vmem:[#allocation3 + $0xca8] sm:$0xff] }
 0x7f9   :  { %3233 = vmatpush1.bf16.msra.mxu0 %v2483_v40  ;;  %3747 = vmatpush3.bf16.msra.mxu1 %v2541_v6  ;;  %v2574_v40 = vld [vmem:[#allocation3 + $0x598] sm:$0xff]  ;;  %v2744_v6 = vld [vmem:[#allocation3 + $0xae8] sm:$0xff] }
 0x7fa   :  { %3234 = vmatprep.subr.bf16.mxu0 %v2491_v12  ;;  %3748 = vmatprep.subr.bf16.mxu1 %v2604_v42  ;;  %v2582_v12 = vld [vmem:[#allocation3 + $0x5d8] sm:$0xff]  ;;  %v2807_v42 = vld [vmem:[#allocation3 + $0xce0] sm:$0xff] }
 0x7fd   :  { %3235 = vmatpush1.bf16.msra.mxu0 %v2490_v7  ;;  %3749 = vmatpush3.bf16.msra.mxu1 %v2548_v9  ;;  %v2581_v7 = vld [vmem:[#allocation3 + $0x5d0] sm:$0xff]  ;;  %v2751_v9 = vld [vmem:[#allocation3 + $0xb20] sm:$0xff] }
 0x7fe   :  { %3236 = vmatprep.subr.bf16.mxu0 %v2498_v44  ;;  %3750 = vmatprep.subr.bf16.mxu1 %v2611_v50  ;;  %v2589_v44 = vld [vmem:[#allocation3 + $0x610] sm:$0xff]  ;;  %v2814_v50 = vld [vmem:[#allocation3 + $0xd18] sm:$0xff] }
 0x801   :  { %3237 = vmatpush1.bf16.msra.mxu0 %v2497_v58  ;;  %3751 = vmatpush3.bf16.msra.mxu1 %v2555_v47  ;;  %v2588_v58 = vld [vmem:[#allocation3 + $0x608] sm:$0xff]  ;;  %v2758_v47 = vld [vmem:[#allocation3 + $0xb58] sm:$0xff] }
 0x802   :  { %3238 = vmatprep.subr.bf16.mxu0 %v2505_v41  ;;  %3752 = vmatprep.subr.bf16.mxu1 %v2618_v51  ;;  %v2596_v41 = vld [vmem:[#allocation3 + $0x648] sm:$0xff]  ;;  %v2821_v51 = vld [vmem:[#allocation3 + $0xd50] sm:$0xff] }
 0x805   :  { %3239 = vmatpush1.bf16.msra.mxu0 %v2504_v43  ;;  %3753 = vmatpush3.bf16.msra.mxu1 %v2562_v45  ;;  %v2595_v43 = vld [vmem:[#allocation3 + $0x640] sm:$0xff]  ;;  %v2765_v45 = vld [vmem:[#allocation3 + $0xb90] sm:$0xff] }
 0x806   :  { %3249 = vmatprep.subr.bf16.mxu0 %v2512_v24  ;;  %3760 = vmatprep.subr.bf16.mxu1 %v2681_v8  ;;  %v2603_v24 = vld [vmem:[#allocation3 + $0x680] sm:$0xff]  ;;  %v2828_v8 = vld [vmem:[#allocation3 + $0xd88] sm:$0xff] }
 0x808   :  { %3241 = vmatmul.mubr.bf16.vlgmr.msra.gmra.mrb[16].mxu0 %v4847_v17  ;;  %3445 = vmatmul.mubr.bf16.vlgmr.msra.gmra.mrb[28].mxu1 %v4853_v23  ;;  %v2639_v17 = vld [vmem:[#allocation3 + $0x7a0] sm:$0xff] }
 0x809   :  { %3250 = vmatpush1.bf16.msra.mxu0 %v2511_v13  ;;  %3761 = vmatpush3.bf16.msra.mxu1 %v2625_v28  ;;  %v2602_v13 = vld [vmem:[#allocation3 + $0x678] sm:$0xff]  ;;  %v2772_v28 = vld [vmem:[#allocation3 + $0xbc8] sm:$0xff] }
 0x80a   :  { %3251 = vmatprep.subr.bf16.mxu0 %v2519_v55  ;;  %3762 = vmatprep.subr.bf16.mxu1 %v2688_v48  ;;  %v2610_v55 = vld [vmem:[#allocation3 + $0x6b8] sm:$0xff]  ;;  %v2835_v48 = vld [vmem:[#allocation3 + $0xdc0] sm:$0xff] }
 0x80b   :  { %3281 = vmatprep.mubr.bf16.mxu0 %v4856_v35  ;;  %3484 = vmatprep.mubr.bf16.mxu1 %v4860_v38  ;;  %v2539_v35 = vld [vmem:[#allocation3 + $0x480] sm:$0xff] }
 0x80d   :  { %3252 = vmatpush1.bf16.msra.mxu0 %v2518_v2  ;;  %3763 = vmatpush3.bf16.msra.mxu1 %v2632_v49  ;;  %v2609_v2 = vld [vmem:[#allocation3 + $0x6b0] sm:$0xff]  ;;  %v2779_v49 = vld [vmem:[#allocation3 + $0xc00] sm:$0xff] }
 0x80e   :  { %3253 = vmatprep.subr.bf16.mxu0 %v2526_v14  ;;  %3764 = vmatprep.subr.bf16.mxu1 %v2695_v15  ;;  %v2617_v14 = vld [vmem:[#allocation3 + $0x6f0] sm:$0xff]  ;;  %v2842_v15 = vld [vmem:[#allocation3 + $0xdf8] sm:$0xff] }
 0x811   :  { %3254 = vmatpush1.bf16.msra.mxu0 %v2525_v34  ;;  %3765 = vmatpush3.bf16.msra.mxu1 %v2639_v17  ;;  %v2616_v34 = vld [vmem:[#allocation3 + $0x6e8] sm:$0xff]  ;;  %v2786_v17 = vld [vmem:[#allocation3 + $0xc38] sm:$0xff] }
 0x812   :  { %3255 = vmatprep.subr.bf16.mxu0 %v2533_v16  ;;  %3766 = vmatprep.subr.bf16.mxu1 %v2702_v53  ;;  %v2624_v16 = vld [vmem:[#allocation3 + $0x728] sm:$0xff]  ;;  %v2623_v53 = vld [vmem:[#allocation3 + $0x720] sm:$0xff] }
 0x815   :  { %3256 = vmatpush1.bf16.msra.mxu0 %v2532_v27  ;;  %3767 = vmatpush3.bf16.msra.mxu1 %v2646_v52  ;;  %v2631_v27 = vld [vmem:[#allocation3 + $0x760] sm:$0xff]  ;;  %v2630_v52 = vld [vmem:[#allocation3 + $0x758] sm:$0xff] }
 0x816   :  { %3257 = vmatprep.subr.bf16.mxu0 %v2540_v20  ;;  %3768 = vmatprep.subr.bf16.mxu1 %v2709_v21  ;;  %v2638_v20 = vld [vmem:[#allocation3 + $0x798] sm:$0xff]  ;;  %v2637_v21 = vld [vmem:[#allocation3 + $0x790] sm:$0xff] }
 0x819   :  { %3258 = vmatpush1.bf16.msra.mxu0 %v2539_v35  ;;  %3769 = vmatpush3.bf16.msra.mxu1 %v2653_v22  ;;  %v2645_v35 = vld [vmem:[#allocation3 + $0x7d0] sm:$0xff]  ;;  %v2644_v22 = vld [vmem:[#allocation3 + $0x7c8] sm:$0xff] }
 0x81a   :  { %3259 = vmatprep.subr.bf16.mxu0 %v2547_v56  ;;  %3770 = vmatprep.subr.bf16.mxu1 %v2716_v25  ;;  %v2652_v56 = vld [vmem:[#allocation3 + $0x808] sm:$0xff]  ;;  %v2651_v25 = vld [vmem:[#allocation3 + $0x800] sm:$0xff] }
 0x81d   :  { %3260 = vmatpush1.bf16.msra.mxu0 %v2546_v57  ;;  %3771 = vmatpush3.bf16.msra.mxu1 %v2660_v26  ;;  %v2658_v57 = vld [vmem:[#allocation3 + $0x838] sm:$0xff] }
 0x81e   :  { %3261 = vmatprep.subr.bf16.mxu0 %v2554_v30  ;;  %3772 = vmatprep.subr.bf16.mxu1 %v2723_v36  ;;  %v2666_v26 = vld [vmem:[#allocation3 + $0x878] sm:$0xff]  ;;  %v2673_v30 = vld [vmem:[#allocation3 + $0x8b0] sm:$0xff]  ;;  %v2672_v36 = vld [vmem:[#allocation3 + $0x8a8] sm:$0xff] }
 0x821   :  { %3262 = vmatpush1.bf16.msra.mxu0 %v2553_v46  ;;  %3773 = vmatpush3.bf16.msra.mxu1 %v2667_v59  ;;  %v2680_v46 = vld [vmem:[#allocation3 + $0x8e8] sm:$0xff]  ;;  %v2679_v59 = vld [vmem:[#allocation3 + $0x8e0] sm:$0xff] }
 0x822   :  { %3263 = vmatprep.subr.bf16.mxu0 %v2561_v60  ;;  %3774 = vmatprep.subr.bf16.mxu1 %v2730_v10  ;;  %v2687_v60 = vld [vmem:[#allocation3 + $0x920] sm:$0xff]  ;;  %v2686_v10 = vld [vmem:[#allocation3 + $0x918] sm:$0xff] }
 0x825   :  { %3264 = vmatpush1.bf16.msra.mxu0 %v2560_v31  ;;  %3775 = vmatpush3.bf16.msra.mxu1 %v2674_v32  ;;  %v2694_v31 = vld [vmem:[#allocation3 + $0x958] sm:$0xff]  ;;  %v2693_v32 = vld [vmem:[#allocation3 + $0x950] sm:$0xff] }
 0x826   :  { %3265 = vmatprep.subr.bf16.mxu0 %v2568_v63  ;;  %3782 = vmatprep.subr.bf16.mxu1 %v2793_v1  ;;  %v2701_v63 = vld [vmem:[#allocation3 + $0x990] sm:$0xff]  ;;  %v2700_v1 = vld [vmem:[#allocation3 + $0x988] sm:$0xff] }
 0x828   :  { %3485 = vmatmul.mubr.bf16.vlgmr.msra.gmra.mrb[32].mxu1 %v4858_v37 }
 0x829   :  { %3266 = vmatpush1.bf16.msra.mxu0 %v2567_v4  ;;  %3783 = vmatpush3.bf16.msra.mxu1 %v2737_v5  ;;  %v2708_v4 = vld [vmem:[#allocation3 + $0x9c8] sm:$0xff]  ;;  %v2707_v5 = vld [vmem:[#allocation3 + $0x9c0] sm:$0xff] }
 0x82a   :  { %3267 = vmatprep.subr.bf16.mxu0 %v2575_v29  ;;  %3784 = vmatprep.subr.bf16.mxu1 %v2800_v11  ;;  %v2715_v29 = vld [vmem:[#allocation3 + $0xa00] sm:$0xff]  ;;  %v2714_v11 = vld [vmem:[#allocation3 + $0x9f8] sm:$0xff] }
 0x82b   :  { %3524 = vmatprep.mubr.bf16.mxu1 %v4864_v3 }
 0x82d   :  { %3268 = vmatpush1.bf16.msra.mxu0 %v2574_v40  ;;  %3785 = vmatpush3.bf16.msra.mxu1 %v2744_v6  ;;  %v2722_v40 = vld [vmem:[#allocation3 + $0xa38] sm:$0xff]  ;;  %v2721_v6 = vld [vmem:[#allocation3 + $0xa30] sm:$0xff] }
 0x82e   :  { %3269 = vmatprep.subr.bf16.mxu0 %v2582_v12  ;;  %3786 = vmatprep.subr.bf16.mxu1 %v2807_v42  ;;  %v2729_v12 = vld [vmem:[#allocation3 + $0xa70] sm:$0xff]  ;;  %v2728_v42 = vld [vmem:[#allocation3 + $0xa68] sm:$0xff] }
 0x831   :  { %3270 = vmatpush1.bf16.msra.mxu0 %v2581_v7  ;;  %3787 = vmatpush3.bf16.msra.mxu1 %v2751_v9  ;;  %v2736_v7 = vld [vmem:[#allocation3 + $0xaa8] sm:$0xff]  ;;  %v2735_v9 = vld [vmem:[#allocation3 + $0xaa0] sm:$0xff] }
 0x832   :  { %3271 = vmatprep.subr.bf16.mxu0 %v2589_v44  ;;  %3788 = vmatprep.subr.bf16.mxu1 %v2814_v50  ;;  %v2743_v44 = vld [vmem:[#allocation3 + $0xae0] sm:$0xff]  ;;  %v2742_v50 = vld [vmem:[#allocation3 + $0xad8] sm:$0xff] }
 0x835   :  { %3272 = vmatpush1.bf16.msra.mxu0 %v2588_v58  ;;  %3789 = vmatpush3.bf16.msra.mxu1 %v2758_v47  ;;  %v2750_v58 = vld [vmem:[#allocation3 + $0xb18] sm:$0xff]  ;;  %v2749_v47 = vld [vmem:[#allocation3 + $0xb10] sm:$0xff] }
 0x836   :  { %3273 = vmatprep.subr.bf16.mxu0 %v2596_v41  ;;  %3790 = vmatprep.subr.bf16.mxu1 %v2821_v51  ;;  %v2757_v41 = vld [vmem:[#allocation3 + $0xb50] sm:$0xff]  ;;  %v2756_v51 = vld [vmem:[#allocation3 + $0xb48] sm:$0xff] }
 0x839   :  { %3274 = vmatpush1.bf16.msra.mxu0 %v2595_v43  ;;  %3791 = vmatpush3.bf16.msra.mxu1 %v2765_v45  ;;  %v2764_v43 = vld [vmem:[#allocation3 + $0xb88] sm:$0xff] }
 0x83a   :  { %3275 = vmatprep.subr.bf16.mxu0 %v2603_v24  ;;  %3792 = vmatprep.subr.bf16.mxu1 %v2828_v8  ;;  %v4897_v45 = vld [vmem:[#allocation19] sm:$0xff] }
 0x83b   :  { %v2763_v24 = vld [vmem:[#allocation3 + $0xb80] sm:$0xff]  ;;  %v2856_v8 = vrot.slane %v4897_v45, %v4648_v18 }
 0x83d   :  { %3276 = vmatpush1.bf16.msra.mxu0 %v2602_v13  ;;  %3793 = vmatpush3.bf16.msra.mxu1 %v2772_v28  ;;  %v2852_v13 = vrot.slane %v4897_v45, %v4600_v33  ;;  %v2860_v28 = vrot.slane %v4897_v45, %v4651_v19  ;;  %v2777_v19 = vld [vmem:[#allocation3 + $0xbf0] sm:$0xff] }
 0x83e   :  { %3277 = vmatprep.subr.bf16.mxu0 %v2610_v55  ;;  %3794 = vmatprep.subr.bf16.mxu1 %v2835_v48  ;;  %v2770_v55 = vld [vmem:[#allocation3 + $0xbb8] sm:$0xff] }
 0x841   :  { %3278 = vmatpush1.bf16.msra.mxu0 %v2609_v2  ;;  %3795 = vmatpush3.bf16.msra.mxu1 %v2779_v49  ;;  %v2778_v49 = vld [vmem:[#allocation3 + $0xbf8] sm:$0xff] }
 0x842   :  { %3279 = vmatprep.subr.bf16.mxu0 %v2617_v14  ;;  %3796 = vmatprep.subr.bf16.mxu1 %v2842_v15 }
 0x845   :  { %3280 = vmatpush1.bf16.msra.mxu0 %v2616_v34  ;;  %3797 = vmatpush3.bf16.msra.mxu1 %v2786_v17 }
 0x846   :  { %3290 = vmatprep.subr.bf16.mxu0 %v2624_v16 }
 0x848   :  { %3282 = vmatmul.mubr.bf16.vlgmr.msra.gmra.mrb[16].mxu0 %v4853_v23  ;;  %3525 = vmatmul.mubr.bf16.vlgmr.msra.gmra.mrb[36].mxu1 %v4862_v39  ;;  %v2659_v23 = vld [vmem:[#allocation3 + $0x840] sm:$0xff] }
 0x849   :  { %3291 = vmatpush1.bf16.msra.mxu0 %v2623_v53  ;;  %3322 = vmatprep.mubr.bf16.mxu0 %v4860_v38  ;;  %v2665_v38 = vld [vmem:[#allocation3 + $0x870] sm:$0xff] }
 0x84a   :  { %3292 = vmatprep.subr.bf16.mxu0 %v2631_v27 }
 0x84d   :  { %3293 = vmatpush1.bf16.msra.mxu0 %v2630_v52 }
 0x84e   :  { %3294 = vmatprep.subr.bf16.mxu0 %v2638_v20 }
 0x851   :  { %3295 = vmatpush1.bf16.msra.mxu0 %v2637_v21 }
 0x852   :  { %3296 = vmatprep.subr.bf16.mxu0 %v2645_v35 }
 0x855   :  { %3297 = vmatpush1.bf16.msra.mxu0 %v2644_v22  ;;  %v2785_v22 = vld [vmem:[#allocation3 + $0xc30] sm:$0xff] }
 0x856   :  { %3298 = vmatprep.subr.bf16.mxu0 %v2652_v56 }
 0x859   :  { %3299 = vmatpush1.bf16.msra.mxu0 %v2651_v25 }
 0x85a   :  { %3300 = vmatprep.subr.bf16.mxu0 %v2659_v23 }
 0x85d   :  { %3301 = vmatpush1.bf16.msra.mxu0 %v2658_v57 }
 0x85e   :  { %3302 = vmatprep.subr.bf16.mxu0 %v2666_v26  ;;  %v2784_v26 = vld [vmem:[#allocation3 + $0xc28] sm:$0xff] }
 0x861   :  { %3303 = vmatpush1.bf16.msra.mxu0 %v2665_v38  ;;  %v2792_v38 = vld [vmem:[#allocation3 + $0xc68] sm:$0xff] }
 0x862   :  { %3304 = vmatprep.subr.bf16.mxu0 %v2673_v30  ;;  %v2791_v30 = vld [vmem:[#allocation3 + $0xc60] sm:$0xff] }
 0x865   :  { %3305 = vmatpush1.bf16.msra.mxu0 %v2672_v36  ;;  %v2799_v36 = vld [vmem:[#allocation3 + $0xca0] sm:$0xff] }
 0x866   :  { %3306 = vmatprep.subr.bf16.mxu0 %v2680_v46  ;;  %v2798_v46 = vld [vmem:[#allocation3 + $0xc98] sm:$0xff] }
 0x869   :  { %3307 = vmatpush1.bf16.msra.mxu0 %v2679_v59  ;;  %v2806_v59 = vld [vmem:[#allocation3 + $0xcd8] sm:$0xff] }
 0x86a   :  { %3308 = vmatprep.subr.bf16.mxu0 %v2687_v60 }
 0x86d   :  { %3309 = vmatpush1.bf16.msra.mxu0 %v2686_v10 }
 0x86e   :  { %3310 = vmatprep.subr.bf16.mxu0 %v2694_v31 }
 0x871   :  { %3311 = vmatpush1.bf16.msra.mxu0 %v2693_v32 }
 0x872   :  { %3312 = vmatprep.subr.bf16.mxu0 %v2701_v63 }
 0x875   :  { %3313 = vmatpush1.bf16.msra.mxu0 %v2700_v1  ;;  %v2805_v1 = vld [vmem:[#allocation3 + $0xcd0] sm:$0xff] }
 0x876   :  { %3314 = vmatprep.subr.bf16.mxu0 %v2708_v4 }
 0x879   :  { %3315 = vmatpush1.bf16.msra.mxu0 %v2707_v5 }
 0x87a   :  { %3316 = vmatprep.subr.bf16.mxu0 %v2715_v29  ;;  %v2813_v29 = vld [vmem:[#allocation3 + $0xd10] sm:$0xff] }
 0x87d   :  { %3317 = vmatpush1.bf16.msra.mxu0 %v2714_v11 }
 0x87e   :  { %3318 = vmatprep.subr.bf16.mxu0 %v2722_v40  ;;  %v2812_v40 = vld [vmem:[#allocation3 + $0xd08] sm:$0xff] }
 0x881   :  { %3319 = vmatpush1.bf16.msra.mxu0 %v2721_v6  ;;  %v2820_v6 = vld [vmem:[#allocation3 + $0xd48] sm:$0xff] }
 0x882   :  { %3320 = vmatprep.subr.bf16.mxu0 %v2729_v12  ;;  %v2819_v12 = vld [vmem:[#allocation3 + $0xd40] sm:$0xff] }
 0x885   :  { %3321 = vmatpush1.bf16.msra.mxu0 %v2728_v42  ;;  %v2827_v42 = vld [vmem:[#allocation3 + $0xd80] sm:$0xff] }
 0x886   :  { %3331 = vmatprep.subr.bf16.mxu0 %v2736_v7 }
 0x888   :  { %3323 = vmatmul.mubr.bf16.vlgmr.msra.gmra.mrb[16].mxu0 %v4858_v37  ;;  %v2771_v37 = vld [vmem:[#allocation3 + $0xbc0] sm:$0xff] }
 0x889   :  { %3332 = vmatpush1.bf16.msra.mxu0 %v2735_v9  ;;  %3363 = vmatprep.mubr.bf16.mxu0 %v4864_v3  ;;  %v2848_v3 = vrot.slane %v4897_v45, %v4590_v54 }
 0x88a   :  { %3333 = vmatprep.subr.bf16.mxu0 %v2743_v44  ;;  %v2826_v44 = vld [vmem:[#allocation3 + $0xd78] sm:$0xff] }
 0x88d   :  { %3334 = vmatpush1.bf16.msra.mxu0 %v2742_v50 }
 0x88e   :  { %3335 = vmatprep.subr.bf16.mxu0 %v2750_v58  ;;  %v2834_v58 = vld [vmem:[#allocation3 + $0xdb8] sm:$0xff] }
 0x891   :  { %3336 = vmatpush1.bf16.msra.mxu0 %v2749_v47 }
 0x892   :  { %3337 = vmatprep.subr.bf16.mxu0 %v2757_v41 }
 0x895   :  { %3338 = vmatpush1.bf16.msra.mxu0 %v2756_v51 }
 0x896   :  { %3339 = vmatprep.subr.bf16.mxu0 %v2764_v43 }
 0x899   :  { %3340 = vmatpush1.bf16.msra.mxu0 %v2763_v24 }
 0x89a   :  { %3341 = vmatprep.subr.bf16.mxu0 %v2771_v37  ;;  %v2833_v37 = vld [vmem:[#allocation3 + $0xdb0] sm:$0xff] }
 0x89b   :  { %v3037_v48 = vpop.f32.mrb[12].mxu0  ;;  %v3201_v2 = vpop.f32.mrb[20].mxu1 }
 0x89c   :  { %v3824_v14 = vadd.f32 %v3037_v48, %v2848_v3  ;;  %v3826_v15 = vadd.f32 %v3201_v2, %v2856_v8  ;;  %v3039_v34 = vpop.f32.mrb[13].mxu0  ;;  %v3203_v17 = vpop.f32.mrb[21].mxu1  ;;  %v2841_v8 = vld [vmem:[#allocation3 + $0xdf0] sm:$0xff] }
 0x89d   :  { %v3825_v54 = vadd.f32 %v3039_v34, %v2852_v13  ;;  %v3827_v16 = vadd.f32 %v3203_v17, %v2860_v28  ;;  %v3041_v53 = vpop.f32.mrb[14].mxu0  ;;  %v3205_v18 = vpop.f32.mrb[22].mxu1  ;;  %3342 = vmatpush1.bf16.msra.mxu0 %v2770_v55  ;;  %v2840_v13 = vld [vmem:[#allocation3 + $0xde8] sm:$0xff]  ;;  %v2872_v28 = vrot.slane %v4897_v45, %v4780_v0 }
 0x89e   :  { %v3532_v27 = vsub.f32 0.0, %v3824_v14  ;;  %v3534_v52 = vsub.f32 0.0, %v3826_v15  ;;  %v3042_v33 = vpop.f32.mrb[15].mxu0  ;;  %v3206_v20 = vpop.f32.mrb[23].mxu1  ;;  %3343 = vmatprep.subr.bf16.mxu0 %v2778_v49 }
 0x89f   :  { %v3533_v21 = vsub.f32 0.0, %v3825_v54  ;;  %v3535_v35 = vsub.f32 0.0, %v3827_v16 }
 0x8a0   :  { %v3539_v56 = vmul.f32 1.442695, %v3532_v27  ;;  %v3543_v25 = vmul.f32 1.442695, %v3534_v52 }
 0x8a1   :  { %v3541_v23 = vmul.f32 1.442695, %v3533_v21  ;;  %v3545_v57 = vmul.f32 1.442695, %v3535_v35  ;;  %3344 = vmatpush1.bf16.msra.mxu0 %v2777_v19 }
 0x8a2   :  { %4102 = vpow2.f32 %v3539_v56  ;;  %3345 = vmatprep.subr.bf16.mxu0 %v2785_v22 }
 0x8a3   :  { %4104 = vpow2.f32 %v3543_v25 }
 0x8a4   :  { %4106 = vpow2.f32 %v3541_v23  ;;  %v2864_v23 = vrot.slane %v4897_v45, %v4774_v61 }
 0x8a5   :  { %4108 = vpow2.f32 %v3545_v57  ;;  %3346 = vmatpush1.bf16.msra.mxu0 %v2784_v26  ;;  %v2868_v57 = vrot.slane %v4897_v45, %v4777_v62 }
 0x8a6   :  { %3347 = vmatprep.subr.bf16.mxu0 %v2792_v38 }
 0x8a9   :  { %3348 = vmatpush1.bf16.msra.mxu0 %v2791_v30 }
 0x8aa   :  { %3349 = vmatprep.subr.bf16.mxu0 %v2799_v36 }
 0x8ac   :  { %v4103_v60 = vpop.eup %4102 }
 0x8ad   :  { %v4105_v10 = vpop.eup %4104  ;;  %v3553_v31 = vadd.f32 1.0, %v4103_v60  ;;  %3350 = vmatpush1.bf16.msra.mxu0 %v2798_v46 }
 0x8ae   :  { %v4107_v32 = vpop.eup %4106  ;;  %v3555_v63 = vadd.f32 1.0, %v4105_v10  ;;  %3351 = vmatprep.subr.bf16.mxu0 %v2806_v59 }
 0x8af   :  { %v4109_v4 = vpop.eup %4108  ;;  %4110 = vrcp.f32 %v3553_v31  ;;  %v3554_v5 = vadd.f32 1.0, %v4107_v32 }
 0x8b0   :  { %4112 = vrcp.f32 %v3555_v63  ;;  %v3556_v11 = vadd.f32 1.0, %v4109_v4 }
 0x8b1   :  { %4114 = vrcp.f32 %v3554_v5  ;;  %3352 = vmatpush1.bf16.msra.mxu0 %v2805_v1 }
 0x8b2   :  { %4116 = vrcp.f32 %v3556_v11  ;;  %3353 = vmatprep.subr.bf16.mxu0 %v2813_v29 }
 0x8b5   :  { %3354 = vmatpush1.bf16.msra.mxu0 %v2812_v40 }
 0x8b6   :  { %3355 = vmatprep.subr.bf16.mxu0 %v2820_v6 }
 0x8b9   :  { %v4111_v7 = vpop.eup %4110  ;;  %3356 = vmatpush1.bf16.msra.mxu0 %v2819_v12 }
 0x8ba   :  { %v4113_v9 = vpop.eup %4112  ;;  %3574 = vst [vmem:[#allocation20] sm:$0xff] %v4111_v7  ;;  %3357 = vmatprep.subr.bf16.mxu0 %v2827_v42 }
 0x8bb   :  { %v4115_v50 = vpop.eup %4114  ;;  %3576 = vst [vmem:[#allocation20 + $0x10] sm:$0xff] %v4113_v9  ;;  %v3732_v47 = vpop.f32.mrb[24].mxu1 }
 0x8bc   :  { %v4117_v41 = vpop.eup %4116  ;;  %3575 = vst [vmem:[#allocation20 + $0x8] sm:$0xff] %v4115_v50  ;;  %v3733_v51 = vpop.f32.mrb[25].mxu1 }
 0x8bd   :  { %3577 = vst [vmem:[#allocation20 + $0x18] sm:$0xff] %v4117_v41  ;;  %3358 = vmatpush1.bf16.msra.mxu0 %v2826_v44  ;;  %v3734_v43 = vadd.f32 %v3733_v51, %v3732_v47  ;;  %v3735_v24 = vpop.f32.mrb[26].mxu1 }
 0x8be   :  { %3359 = vmatprep.subr.bf16.mxu0 %v2834_v58  ;;  %v3736_v3 = vpop.f32.mrb[27].mxu1 }
 0x8bf   :  { %v3407_v55 = vadd.f32 %v3734_v43, %v2872_v28 }
 0x8c1   :  { %3360 = vmatpush1.bf16.msra.mxu0 %v2833_v37 }
 0x8c2   :  { %3361 = vmatprep.subr.bf16.mxu0 %v2841_v8 }
 0x8c5   :  { %3362 = vmatpush1.bf16.msra.mxu0 %v2840_v13 }
 0x8c8   :  { %3364 = vmatmul.mubr.bf16.vlgmr.msra.gmra.mrb[16].mxu0 %v4862_v39 }
 0x8db   :  { %v3754_v48 = vpop.f32.mrb[28].mxu1 }
 0x8dc   :  { %v3755_v2 = vpop.f32.mrb[29].mxu1 }
 0x8dd   :  { %v3756_v49 = vadd.f32 %v3755_v2, %v3754_v48  ;;  %v3757_v14 = vpop.f32.mrb[30].mxu1 }
 0x8de   :  { %v3758_v15 = vpop.f32.mrb[31].mxu1 }
 0x8df   :  { %v3447_v34 = vadd.f32 %v3756_v49, %v3407_v55 }
 0x8fb   :  { %v3776_v17 = vpop.f32.mrb[32].mxu1 }
 0x8fc   :  { %v3777_v54 = vpop.f32.mrb[33].mxu1 }
 0x8fd   :  { %v3778_v16 = vadd.f32 %v3777_v54, %v3776_v17  ;;  %v3779_v53 = vpop.f32.mrb[34].mxu1 }
 0x8fe   :  { %v3780_v18 = vpop.f32.mrb[35].mxu1 }
 0x8ff   :  { %v3487_v27 = vadd.f32 %v3778_v16, %v3447_v34 }
 0x91b   :  { %v3798_v52 = vpop.f32.mrb[36].mxu1 }
 0x91c   :  { %v3799_v33 = vpop.f32.mrb[37].mxu1 }
 0x91d   :  { %v3800_v20 = vadd.f32 %v3799_v33, %v3798_v52  ;;  %v3801_v39 = vpop.f32.mrb[38].mxu1 }
 0x91e   :  { %v3802_v19 = vpop.f32.mrb[39].mxu1 }
 0x91f   :  { %v3527_v21 = vadd.f32 %v3800_v20, %v3487_v27 }
 0x921   :  { %v3538_v0 = vsub.f32 0.0, %v3527_v21 }
 0x923   :  { %v3551_v35 = vmul.f32 1.442695, %v3538_v0 }
 0x925   :  { %4118 = vpow2.f32 %v3551_v35 }
 0x92f   :  { %v4119_v22 = vpop.eup %4118 }
 0x930   :  { %v3559_v56 = vadd.f32 1.0, %v4119_v22 }
 0x932   :  { %4120 = vrcp.f32 %v3559_v56 }
 0x93c   :  { %v4121_v25 = vpop.eup %4120 }
 0x93d   :  { %3580 = vst [vmem:[#allocation20 + $0x30] sm:$0xff] %v4121_v25 }
 0x99b   :  { %v3365_v26 = vpop.f32.mrb[16].mxu0 }
 0x99c   :  { %v3828_v38 = vadd.f32 %v3365_v26, %v2864_v23  ;;  %v3367_v30 = vpop.f32.mrb[17].mxu0 }
 0x99d   :  { %v3829_v36 = vadd.f32 %v3367_v30, %v2868_v57  ;;  %v3369_v46 = vpop.f32.mrb[18].mxu0 }
 0x99e   :  { %v3536_v59 = vsub.f32 0.0, %v3828_v38  ;;  %v3370_v60 = vpop.f32.mrb[19].mxu0 }
 0x99f   :  { %v3537_v10 = vsub.f32 0.0, %v3829_v36 }
 0x9a0   :  { %v3547_v31 = vmul.f32 1.442695, %v3536_v59 }
 0x9a1   :  { %v3549_v32 = vmul.f32 1.442695, %v3537_v10 }
 0x9a2   :  { %4122 = vpow2.f32 %v3547_v31 }
 0x9a3   :  { %4124 = vpow2.f32 %v3549_v32 }
 0x9ac   :  { %v4123_v63 = vpop.eup %4122 }
 0x9ad   :  { %v4125_v1 = vpop.eup %4124  ;;  %v3557_v4 = vadd.f32 1.0, %v4123_v63 }
 0x9ae   :  { %v3558_v5 = vadd.f32 1.0, %v4125_v1 }
 0x9af   :  { %4126 = vrcp.f32 %v3557_v4 }
 0x9b0   :  { %4128 = vrcp.f32 %v3558_v5 }
 0x9b9   :  { %v4127_v61 = vpop.eup %4126 }
 0x9ba   :  { %v4129_v62 = vpop.eup %4128  ;;  %3578 = vst [vmem:[#allocation20 + $0x20] sm:$0xff] %v4127_v61 }
 0x9bb   :  { %3579 = vst [vmem:[#allocation20 + $0x28] sm:$0xff] %v4129_v62 }
 0x9bc   :  { %4339 = shalt.err (!%p4336_p6)
}
 0x9bd   :  { %s4340_s14 = scalar_lea.hbm %s4937_s11, 896 }
 0x9be   :  { %p4341_p7 = scmp.ne.s32.totalorder %s4937_s11, %s4340_s14  ;;  %p4344_p8 = scmp.lt.u32.totalorder %s4340_s14, %s4937_s11 }
 0x9c0   :  { %p4346_p9 = pnand %p4344_p8, %p4341_p7 }
 0x9c2   :  { %4349 = shalt.err (!%p4346_p9)
}
 0x9c3   :  { %3590 = dma.vmem_to_hbm [thread:$0]  %s3588_s27, 896, %s4937_s11, [#allocation7]  }
 0x9c4   :  { %4364 = dma.done.wait [#allocation7], 896  }
 0x9c5   :  { %4365 = vsyncadd [#allocation7], 4294966400 }
 0x9c6   :  { %3594 = vsyncpa [#allocation6], 1 }
 0x9c7   :  { %3595 = vsyncpa [#allocation9], 1 }
 0x9c8   :  { %3596 = vsyncpa [#allocation12], 1 }
 0x9c9   :  { %3597 = vsyncpa [#allocation15], 1 }
 0x9ca   :  { %3598 = vsyncpa [#allocation18], 1 }
 0x9cb   :  { %3599 = vsyncpa [#allocation7], 1 }
 0x9cc   :  { %3600 = vsyncmov [#allocation4] }
 0x9cf   :  { %s3601_s19 = vpop.sfrf %3600 }
 0x9d0   :  { %p3705_p10 = scmp.ne.s32.totalorder %s3601_s19, 0 }
 0x9d2   :  { %3605 = shalt.err (%p3705_p10)  }
 0x9d3   :  { %3607 = vsyncmov [#allocation4 + $0x1] }
 0x9d6   :  { %s3608_s13 = vpop.sfrf %3607 }
 0x9d7   :  { %p3706_p11 = scmp.ne.s32.totalorder %s3608_s13, 0 }
 0x9d9   :  { %3612 = shalt.err (%p3706_p11)  }

</bundles_post_ra>
